<compile_context>
chip_gen: v7x
topology: tpu7x:2x2x1
jax: 0.10.0
libtpu: 0.0.40
codegen_flags: <defaults>
</compile_context>

<pallas_src>
import functools

import jax
import jax.numpy as jnp
from jax.experimental import pallas as pl
from jax.experimental.pallas import tpu as pltpu

# ------------------------- small synthetic config -------------------------
VOCAB = 256
HIDDEN = 128
NUM_HEADS = 4
NUM_KV_HEADS = 2
HEAD_DIM = HIDDEN // NUM_HEADS          # 32
Q_SIZE = NUM_HEADS * HEAD_DIM           # 128
KV_SIZE = NUM_KV_HEADS * HEAD_DIM       # 64
INTERMEDIATE = 256
NUM_EXPERTS = 4
TOP_K = 2
NUM_SHARED_EXPERTS = 1
NUM_LAYERS = 2
RMS_EPS = 1e-6
ROPE_THETA = 10000.0
SEQ = 16                                # TODO(synk): tiny demo seq; MXU needs >=128 rows at scale
DTYPE = jnp.float32                     # activation dtype (weights stored bf16)
VMEM_LIMIT = 32 * 1024 * 1024

assert HIDDEN % NUM_HEADS == 0
assert NUM_HEADS % NUM_KV_HEADS == 0
assert HEAD_DIM % 2 == 0
# The packed-RoPE roll trick in _attn_block_kernel is only valid because every head
# block in the [Q | K | V] lane packing is HEAD_DIM-wide and HEAD_DIM-aligned and
# half = HEAD_DIM // 2 < HEAD_DIM, so the full-width rolls never cross a head / Q-K
# boundary.  Changing the packing or HEAD_DIM requires revisiting the roll shifts.
assert Q_SIZE % HEAD_DIM == 0 and KV_SIZE % HEAD_DIM == 0


# =======================================================================
# Kernel 1: fused  (add+rmsnorm) -> qkv -> rope -> attention -> o_proj
#                  -> (add+rmsnorm) -> router logits -> softmax/top-k gates
# =======================================================================
def _attn_block_kernel(x_ref, res_ref, ln1_ref, wqkv_ref, cos_ref, sin_ref,
                       wo_ref, ln2_ref, wr_ref,
                       h_ref, res_out_ref, gates_ref, counts_ref, *, eps):
    f32 = jnp.float32
    bf16 = jnp.bfloat16
    t = x_ref.shape[0]

    # ---- fused residual add + input RMSNorm (f32) ----
    s = x_ref[...].astype(f32) + res_ref[...].astype(f32)             # [T, H]
    var = jnp.mean(s * s, axis=-1, keepdims=True)
    h = s * jax.lax.rsqrt(var + eps) * ln1_ref[...].astype(f32)

    # ---- packed qkv projection (bf16 MXU, f32 accumulation) ----
    qkv = jnp.dot(h.astype(bf16), wqkv_ref[...],
                  preferred_element_type=f32)                          # [T, Q+2KV]

    # ---- neox RoPE applied once on the packed qkv.
    #      cos/sin tables already carry the attention scale (head_dim**-0.5) on the
    #      Q lanes and cos=1 / sin=0 on the V lanes.
    half = HEAD_DIM // 2
    width = qkv.shape[-1]
    lane = jax.lax.broadcasted_iota(jnp.int32, qkv.shape, 1)
    first_half = (lane % HEAD_DIM) < half
    rot = jnp.where(first_half,
                    -pltpu.roll(qkv, width - half, 1),                 # x[j + half]
                    pltpu.roll(qkv, half, 1))                          # x[j - half]
    qkv = qkv * cos_ref[...] + rot * sin_ref[...]

    q = qkv[:, :Q_SIZE]                                                # [T, 128]
    k = qkv[:, Q_SIZE:Q_SIZE + KV_SIZE]                                # [T, 64]
    v = qkv[:, Q_SIZE + KV_SIZE:]                                      # [T, 64]

    # ---- causal attention, all heads batched into one [NH, T, D] einsum pair ----
    # TODO(synk): at production head_dim replace the lane slices below with a single
    #             head-major relayout (pltpu.einshape) / flash-style restructuring.
    group = NUM_HEADS // NUM_KV_HEADS
    d = HEAD_DIM
    q3 = jnp.stack([q[:, n * d:(n + 1) * d] for n in range(NUM_HEADS)], axis=0)
    k_sl = [k[:, g * d:(g + 1) * d] for g in range(NUM_KV_HEADS)]
    v_sl = [v[:, g * d:(g + 1) * d] for g in range(NUM_KV_HEADS)]
    k3 = jnp.stack([k_sl[n // group] for n in range(NUM_HEADS)], axis=0)   # GQA expand
    v3 = jnp.stack([v_sl[n // group] for n in range(NUM_HEADS)], axis=0)

    row = jax.lax.broadcasted_iota(jnp.int32, (t, t), 0)
    col = jax.lax.broadcasted_iota(jnp.int32, (t, t), 1)
    causal = (col <= row)[None, :, :]

    sc = jnp.einsum('htd,hsd->hts', q3.astype(bf16), k3.astype(bf16),
                    preferred_element_type=f32)                        # scale folded into RoPE tables
    sc = jnp.where(causal, sc, -1e30)                                  # keep mask+softmax in f32
    m = jnp.max(sc, axis=-1, keepdims=True)
    p = jnp.exp(sc - m)
    p = p * pl.reciprocal(jnp.sum(p, axis=-1, keepdims=True), approx=True)
    o3 = jnp.einsum('hts,hsd->htd', p.astype(bf16), v3.astype(bf16),
                    preferred_element_type=f32)                        # [NH, T, D]
    attn = jnp.concatenate([o3[n] for n in range(NUM_HEADS)], axis=-1)  # [T, NH*D] lane-dense

    # ---- o_proj + fused residual add + post-attention RMSNorm ----
    o = jnp.dot(attn.astype(bf16), wo_ref[...], preferred_element_type=f32)
    s2 = o + s
    res_out_ref[...] = s2.astype(res_out_ref.dtype)
    var2 = jnp.mean(s2 * s2, axis=-1, keepdims=True)
    h2 = s2 * jax.lax.rsqrt(var2 + eps) * ln2_ref[...].astype(f32)
    h_ref[...] = h2.astype(h_ref.dtype)

    # ---- fused MoE gating: router logits -> softmax -> top-k dense gates ----
    # renormalize=False (norm_topk_prob default): gates are the raw softmax probs of
    # the selected experts.
    logits = jnp.dot(h2.astype(bf16), wr_ref[...], preferred_element_type=f32)  # [T, E]
    n_exp = logits.shape[-1]
    lmax = jnp.max(logits, axis=-1, keepdims=True)
    pe = jnp.exp(logits - lmax)
    probs = pe / jnp.sum(pe, axis=-1, keepdims=True)

    eidx = jax.lax.broadcasted_iota(jnp.int32, probs.shape, 1)
    remaining = probs
    picked = jnp.zeros(probs.shape, jnp.int32)
    cols = [jnp.zeros((t, 1), f32) for _ in range(n_exp)]
    for _ in range(TOP_K):
        mval = jnp.max(remaining, axis=-1, keepdims=True)              # [T, 1]
        sel = jnp.min(jnp.where(remaining >= mval, eidx, n_exp),
                      axis=-1, keepdims=True)                          # lowest-index argmax
        for ee in range(n_exp):
            cols[ee] = cols[ee] + jnp.where(sel == ee, mval, 0.0)
        picked = jnp.maximum(picked, (eidx == sel).astype(jnp.int32))
        remaining = jnp.where(eidx == sel, -jnp.inf, remaining)

    gates_ref[...] = jnp.stack(cols, axis=0).astype(gates_ref.dtype)   # [E, T, 1]
    counts_ref[...] = jnp.sum(picked, axis=0, keepdims=True)           # [1, E] int32


def attn_block(x, residual, ln1, wqkv, cos, sin, wo, ln2, wr):
    t, hdim = x.shape
    n_exp = wr.shape[1]
    return pl.pallas_call(
        functools.partial(_attn_block_kernel, eps=RMS_EPS),
        out_shape=(jax.ShapeDtypeStruct((t, hdim), x.dtype),           # post-attn normed hidden
                   jax.ShapeDtypeStruct((t, hdim), x.dtype),           # new residual
                   jax.ShapeDtypeStruct((n_exp, t, 1), jnp.float32),   # per-expert gate columns
                   jax.ShapeDtypeStruct((1, n_exp), jnp.int32)),       # per-expert token counts
        grid=(1,),
        in_specs=[pl.BlockSpec((t, hdim), lambda i: (0, 0)),
                  pl.BlockSpec((t, hdim), lambda i: (0, 0)),
                  pl.BlockSpec(ln1.shape, lambda i: (0, 0)),
                  pl.BlockSpec(wqkv.shape, lambda i: (0, 0)),
                  pl.BlockSpec(cos.shape, lambda i: (0, 0)),
                  pl.BlockSpec(sin.shape, lambda i: (0, 0)),
                  pl.BlockSpec(wo.shape, lambda i: (0, 0)),
                  pl.BlockSpec(ln2.shape, lambda i: (0, 0)),
                  pl.BlockSpec(wr.shape, lambda i: (0, 0))],
        out_specs=(pl.BlockSpec((t, hdim), lambda i: (0, 0)),
                   pl.BlockSpec((t, hdim), lambda i: (0, 0)),
                   pl.BlockSpec((n_exp, t, 1), lambda i: (0, 0, 0)),
                   pl.BlockSpec((1, n_exp), lambda i: (0, 0))),
        input_output_aliases={0: 0, 1: 1},                             # reuse activation/residual buffers
        compiler_params=pltpu.CompilerParams(
            dimension_semantics=("arbitrary",),
            vmem_limit_bytes=VMEM_LIMIT),
    )(x, residual, ln1, wqkv, cos, sin, wo, ln2, wr)


# =======================================================================
# Kernel 2: fused MoE — shared expert + routed experts (grid over experts),
# accumulating directly into the resident f32 output block, with empty
# experts skipped via scalar-prefetched SMEM token counts.
# =======================================================================
def _moe_block_kernel(counts_ref, h_ref, gate_ref, sw1_ref, sw2_ref, w1_ref, w2_ref,
                      o_ref, *, inter, shared_inter):
    f32 = jnp.float32
    bf16 = jnp.bfloat16
    e = pl.program_id(0)
    xb = h_ref[...].astype(bf16)                                       # [T, H]

    @pl.when(e == 0)
    def _():
        # shared expert initialises the (f32, resident) output accumulator
        gu = jnp.dot(xb, sw1_ref[...], preferred_element_type=f32)     # [T, 2*Is]
        act = jax.nn.silu(gu[:, :shared_inter]) * gu[:, shared_inter:]
        o_ref[...] = jnp.dot(act.astype(bf16), sw2_ref[...],
                             preferred_element_type=f32).astype(o_ref.dtype)

    # routed expert e — skipped entirely when no token routed here.
    # TODO(synk): at real expert counts use grouped routing (per-expert offsets
    #             prefetched) so weight DMAs are skipped too, not just the FLOPs.
    @pl.when(counts_ref[e] > 0)
    def _():
        gu = jnp.dot(xb, w1_ref[0], preferred_element_type=f32)        # [T, 2I]
        act = jax.nn.silu(gu[:, :inter]) * gu[:, inter:]
        down = jnp.dot(act.astype(bf16), w2_ref[0], preferred_element_type=f32)  # [T, H]
        # NOTE: o_ref dtype is f32, so accumulating in-place is exact; keep an f32
        # VMEM scratch instead if the activation dtype ever becomes bf16.
        o_ref[...] += (down * gate_ref[0].astype(f32)).astype(o_ref.dtype)


def moe_block(h, gates, counts, sw1, sw2, w1, w2):
    t, hdim = h.shape
    n_exp, _, two_i = w1.shape
    inter = two_i // 2
    shared_inter = sw2.shape[0]
    return pl.pallas_call(
        functools.partial(_moe_block_kernel, inter=inter, shared_inter=shared_inter),
        out_shape=jax.ShapeDtypeStruct((t, hdim), h.dtype),
        grid_spec=pltpu.PrefetchScalarGridSpec(
            num_scalar_prefetch=1,                                     # counts -> SMEM
            grid=(n_exp,),
            in_specs=[pl.BlockSpec((t, hdim), lambda e, c: (0, 0)),
                      pl.BlockSpec((1, t, 1), lambda e, c: (e, 0, 0)),  # own gate column
                      pl.BlockSpec(sw1.shape, lambda e, c: (0, 0)),
                      pl.BlockSpec(sw2.shape, lambda e, c: (0, 0)),
                      pl.BlockSpec((1,) + w1.shape[1:], lambda e, c: (e, 0, 0)),
                      pl.BlockSpec((1,) + w2.shape[1:], lambda e, c: (e, 0, 0))],
            out_specs=pl.BlockSpec((t, hdim), lambda e, c: (0, 0))),
        compiler_params=pltpu.CompilerParams(
            dimension_semantics=("arbitrary",),
            vmem_limit_bytes=VMEM_LIMIT),
    )(counts, h, gates, sw1, sw2, w1, w2)


# =======================================================================
# Kernel 3: final residual add + RMSNorm
# =======================================================================
def _final_norm_kernel(x_ref, res_ref, w_ref, o_ref, *, eps):
    s = x_ref[...].astype(jnp.float32) + res_ref[...].astype(jnp.float32)
    var = jnp.mean(s * s, axis=-1, keepdims=True)
    o_ref[...] = (s * jax.lax.rsqrt(var + eps)
                  * w_ref[...].astype(jnp.float32)).astype(o_ref.dtype)


def final_norm(x, residual, w):
    t, hdim = x.shape
    return pl.pallas_call(
        functools.partial(_final_norm_kernel, eps=RMS_EPS),
        out_shape=jax.ShapeDtypeStruct((t, hdim), x.dtype),
        grid=(1,),
        in_specs=[pl.BlockSpec((t, hdim), lambda i: (0, 0)),
                  pl.BlockSpec((t, hdim), lambda i: (0, 0)),
                  pl.BlockSpec(w.shape, lambda i: (0, 0))],
        out_specs=pl.BlockSpec((t, hdim), lambda i: (0, 0)),
        input_output_aliases={0: 0},
        compiler_params=pltpu.CompilerParams(
            dimension_semantics=("arbitrary",),
            vmem_limit_bytes=VMEM_LIMIT),
    )(x, residual, w)


# -------------------------------- parameters --------------------------------
def init_params(key):
    def dense(k, shape, scale=0.02, dtype=jnp.bfloat16):
        return (scale * jax.random.normal(k, shape, dtype=jnp.float32)).astype(dtype)

    keys = jax.random.split(key, 1 + NUM_LAYERS)
    params = {
        "embed": dense(keys[0], (VOCAB, HIDDEN), dtype=DTYPE),
        "final_ln": jnp.ones((1, HIDDEN), DTYPE),
        "layers": [],
    }
    shared_inter = INTERMEDIATE * NUM_SHARED_EXPERTS
    for li in range(NUM_LAYERS):
        lk = jax.random.split(keys[1 + li], 7)
        params["layers"].append({
            "input_ln": jnp.ones((1, HIDDEN), DTYPE),
            "post_ln": jnp.ones((1, HIDDEN), DTYPE),
            # all matmul weights stored bf16, pre-transposed to [in_features, out_features]
            "qkv_w": dense(lk[0], (HIDDEN, Q_SIZE + 2 * KV_SIZE)),
            "o_w": dense(lk[1], (NUM_HEADS * HEAD_DIM, HIDDEN)),
            "router_w": dense(lk[2], (HIDDEN, NUM_EXPERTS)),
            "w1": dense(lk[3], (NUM_EXPERTS, HIDDEN, 2 * INTERMEDIATE)),       # gate||up
            "w2": dense(lk[4], (NUM_EXPERTS, INTERMEDIATE, HIDDEN)),
            "shared_w1": dense(lk[5], (HIDDEN, 2 * shared_inter)),
            "shared_w2": dense(lk[6], (shared_inter, HIDDEN)),
        })
    return params


def rope_tables(positions):
    """Packed neox cos/sin laid out over the [Q | K | V] lane order of qkv.

    Q lanes carry the attention scale head_dim**-0.5 (RoPE is linear, so the scale can
    be folded into the tables); V lanes get cos=1, sin=0 so RoPE can be applied to the
    whole packed qkv tensor in one shot.
    """
    t = positions.shape[0]
    inv_freq = 1.0 / (ROPE_THETA ** (jnp.arange(0, HEAD_DIM, 2, dtype=jnp.float32) / HEAD_DIM))
    freqs = positions.astype(jnp.float32)[:, None] * inv_freq[None, :]        # [T, D/2]
    cos = jnp.concatenate([jnp.cos(freqs), jnp.cos(freqs)], axis=-1)          # [T, D]
    sin = jnp.concatenate([jnp.sin(freqs), jnp.sin(freqs)], axis=-1)
    scale = HEAD_DIM ** -0.5
    cos_all = jnp.concatenate([jnp.tile(cos * scale, (1, NUM_HEADS)),
                               jnp.tile(cos, (1, NUM_KV_HEADS)),
                               jnp.ones((t, KV_SIZE), jnp.float32)], axis=-1)  # [T, Q+2KV]
    sin_all = jnp.concatenate([jnp.tile(sin * scale, (1, NUM_HEADS)),
                               jnp.tile(sin, (1, NUM_KV_HEADS)),
                               jnp.zeros((t, KV_SIZE), jnp.float32)], axis=-1)
    return cos_all, sin_all


# ------------------------------ model forward -------------------------------
def xverse_model_forward(params, input_ids, positions):
    # VocabParallelEmbedding (tp=1) -> plain gather (glue).
    h = params["embed"][input_ids]                                     # [T, H]
    cos_all, sin_all = rope_tables(positions)
    residual = jnp.zeros_like(h)                                       # first layer: res = h, h = norm(h)

    for layer in params["layers"]:
        h_norm, residual, gates_etl, counts2d = attn_block(
            h, residual, layer["input_ln"], layer["qkv_w"], cos_all, sin_all,
            layer["o_w"], layer["post_ln"], layer["router_w"])

        counts = counts2d.reshape(-1)                                  # [E] int32 -> SMEM prefetch

        # fused MoE (shared expert + routed experts); tp=1 all_reduce == identity.
        h = moe_block(h_norm, gates_etl, counts, layer["shared_w1"],
                      layer["shared_w2"], layer["w1"], layer["w2"])

    return final_norm(h, residual, params["final_ln"])


if __name__ == "__main__":
    key = jax.random.PRNGKey(0)
    pk, ik = jax.random.split(key)
    params = init_params(pk)
    input_ids = jax.random.randint(ik, (SEQ,), 0, VOCAB, dtype=jnp.int32)
    positions = jnp.arange(SEQ, dtype=jnp.int32)

    out = jax.jit(xverse_model_forward)(params, input_ids, positions)
    jax.block_until_ready(out)
    assert out.shape == (SEQ, HIDDEN) and out.dtype == DTYPE
    print("KERNEL_OK")
</pallas_src>

<mosaic_0001>
module attributes {stable_mosaic.version = 11 : i64} {
  func.func @_moe_block_kernel(%arg0: i32, %arg1: memref<4xi32, #tpu.memory_space<smem>>, %arg2: memref<16x128xf32, #tpu.memory_space<vmem>>, %arg3: memref<1x16x1xf32, #tpu.memory_space<vmem>>, %arg4: memref<128x512xbf16, #tpu.memory_space<vmem>>, %arg5: memref<256x128xbf16, #tpu.memory_space<vmem>>, %arg6: memref<1x128x512xbf16, #tpu.memory_space<vmem>>, %arg7: memref<1x256x128xbf16, #tpu.memory_space<vmem>>, %arg8: memref<16x128xf32, #tpu.memory_space<vmem>>) attributes {dimension_semantics = [#tpu.dimension_semantics<arbitrary>], iteration_bounds = array<i64: 4>, scalar_prefetch = 1 : i64, scratch_operands = 0 : i64, tpu.core_type = #tpu.core_type<tc>, window_params = [{pipeline_mode = #tpu.pipeline_mode<synchronous>, transform_indices = @transform_0, window_bounds = array<i64: 16, 128>}, {transform_indices = @transform_1, window_bounds = array<i64: 1, 16, 1>}, {pipeline_mode = #tpu.pipeline_mode<synchronous>, transform_indices = @transform_2, window_bounds = array<i64: 128, 512>}, {pipeline_mode = #tpu.pipeline_mode<synchronous>, transform_indices = @transform_3, window_bounds = array<i64: 256, 128>}, {transform_indices = @transform_4, window_bounds = array<i64: 1, 128, 512>}, {transform_indices = @transform_5, window_bounds = array<i64: 1, 256, 128>}, {pipeline_mode = #tpu.pipeline_mode<synchronous>, transform_indices = @transform_6, window_bounds = array<i64: 16, 128>}]} {
    %c0 = arith.constant 0 : index
    %c0_0 = arith.constant 0 : index
    %0 = vector.load %arg2[%c0, %c0_0] : memref<16x128xf32, #tpu.memory_space<vmem>>, vector<16x128xf32>
    %1 = arith.truncf %0 : vector<16x128xf32> to vector<16x128xbf16>
    %c0_i32 = arith.constant 0 : i32
    %2 = arith.cmpi eq, %arg0, %c0_i32 : i32
    %3 = arith.extui %2 : i1 to i32
    %c0_i32_1 = arith.constant 0 : i32
    %4 = arith.cmpi ne, %3, %c0_i32_1 : i32
    scf.if %4 {
      %c0_4 = arith.constant 0 : index
      %c0_5 = arith.constant 0 : index
      %10 = vector.load %arg4[%c0_4, %c0_5] : memref<128x512xbf16, #tpu.memory_space<vmem>>, vector<128x512xbf16>
      %cst = arith.constant dense<0.000000e+00> : vector<16x512xf32>
      %11 = tpu.matmul %1, %10, %cst {dimension_numbers = #tpu.dot_dimension_numbers<[1], [0], [0], [1], [0, 0, 1, 1], [], []>} : vector<16x128xbf16>, vector<128x512xbf16>, vector<16x512xf32> -> vector<16x512xf32>
      %12 = vector.extract_strided_slice %11 {offsets = [0, 0], sizes = [16, 256], strides = [1, 1]} : vector<16x512xf32> to vector<16x256xf32>
      %13 = arith.negf %12 : vector<16x256xf32>
      %14 = math.exp %13 : vector<16x256xf32>
      %cst_6 = arith.constant 1.000000e+00 : f32
      %15 = vector.broadcast %cst_6 : f32 to vector<16x256xf32>
      %16 = arith.addf %15, %14 : vector<16x256xf32>
      %17 = arith.divf %15, %16 : vector<16x256xf32>
      %18 = arith.mulf %12, %17 : vector<16x256xf32>
      %19 = vector.extract_strided_slice %11 {offsets = [0, 256], sizes = [16, 256], strides = [1, 1]} : vector<16x512xf32> to vector<16x256xf32>
      %20 = arith.mulf %18, %19 : vector<16x256xf32>
      %21 = arith.truncf %20 : vector<16x256xf32> to vector<16x256xbf16>
      %c0_7 = arith.constant 0 : index
      %c0_8 = arith.constant 0 : index
      %22 = vector.load %arg5[%c0_7, %c0_8] : memref<256x128xbf16, #tpu.memory_space<vmem>>, vector<256x128xbf16>
      %cst_9 = arith.constant dense<0.000000e+00> : vector<16x128xf32>
      %23 = tpu.matmul %21, %22, %cst_9 {dimension_numbers = #tpu.dot_dimension_numbers<[1], [0], [0], [1], [0, 0, 1, 1], [], []>} : vector<16x256xbf16>, vector<256x128xbf16>, vector<16x128xf32> -> vector<16x128xf32>
      %c0_10 = arith.constant 0 : index
      %c0_11 = arith.constant 0 : index
      %24 = vector.load %arg8[%c0_10, %c0_11] : memref<16x128xf32, #tpu.memory_space<vmem>>, vector<16x128xf32>
      tpu.vector_store %arg8[%c0_10, %c0_11], %23 {strides = array<i32>} : memref<16x128xf32, #tpu.memory_space<vmem>>, vector<16x128xf32>,
    } else {
    }
    %5 = arith.index_cast %arg0 : i32 to index
    %6 = memref.load %arg1[%5] : memref<4xi32, #tpu.memory_space<smem>>
    %c0_i32_2 = arith.constant 0 : i32
    %7 = arith.cmpi sgt, %6, %c0_i32_2 : i32
    %8 = arith.extui %7 : i1 to i32
    %c0_i32_3 = arith.constant 0 : i32
    %9 = arith.cmpi ne, %8, %c0_i32_3 : i32
    scf.if %9 {
      %c0_4 = arith.constant 0 : index
      %c0_5 = arith.constant 0 : index
      %c0_6 = arith.constant 0 : index
      %10 = vector.load %arg6[%c0_4, %c0_5, %c0_6] : memref<1x128x512xbf16, #tpu.memory_space<vmem>>, vector<1x128x512xbf16>
      %11 = vector.shape_cast %10 : vector<1x128x512xbf16> to vector<128x512xbf16>
      %cst = arith.constant dense<0.000000e+00> : vector<16x512xf32>
      %12 = tpu.matmul %1, %11, %cst {dimension_numbers = #tpu.dot_dimension_numbers<[1], [0], [0], [1], [0, 0, 1, 1], [], []>} : vector<16x128xbf16>, vector<128x512xbf16>, vector<16x512xf32> -> vector<16x512xf32>
      %13 = vector.extract_strided_slice %12 {offsets = [0, 0], sizes = [16, 256], strides = [1, 1]} : vector<16x512xf32> to vector<16x256xf32>
      %14 = arith.negf %13 : vector<16x256xf32>
      %15 = math.exp %14 : vector<16x256xf32>
      %cst_7 = arith.constant 1.000000e+00 : f32
      %16 = vector.broadcast %cst_7 : f32 to vector<16x256xf32>
      %17 = arith.addf %16, %15 : vector<16x256xf32>
      %18 = arith.divf %16, %17 : vector<16x256xf32>
      %19 = arith.mulf %13, %18 : vector<16x256xf32>
      %20 = vector.extract_strided_slice %12 {offsets = [0, 256], sizes = [16, 256], strides = [1, 1]} : vector<16x512xf32> to vector<16x256xf32>
      %21 = arith.mulf %19, %20 : vector<16x256xf32>
      %22 = arith.truncf %21 : vector<16x256xf32> to vector<16x256xbf16>
      %c0_8 = arith.constant 0 : index
      %c0_9 = arith.constant 0 : index
      %c0_10 = arith.constant 0 : index
      %23 = vector.load %arg7[%c0_8, %c0_9, %c0_10] : memref<1x256x128xbf16, #tpu.memory_space<vmem>>, vector<1x256x128xbf16>
      %24 = vector.shape_cast %23 : vector<1x256x128xbf16> to vector<256x128xbf16>
      %cst_11 = arith.constant dense<0.000000e+00> : vector<16x128xf32>
      %25 = tpu.matmul %22, %24, %cst_11 {dimension_numbers = #tpu.dot_dimension_numbers<[1], [0], [0], [1], [0, 0, 1, 1], [], []>} : vector<16x256xbf16>, vector<256x128xbf16>, vector<16x128xf32> -> vector<16x128xf32>
      %c0_12 = arith.constant 0 : index
      %c0_13 = arith.constant 0 : index
      %26 = vector.load %arg8[%c0_12, %c0_13] : memref<16x128xf32, #tpu.memory_space<vmem>>, vector<16x128xf32>
      %c0_14 = arith.constant 0 : index
      %c0_15 = arith.constant 0 : index
      %c0_16 = arith.constant 0 : index
      %27 = vector.load %arg3[%c0_14, %c0_15, %c0_16] : memref<1x16x1xf32, #tpu.memory_space<vmem>>, vector<1x16x1xf32>
      %28 = vector.shape_cast %27 : vector<1x16x1xf32> to vector<16x1xf32>
      %29 = vector.broadcast %28 : vector<16x1xf32> to vector<16x128xf32>
      %30 = arith.mulf %25, %29 : vector<16x128xf32>
      %31 = arith.addf %26, %30 : vector<16x128xf32>
      %c0_17 = arith.constant 0 : index
      %c0_18 = arith.constant 0 : index
      %32 = vector.load %arg8[%c0_17, %c0_18] : memref<16x128xf32, #tpu.memory_space<vmem>>, vector<16x128xf32>
      tpu.vector_store %arg8[%c0_17, %c0_18], %31 {strides = array<i32>} : memref<16x128xf32, #tpu.memory_space<vmem>>, vector<16x128xf32>,
    } else {
    }
    return
  }
  func.func @transform_0(%arg0: i32, %arg1: memref<4xi32, #tpu.memory_space<smem>>) -> (i32, i32) {
    %c0_i32 = arith.constant 0 : i32
    %c0_i32_0 = arith.constant 0 : i32
    %c0_i32_1 = arith.constant 0 : i32
    return %c0_i32, %c0_i32_0 : i32, i32
  }
  func.func @transform_1(%arg0: i32, %arg1: memref<4xi32, #tpu.memory_space<smem>>) -> (i32, i32, i32) {
    %c0_i32 = arith.constant 0 : i32
    %c0_i32_0 = arith.constant 0 : i32
    %c0_i32_1 = arith.constant 0 : i32
    return %arg0, %c0_i32, %c0_i32_0 : i32, i32, i32
  }
  func.func @transform_2(%arg0: i32, %arg1: memref<4xi32, #tpu.memory_space<smem>>) -> (i32, i32) {
    %c0_i32 = arith.constant 0 : i32
    %c0_i32_0 = arith.constant 0 : i32
    %c0_i32_1 = arith.constant 0 : i32
    return %c0_i32, %c0_i32_0 : i32, i32
  }
  func.func @transform_3(%arg0: i32, %arg1: memref<4xi32, #tpu.memory_space<smem>>) -> (i32, i32) {
    %c0_i32 = arith.constant 0 : i32
    %c0_i32_0 = arith.constant 0 : i32
    %c0_i32_1 = arith.constant 0 : i32
    return %c0_i32, %c0_i32_0 : i32, i32
  }
  func.func @transform_4(%arg0: i32, %arg1: memref<4xi32, #tpu.memory_space<smem>>) -> (i32, i32, i32) {
    %c0_i32 = arith.constant 0 : i32
    %c0_i32_0 = arith.constant 0 : i32
    %c0_i32_1 = arith.constant 0 : i32
    return %arg0, %c0_i32, %c0_i32_0 : i32, i32, i32
  }
  func.func @transform_5(%arg0: i32, %arg1: memref<4xi32, #tpu.memory_space<smem>>) -> (i32, i32, i32) {
    %c0_i32 = arith.constant 0 : i32
    %c0_i32_0 = arith.constant 0 : i32
    %c0_i32_1 = arith.constant 0 : i32
    return %arg0, %c0_i32, %c0_i32_0 : i32, i32, i32
  }
  func.func @transform_6(%arg0: i32, %arg1: memref<4xi32, #tpu.memory_space<smem>>) -> (i32, i32) {
    %c0_i32 = arith.constant 0 : i32
    %c0_i32_0 = arith.constant 0 : i32
    %c0_i32_1 = arith.constant 0 : i32
    return %c0_i32, %c0_i32_0 : i32, i32
  }
}

module attributes {stable_mosaic.version = 11 : i64} {
  func.func @_attn_block_kernel(%arg0: i32, %arg1: memref<16x128xf32, #tpu.memory_space<vmem>>, %arg2: memref<16x128xf32, #tpu.memory_space<vmem>>, %arg3: memref<1x128xf32, #tpu.memory_space<vmem>>, %arg4: memref<128x256xbf16, #tpu.memory_space<vmem>>, %arg5: memref<16x256xf32, #tpu.memory_space<vmem>>, %arg6: memref<16x256xf32, #tpu.memory_space<vmem>>, %arg7: memref<128x128xbf16, #tpu.memory_space<vmem>>, %arg8: memref<1x128xf32, #tpu.memory_space<vmem>>, %arg9: memref<128x4xbf16, #tpu.memory_space<vmem>>, %arg10: memref<16x128xf32, #tpu.memory_space<vmem>>, %arg11: memref<16x128xf32, #tpu.memory_space<vmem>>, %arg12: memref<4x16x1xf32, #tpu.memory_space<vmem>>, %arg13: memref<1x4xi32, #tpu.memory_space<vmem>>) attributes {dimension_semantics = [#tpu.dimension_semantics<arbitrary>], iteration_bounds = array<i64: 1>, scalar_prefetch = 0 : i64, scratch_operands = 0 : i64, tpu.core_type = #tpu.core_type<tc>, window_params = [{pipeline_mode = #tpu.pipeline_mode<synchronous>, transform_indices = @transform_0, window_bounds = array<i64: 16, 128>}, {pipeline_mode = #tpu.pipeline_mode<synchronous>, transform_indices = @transform_1, window_bounds = array<i64: 16, 128>}, {pipeline_mode = #tpu.pipeline_mode<synchronous>, transform_indices = @transform_2, window_bounds = array<i64: 1, 128>}, {pipeline_mode = #tpu.pipeline_mode<synchronous>, transform_indices = @transform_3, window_bounds = array<i64: 128, 256>}, {pipeline_mode = #tpu.pipeline_mode<synchronous>, transform_indices = @transform_4, window_bounds = array<i64: 16, 256>}, {pipeline_mode = #tpu.pipeline_mode<synchronous>, transform_indices = @transform_5, window_bounds = array<i64: 16, 256>}, {pipeline_mode = #tpu.pipeline_mode<synchronous>, transform_indices = @transform_6, window_bounds = array<i64: 128, 128>}, {pipeline_mode = #tpu.pipeline_mode<synchronous>, transform_indices = @transform_7, window_bounds = array<i64: 1, 128>}, {pipeline_mode = #tpu.pipeline_mode<synchronous>, transform_indices = @transform_8, window_bounds = array<i64: 128, 4>}, {pipeline_mode = #tpu.pipeline_mode<synchronous>, transform_indices = @transform_9, window_bounds = array<i64: 16, 128>}, {pipeline_mode = #tpu.pipeline_mode<synchronous>, transform_indices = @transform_10, window_bounds = array<i64: 16, 128>}, {pipeline_mode = #tpu.pipeline_mode<synchronous>, transform_indices = @transform_11, window_bounds = array<i64: 4, 16, 1>}, {pipeline_mode = #tpu.pipeline_mode<synchronous>, transform_indices = @transform_12, window_bounds = array<i64: 1, 4>}]} {
    %c0 = arith.constant 0 : index
    %c0_0 = arith.constant 0 : index
    %0 = vector.load %arg1[%c0, %c0_0] : memref<16x128xf32, #tpu.memory_space<vmem>>, vector<16x128xf32>
    %c0_1 = arith.constant 0 : index
    %c0_2 = arith.constant 0 : index
    %1 = vector.load %arg2[%c0_1, %c0_2] : memref<16x128xf32, #tpu.memory_space<vmem>>, vector<16x128xf32>
    %2 = arith.addf %0, %1 : vector<16x128xf32>
    %3 = arith.mulf %2, %2 : vector<16x128xf32>
    %cst = arith.constant dense<0.000000e+00> : vector<16xf32>
    %4 = vector.multi_reduction <add>, %3, %cst [1] : vector<16x128xf32> to vector<16xf32>
    %5 = vector.shape_cast %4 : vector<16xf32> to vector<16x1xf32>
    %cst_3 = arith.constant 1.280000e+02 : f32
    %6 = vector.broadcast %cst_3 : f32 to vector<16x1xf32>
    %7 = arith.divf %5, %6 : vector<16x1xf32>
    %cst_4 = arith.constant 9.99999997E-7 : f32
    %8 = vector.broadcast %cst_4 : f32 to vector<16x1xf32>
    %9 = arith.addf %7, %8 : vector<16x1xf32>
    %10 = math.rsqrt %9 : vector<16x1xf32>
    %11 = vector.broadcast %10 : vector<16x1xf32> to vector<16x128xf32>
    %12 = arith.mulf %2, %11 : vector<16x128xf32>
    %c0_5 = arith.constant 0 : index
    %c0_6 = arith.constant 0 : index
    %13 = vector.load %arg3[%c0_5, %c0_6] : memref<1x128xf32, #tpu.memory_space<vmem>>, vector<1x128xf32>
    %14 = vector.broadcast %13 : vector<1x128xf32> to vector<16x128xf32>
    %15 = arith.mulf %12, %14 : vector<16x128xf32>
    %16 = arith.truncf %15 : vector<16x128xf32> to vector<16x128xbf16>
    %c0_7 = arith.constant 0 : index
    %c0_8 = arith.constant 0 : index
    %17 = vector.load %arg4[%c0_7, %c0_8] : memref<128x256xbf16, #tpu.memory_space<vmem>>, vector<128x256xbf16>
    %cst_9 = arith.constant dense<0.000000e+00> : vector<16x256xf32>
    %18 = tpu.matmul %16, %17, %cst_9 {dimension_numbers = #tpu.dot_dimension_numbers<[1], [0], [0], [1], [0, 0, 1, 1], [], []>} : vector<16x128xbf16>, vector<128x256xbf16>, vector<16x256xf32> -> vector<16x256xf32>
    %19 = tpu.iota {dimensions = array<i32: 1>} : vector<16x256xi32>
    %c32_i32 = arith.constant 32 : i32
    %c0_i32 = arith.constant 0 : i32
    %20 = arith.cmpi eq, %c32_i32, %c0_i32 : i32
    %c1_i32 = arith.constant 1 : i32
    %21 = arith.select %20, %c1_i32, %c32_i32 : i32
    %22 = vector.broadcast %21 : i32 to vector<16x256xi32>
    %23 = arith.remsi %19, %22 : vector<16x256xi32>
    %c0_i32_10 = arith.constant 0 : i32
    %24 = vector.broadcast %c0_i32_10 : i32 to vector<16x256xi32>
    %25 = arith.cmpi ne, %23, %24 : vector<16x256xi32>
    %c0_i32_11 = arith.constant 0 : i32
    %26 = vector.broadcast %c0_i32_11 : i32 to vector<16x256xi32>
    %27 = arith.cmpi slt, %23, %26 : vector<16x256xi32>
    %c0_i32_12 = arith.constant 0 : i32
    %28 = arith.cmpi slt, %21, %c0_i32_12 : i32
    %29 = vector.broadcast %28 : i1 to vector<16x256xi1>
    %30 = vector.broadcast %29 : vector<16x256xi1> to vector<16x256xi1>
    %31 = arith.xori %27, %30 : vector<16x256xi1>
    %32 = arith.andi %31, %25 : vector<16x256xi1>
    %33 = vector.broadcast %21 : i32 to vector<16x256xi32>
    %34 = arith.addi %23, %33 : vector<16x256xi32>
    %35 = arith.select %32, %34, %23 : vector<16x256xi1>, vector<16x256xi32>
    %c16_i32 = arith.constant 16 : i32
    %36 = vector.broadcast %c16_i32 : i32 to vector<16x256xi32>
    %37 = arith.cmpi slt, %35, %36 : vector<16x256xi32>
    %c240_i32 = arith.constant 240 : i32
    %38 = tpu.dynamic_rotate %18 by %c240_i32 dim 1 : vector<16x256xf32>, i32 -> vector<16x256xf32>
    %cst_13 = arith.constant 0.000000e+00 : f32
    %39 = vector.broadcast %cst_13 : f32 to vector<16x256xf32>
    %40 = arith.subf %39, %38 : vector<16x256xf32>
    %c16_i32_14 = arith.constant 16 : i32
    %41 = tpu.dynamic_rotate %18 by %c16_i32_14 dim 1 : vector<16x256xf32>, i32 -> vector<16x256xf32>
    %42 = arith.select %37, %40, %41 : vector<16x256xi1>, vector<16x256xf32>
    %c0_15 = arith.constant 0 : index
    %c0_16 = arith.constant 0 : index
    %43 = vector.load %arg5[%c0_15, %c0_16] : memref<16x256xf32, #tpu.memory_space<vmem>>, vector<16x256xf32>
    %44 = arith.mulf %18, %43 : vector<16x256xf32>
    %c0_17 = arith.constant 0 : index
    %c0_18 = arith.constant 0 : index
    %45 = vector.load %arg6[%c0_17, %c0_18] : memref<16x256xf32, #tpu.memory_space<vmem>>, vector<16x256xf32>
    %46 = arith.mulf %42, %45 : vector<16x256xf32>
    %47 = arith.addf %44, %46 : vector<16x256xf32>
    %48 = vector.extract_strided_slice %47 {offsets = [0, 0], sizes = [16, 128], strides = [1, 1]} : vector<16x256xf32> to vector<16x128xf32>
    %49 = vector.extract_strided_slice %47 {offsets = [0, 128], sizes = [16, 64], strides = [1, 1]} : vector<16x256xf32> to vector<16x64xf32>
    %50 = vector.extract_strided_slice %47 {offsets = [0, 192], sizes = [16, 64], strides = [1, 1]} : vector<16x256xf32> to vector<16x64xf32>
    %51 = vector.extract_strided_slice %48 {offsets = [0, 0], sizes = [16, 32], strides = [1, 1]} : vector<16x128xf32> to vector<16x32xf32>
    %52 = vector.extract_strided_slice %48 {offsets = [0, 32], sizes = [16, 32], strides = [1, 1]} : vector<16x128xf32> to vector<16x32xf32>
    %53 = vector.extract_strided_slice %48 {offsets = [0, 64], sizes = [16, 32], strides = [1, 1]} : vector<16x128xf32> to vector<16x32xf32>
    %54 = vector.extract_strided_slice %48 {offsets = [0, 96], sizes = [16, 32], strides = [1, 1]} : vector<16x128xf32> to vector<16x32xf32>
    %55 = vector.shape_cast %51 : vector<16x32xf32> to vector<1x16x32xf32>
    %56 = vector.shape_cast %52 : vector<16x32xf32> to vector<1x16x32xf32>
    %57 = vector.shape_cast %53 : vector<16x32xf32> to vector<1x16x32xf32>
    %58 = vector.shape_cast %54 : vector<16x32xf32> to vector<1x16x32xf32>
    %59 = tpu.concatenate %55, %56, %57, %58 in 0 : vector<1x16x32xf32>, vector<1x16x32xf32>, vector<1x16x32xf32>, vector<1x16x32xf32> -> vector<4x16x32xf32>
    %60 = vector.extract_strided_slice %49 {offsets = [0, 0], sizes = [16, 32], strides = [1, 1]} : vector<16x64xf32> to vector<16x32xf32>
    %61 = vector.extract_strided_slice %49 {offsets = [0, 32], sizes = [16, 32], strides = [1, 1]} : vector<16x64xf32> to vector<16x32xf32>
    %62 = vector.extract_strided_slice %50 {offsets = [0, 0], sizes = [16, 32], strides = [1, 1]} : vector<16x64xf32> to vector<16x32xf32>
    %63 = vector.extract_strided_slice %50 {offsets = [0, 32], sizes = [16, 32], strides = [1, 1]} : vector<16x64xf32> to vector<16x32xf32>
    %64 = vector.shape_cast %60 : vector<16x32xf32> to vector<1x16x32xf32>
    %65 = vector.shape_cast %60 : vector<16x32xf32> to vector<1x16x32xf32>
    %66 = vector.shape_cast %61 : vector<16x32xf32> to vector<1x16x32xf32>
    %67 = vector.shape_cast %61 : vector<16x32xf32> to vector<1x16x32xf32>
    %68 = tpu.concatenate %64, %65, %66, %67 in 0 : vector<1x16x32xf32>, vector<1x16x32xf32>, vector<1x16x32xf32>, vector<1x16x32xf32> -> vector<4x16x32xf32>
    %69 = vector.shape_cast %62 : vector<16x32xf32> to vector<1x16x32xf32>
    %70 = vector.shape_cast %62 : vector<16x32xf32> to vector<1x16x32xf32>
    %71 = vector.shape_cast %63 : vector<16x32xf32> to vector<1x16x32xf32>
    %72 = vector.shape_cast %63 : vector<16x32xf32> to vector<1x16x32xf32>
    %73 = tpu.concatenate %69, %70, %71, %72 in 0 : vector<1x16x32xf32>, vector<1x16x32xf32>, vector<1x16x32xf32>, vector<1x16x32xf32> -> vector<4x16x32xf32>
    %74 = tpu.iota {dimensions = array<i32: 0>} : vector<16x16xi32>
    %75 = tpu.iota {dimensions = array<i32: 1>} : vector<16x16xi32>
    %76 = arith.cmpi sle, %75, %74 : vector<16x16xi32>
    %77 = vector.shape_cast %76 : vector<16x16xi1> to vector<1x16x16xi1>
    %78 = arith.truncf %59 : vector<4x16x32xf32> to vector<4x16x32xbf16>
    %79 = arith.truncf %68 : vector<4x16x32xf32> to vector<4x16x32xbf16>
    "tpu.trace_start"() <{level = 10 : i32, message = "htd,hsd->hts"}> : () -> ()
    %cst_19 = arith.constant dense<0.000000e+00> : vector<4x16x16xf32>
    %80 = tpu.matmul %78, %79, %cst_19 {dimension_numbers = #tpu.dot_dimension_numbers<[2], [2], [1], [1], [0, 0, 0, 1, 1, 1], [0], [0]>} : vector<4x16x32xbf16>, vector<4x16x32xbf16>, vector<4x16x16xf32> -> vector<4x16x16xf32>
    %cst_20 = arith.constant -1.000000e+30 : f32
    "tpu.trace_stop"() : () -> ()
    %81 = vector.shape_cast %77 : vector<1x16x16xi1> to vector<1x16x16xi1>
    %82 = vector.broadcast %81 : vector<1x16x16xi1> to vector<4x16x16xi1>
    %83 = vector.broadcast %cst_20 : f32 to vector<4x16x16xf32>
    %84 = arith.select %82, %80, %83 : vector<4x16x16xi1>, vector<4x16x16xf32>
    %cst_21 = arith.constant dense<0xFF800000> : vector<4x16xf32>
    %85 = vector.multi_reduction <maximumf>, %84, %cst_21 [2] : vector<4x16x16xf32> to vector<4x16xf32>
    %86 = vector.shape_cast %85 : vector<4x16xf32> to vector<4x16x1xf32>
    %87 = vector.broadcast %86 : vector<4x16x1xf32> to vector<4x16x16xf32>
    %88 = arith.subf %84, %87 : vector<4x16x16xf32>
    %89 = math.exp %88 : vector<4x16x16xf32>
    %cst_22 = arith.constant dense<0.000000e+00> : vector<4x16xf32>
    %90 = vector.multi_reduction <add>, %89, %cst_22 [2] : vector<4x16x16xf32> to vector<4x16xf32>
    %91 = vector.shape_cast %90 : vector<4x16xf32> to vector<4x16x1xf32>
    %92 = tpu.reciprocal %91 {approx = true} : vector<4x16x1xf32> -> vector<4x16x1xf32>
    %93 = vector.broadcast %92 : vector<4x16x1xf32> to vector<4x16x16xf32>
    %94 = arith.mulf %89, %93 : vector<4x16x16xf32>
    %95 = arith.truncf %94 : vector<4x16x16xf32> to vector<4x16x16xbf16>
    %96 = arith.truncf %73 : vector<4x16x32xf32> to vector<4x16x32xbf16>
    "tpu.trace_start"() <{level = 10 : i32, message = "hts,hsd->htd"}> : () -> ()
    %cst_23 = arith.constant dense<0.000000e+00> : vector<4x16x32xf32>
    %97 = tpu.matmul %95, %96, %cst_23 {dimension_numbers = #tpu.dot_dimension_numbers<[2], [1], [1], [2], [0, 0, 0, 1, 1, 2], [0], [0]>} : vector<4x16x16xbf16>, vector<4x16x32xbf16>, vector<4x16x32xf32> -> vector<4x16x32xf32>
    "tpu.trace_stop"() : () -> ()
    %98 = vector.extract_strided_slice %97 {offsets = [0, 0, 0], sizes = [1, 16, 32], strides = [1, 1, 1]} : vector<4x16x32xf32> to vector<1x16x32xf32>
    %99 = vector.shape_cast %98 : vector<1x16x32xf32> to vector<16x32xf32>
    %100 = vector.extract_strided_slice %97 {offsets = [1, 0, 0], sizes = [1, 16, 32], strides = [1, 1, 1]} : vector<4x16x32xf32> to vector<1x16x32xf32>
    %101 = vector.shape_cast %100 : vector<1x16x32xf32> to vector<16x32xf32>
    %102 = vector.extract_strided_slice %97 {offsets = [2, 0, 0], sizes = [1, 16, 32], strides = [1, 1, 1]} : vector<4x16x32xf32> to vector<1x16x32xf32>
    %103 = vector.shape_cast %102 : vector<1x16x32xf32> to vector<16x32xf32>
    %104 = vector.extract_strided_slice %97 {offsets = [3, 0, 0], sizes = [1, 16, 32], strides = [1, 1, 1]} : vector<4x16x32xf32> to vector<1x16x32xf32>
    %105 = vector.shape_cast %104 : vector<1x16x32xf32> to vector<16x32xf32>
    %106 = tpu.concatenate %99, %101, %103, %105 in 1 : vector<16x32xf32>, vector<16x32xf32>, vector<16x32xf32>, vector<16x32xf32> -> vector<16x128xf32>
    %107 = arith.truncf %106 : vector<16x128xf32> to vector<16x128xbf16>
    %c0_24 = arith.constant 0 : index
    %c0_25 = arith.constant 0 : index
    %108 = vector.load %arg7[%c0_24, %c0_25] : memref<128x128xbf16, #tpu.memory_space<vmem>>, vector<128x128xbf16>
    %cst_26 = arith.constant dense<0.000000e+00> : vector<16x128xf32>
    %109 = tpu.matmul %107, %108, %cst_26 {dimension_numbers = #tpu.dot_dimension_numbers<[1], [0], [0], [1], [0, 0, 1, 1], [], []>} : vector<16x128xbf16>, vector<128x128xbf16>, vector<16x128xf32> -> vector<16x128xf32>
    %110 = arith.addf %109, %2 : vector<16x128xf32>
    %c0_27 = arith.constant 0 : index
    %c0_28 = arith.constant 0 : index
    %111 = vector.load %arg11[%c0_27, %c0_28] : memref<16x128xf32, #tpu.memory_space<vmem>>, vector<16x128xf32>
    tpu.vector_store %arg11[%c0_27, %c0_28], %110 {strides = array<i32>} : memref<16x128xf32, #tpu.memory_space<vmem>>, vector<16x128xf32>,
    %112 = arith.mulf %110, %110 : vector<16x128xf32>
    %cst_29 = arith.constant dense<0.000000e+00> : vector<16xf32>
    %113 = vector.multi_reduction <add>, %112, %cst_29 [1] : vector<16x128xf32> to vector<16xf32>
    %114 = vector.shape_cast %113 : vector<16xf32> to vector<16x1xf32>
    %cst_30 = arith.constant 1.280000e+02 : f32
    %115 = vector.broadcast %cst_30 : f32 to vector<16x1xf32>
    %116 = arith.divf %114, %115 : vector<16x1xf32>
    %cst_31 = arith.constant 9.99999997E-7 : f32
    %117 = vector.broadcast %cst_31 : f32 to vector<16x1xf32>
    %118 = arith.addf %116, %117 : vector<16x1xf32>
    %119 = math.rsqrt %118 : vector<16x1xf32>
    %120 = vector.broadcast %119 : vector<16x1xf32> to vector<16x128xf32>
    %121 = arith.mulf %110, %120 : vector<16x128xf32>
    %c0_32 = arith.constant 0 : index
    %c0_33 = arith.constant 0 : index
    %122 = vector.load %arg8[%c0_32, %c0_33] : memref<1x128xf32, #tpu.memory_space<vmem>>, vector<1x128xf32>
    %123 = vector.broadcast %122 : vector<1x128xf32> to vector<16x128xf32>
    %124 = arith.mulf %121, %123 : vector<16x128xf32>
    %c0_34 = arith.constant 0 : index
    %c0_35 = arith.constant 0 : index
    %125 = vector.load %arg10[%c0_34, %c0_35] : memref<16x128xf32, #tpu.memory_space<vmem>>, vector<16x128xf32>
    tpu.vector_store %arg10[%c0_34, %c0_35], %124 {strides = array<i32>} : memref<16x128xf32, #tpu.memory_space<vmem>>, vector<16x128xf32>,
    %126 = arith.truncf %124 : vector<16x128xf32> to vector<16x128xbf16>
    %c0_36 = arith.constant 0 : index
    %c0_37 = arith.constant 0 : index
    %127 = vector.load %arg9[%c0_36, %c0_37] : memref<128x4xbf16, #tpu.memory_space<vmem>>, vector<128x4xbf16>
    %cst_38 = arith.constant dense<0.000000e+00> : vector<16x4xf32>
    %128 = tpu.matmul %126, %127, %cst_38 {dimension_numbers = #tpu.dot_dimension_numbers<[1], [0], [0], [1], [0, 0, 1, 1], [], []>} : vector<16x128xbf16>, vector<128x4xbf16>, vector<16x4xf32> -> vector<16x4xf32>
    %cst_39 = arith.constant dense<0xFF800000> : vector<16xf32>
    %129 = vector.multi_reduction <maximumf>, %128, %cst_39 [1] : vector<16x4xf32> to vector<16xf32>
    %130 = vector.shape_cast %129 : vector<16xf32> to vector<16x1xf32>
    %131 = vector.broadcast %130 : vector<16x1xf32> to vector<16x4xf32>
    %132 = arith.subf %128, %131 : vector<16x4xf32>
    %133 = math.exp %132 : vector<16x4xf32>
    %cst_40 = arith.constant dense<0.000000e+00> : vector<16xf32>
    %134 = vector.multi_reduction <add>, %133, %cst_40 [1] : vector<16x4xf32> to vector<16xf32>
    %135 = vector.shape_cast %134 : vector<16xf32> to vector<16x1xf32>
    %136 = vector.broadcast %135 : vector<16x1xf32> to vector<16x4xf32>
    %137 = arith.divf %133, %136 : vector<16x4xf32>
    %138 = tpu.iota {dimensions = array<i32: 1>} : vector<16x4xi32>
    %c0_i32_41 = arith.constant 0 : i32
    %139 = vector.broadcast %c0_i32_41 : i32 to vector<16x4xi32>
    %cst_42 = arith.constant 0.000000e+00 : f32
    %140 = vector.broadcast %cst_42 : f32 to vector<16x1xf32>
    %cst_43 = arith.constant 0.000000e+00 : f32
    %141 = vector.broadcast %cst_43 : f32 to vector<16x1xf32>
    %cst_44 = arith.constant 0.000000e+00 : f32
    %142 = vector.broadcast %cst_44 : f32 to vector<16x1xf32>
    %cst_45 = arith.constant 0.000000e+00 : f32
    %143 = vector.broadcast %cst_45 : f32 to vector<16x1xf32>
    %cst_46 = arith.constant dense<0xFF800000> : vector<16xf32>
    %144 = vector.multi_reduction <maximumf>, %137, %cst_46 [1] : vector<16x4xf32> to vector<16xf32>
    %145 = vector.shape_cast %144 : vector<16xf32> to vector<16x1xf32>
    %146 = vector.broadcast %145 : vector<16x1xf32> to vector<16x4xf32>
    %147 = arith.cmpf oge, %137, %146 : vector<16x4xf32>
    %c4_i32 = arith.constant 4 : i32
    %148 = vector.broadcast %c4_i32 : i32 to vector<16x4xi32>
    %149 = arith.select %147, %138, %148 : vector<16x4xi1>, vector<16x4xi32>
    %cst_47 = arith.constant dense<2147483647> : vector<16xi32>
    %150 = vector.multi_reduction <minsi>, %149, %cst_47 [1] : vector<16x4xi32> to vector<16xi32>
    %151 = vector.shape_cast %150 : vector<16xi32> to vector<16x1xi32>
    %c0_i32_48 = arith.constant 0 : i32
    %152 = vector.broadcast %c0_i32_48 : i32 to vector<16x1xi32>
    %153 = arith.cmpi eq, %151, %152 : vector<16x1xi32>
    %cst_49 = arith.constant 0.000000e+00 : f32
    %154 = vector.broadcast %cst_49 : f32 to vector<16x1xf32>
    %155 = arith.select %153, %145, %154 : vector<16x1xi1>, vector<16x1xf32>
    %156 = arith.addf %140, %155 : vector<16x1xf32>
    %c1_i32_50 = arith.constant 1 : i32
    %157 = vector.broadcast %c1_i32_50 : i32 to vector<16x1xi32>
    %158 = arith.cmpi eq, %151, %157 : vector<16x1xi32>
    %cst_51 = arith.constant 0.000000e+00 : f32
    %159 = vector.broadcast %cst_51 : f32 to vector<16x1xf32>
    %160 = arith.select %158, %145, %159 : vector<16x1xi1>, vector<16x1xf32>
    %161 = arith.addf %141, %160 : vector<16x1xf32>
    %c2_i32 = arith.constant 2 : i32
    %162 = vector.broadcast %c2_i32 : i32 to vector<16x1xi32>
    %163 = arith.cmpi eq, %151, %162 : vector<16x1xi32>
    %cst_52 = arith.constant 0.000000e+00 : f32
    %164 = vector.broadcast %cst_52 : f32 to vector<16x1xf32>
    %165 = arith.select %163, %145, %164 : vector<16x1xi1>, vector<16x1xf32>
    %166 = arith.addf %142, %165 : vector<16x1xf32>
    %c3_i32 = arith.constant 3 : i32
    %167 = vector.broadcast %c3_i32 : i32 to vector<16x1xi32>
    %168 = arith.cmpi eq, %151, %167 : vector<16x1xi32>
    %cst_53 = arith.constant 0.000000e+00 : f32
    %169 = vector.broadcast %cst_53 : f32 to vector<16x1xf32>
    %170 = arith.select %168, %145, %169 : vector<16x1xi1>, vector<16x1xf32>
    %171 = arith.addf %143, %170 : vector<16x1xf32>
    %172 = vector.broadcast %151 : vector<16x1xi32> to vector<16x4xi32>
    %173 = arith.cmpi eq, %138, %172 : vector<16x4xi32>
    %174 = arith.extui %173 : vector<16x4xi1> to vector<16x4xi32>
    %175 = arith.maxsi %139, %174 : vector<16x4xi32>
    %176 = vector.broadcast %151 : vector<16x1xi32> to vector<16x4xi32>
    %177 = arith.cmpi eq, %138, %176 : vector<16x4xi32>
    %cst_54 = arith.constant 0xFF800000 : f32
    %178 = vector.broadcast %cst_54 : f32 to vector<16x4xf32>
    %179 = arith.select %177, %178, %137 : vector<16x4xi1>, vector<16x4xf32>
    %cst_55 = arith.constant dense<0xFF800000> : vector<16xf32>
    %180 = vector.multi_reduction <maximumf>, %179, %cst_55 [1] : vector<16x4xf32> to vector<16xf32>
    %181 = vector.shape_cast %180 : vector<16xf32> to vector<16x1xf32>
    %182 = vector.broadcast %181 : vector<16x1xf32> to vector<16x4xf32>
    %183 = arith.cmpf oge, %179, %182 : vector<16x4xf32>
    %c4_i32_56 = arith.constant 4 : i32
    %184 = vector.broadcast %c4_i32_56 : i32 to vector<16x4xi32>
    %185 = arith.select %183, %138, %184 : vector<16x4xi1>, vector<16x4xi32>
    %cst_57 = arith.constant dense<2147483647> : vector<16xi32>
    %186 = vector.multi_reduction <minsi>, %185, %cst_57 [1] : vector<16x4xi32> to vector<16xi32>
    %187 = vector.shape_cast %186 : vector<16xi32> to vector<16x1xi32>
    %c0_i32_58 = arith.constant 0 : i32
    %188 = vector.broadcast %c0_i32_58 : i32 to vector<16x1xi32>
    %189 = arith.cmpi eq, %187, %188 : vector<16x1xi32>
    %cst_59 = arith.constant 0.000000e+00 : f32
    %190 = vector.broadcast %cst_59 : f32 to vector<16x1xf32>
    %191 = arith.select %189, %181, %190 : vector<16x1xi1>, vector<16x1xf32>
    %192 = arith.addf %156, %191 : vector<16x1xf32>
    %c1_i32_60 = arith.constant 1 : i32
    %193 = vector.broadcast %c1_i32_60 : i32 to vector<16x1xi32>
    %194 = arith.cmpi eq, %187, %193 : vector<16x1xi32>
    %cst_61 = arith.constant 0.000000e+00 : f32
    %195 = vector.broadcast %cst_61 : f32 to vector<16x1xf32>
    %196 = arith.select %194, %181, %195 : vector<16x1xi1>, vector<16x1xf32>
    %197 = arith.addf %161, %196 : vector<16x1xf32>
    %c2_i32_62 = arith.constant 2 : i32
    %198 = vector.broadcast %c2_i32_62 : i32 to vector<16x1xi32>
    %199 = arith.cmpi eq, %187, %198 : vector<16x1xi32>
    %cst_63 = arith.constant 0.000000e+00 : f32
    %200 = vector.broadcast %cst_63 : f32 to vector<16x1xf32>
    %201 = arith.select %199, %181, %200 : vector<16x1xi1>, vector<16x1xf32>
    %202 = arith.addf %166, %201 : vector<16x1xf32>
    %c3_i32_64 = arith.constant 3 : i32
    %203 = vector.broadcast %c3_i32_64 : i32 to vector<16x1xi32>
    %204 = arith.cmpi eq, %187, %203 : vector<16x1xi32>
    %cst_65 = arith.constant 0.000000e+00 : f32
    %205 = vector.broadcast %cst_65 : f32 to vector<16x1xf32>
    %206 = arith.select %204, %181, %205 : vector<16x1xi1>, vector<16x1xf32>
    %207 = arith.addf %171, %206 : vector<16x1xf32>
    %208 = vector.broadcast %187 : vector<16x1xi32> to vector<16x4xi32>
    %209 = arith.cmpi eq, %138, %208 : vector<16x4xi32>
    %210 = arith.extui %209 : vector<16x4xi1> to vector<16x4xi32>
    %211 = arith.maxsi %175, %210 : vector<16x4xi32>
    %212 = vector.shape_cast %192 : vector<16x1xf32> to vector<1x16x1xf32>
    %213 = vector.shape_cast %197 : vector<16x1xf32> to vector<1x16x1xf32>
    %214 = vector.shape_cast %202 : vector<16x1xf32> to vector<1x16x1xf32>
    %215 = vector.shape_cast %207 : vector<16x1xf32> to vector<1x16x1xf32>
    %216 = tpu.concatenate %212, %213, %214, %215 in 0 : vector<1x16x1xf32>, vector<1x16x1xf32>, vector<1x16x1xf32>, vector<1x16x1xf32> -> vector<4x16x1xf32>
    %c0_66 = arith.constant 0 : index
    %c0_67 = arith.constant 0 : index
    %c0_68 = arith.constant 0 : index
    %217 = vector.load %arg12[%c0_66, %c0_67, %c0_68] : memref<4x16x1xf32, #tpu.memory_space<vmem>>, vector<4x16x1xf32>
    tpu.vector_store %arg12[%c0_66, %c0_67, %c0_68], %216 {strides = array<i32>} : memref<4x16x1xf32, #tpu.memory_space<vmem>>, vector<4x16x1xf32>,
    %cst_69 = arith.constant dense<0> : vector<4xi32>
    %218 = vector.multi_reduction <add>, %211, %cst_69 [0] : vector<16x4xi32> to vector<4xi32>
    %219 = vector.shape_cast %218 : vector<4xi32> to vector<1x4xi32>
    %c0_70 = arith.constant 0 : index
    %c0_71 = arith.constant 0 : index
    %220 = vector.load %arg13[%c0_70, %c0_71] : memref<1x4xi32, #tpu.memory_space<vmem>>, vector<1x4xi32>
    tpu.vector_store %arg13[%c0_70, %c0_71], %219 {strides = array<i32>} : memref<1x4xi32, #tpu.memory_space<vmem>>, vector<1x4xi32>,
    return
  }
  func.func @transform_0(%arg0: i32) -> (i32, i32) {
    %c0_i32 = arith.constant 0 : i32
    %c0_i32_0 = arith.constant 0 : i32
    %c0_i32_1 = arith.constant 0 : i32
    return %c0_i32, %c0_i32_0 : i32, i32
  }
  func.func @transform_1(%arg0: i32) -> (i32, i32) {
    %c0_i32 = arith.constant 0 : i32
    %c0_i32_0 = arith.constant 0 : i32
    %c0_i32_1 = arith.constant 0 : i32
    return %c0_i32, %c0_i32_0 : i32, i32
  }
  func.func @transform_2(%arg0: i32) -> (i32, i32) {
    %c0_i32 = arith.constant 0 : i32
    %c0_i32_0 = arith.constant 0 : i32
    %c0_i32_1 = arith.constant 0 : i32
    return %c0_i32, %c0_i32_0 : i32, i32
  }
  func.func @transform_3(%arg0: i32) -> (i32, i32) {
    %c0_i32 = arith.constant 0 : i32
    %c0_i32_0 = arith.constant 0 : i32
    %c0_i32_1 = arith.constant 0 : i32
    return %c0_i32, %c0_i32_0 : i32, i32
  }
  func.func @transform_4(%arg0: i32) -> (i32, i32) {
    %c0_i32 = arith.constant 0 : i32
    %c0_i32_0 = arith.constant 0 : i32
    %c0_i32_1 = arith.constant 0 : i32
    return %c0_i32, %c0_i32_0 : i32, i32
  }
  func.func @transform_5(%arg0: i32) -> (i32, i32) {
    %c0_i32 = arith.constant 0 : i32
    %c0_i32_0 = arith.constant 0 : i32
    %c0_i32_1 = arith.constant 0 : i32
    return %c0_i32, %c0_i32_0 : i32, i32
  }
  func.func @transform_6(%arg0: i32) -> (i32, i32) {
    %c0_i32 = arith.constant 0 : i32
    %c0_i32_0 = arith.constant 0 : i32
    %c0_i32_1 = arith.constant 0 : i32
    return %c0_i32, %c0_i32_0 : i32, i32
  }
  func.func @transform_7(%arg0: i32) -> (i32, i32) {
    %c0_i32 = arith.constant 0 : i32
    %c0_i32_0 = arith.constant 0 : i32
    %c0_i32_1 = arith.constant 0 : i32
    return %c0_i32, %c0_i32_0 : i32, i32
  }
  func.func @transform_8(%arg0: i32) -> (i32, i32) {
    %c0_i32 = arith.constant 0 : i32
    %c0_i32_0 = arith.constant 0 : i32
    %c0_i32_1 = arith.constant 0 : i32
    return %c0_i32, %c0_i32_0 : i32, i32
  }
  func.func @transform_9(%arg0: i32) -> (i32, i32) {
    %c0_i32 = arith.constant 0 : i32
    %c0_i32_0 = arith.constant 0 : i32
    %c0_i32_1 = arith.constant 0 : i32
    return %c0_i32, %c0_i32_0 : i32, i32
  }
  func.func @transform_10(%arg0: i32) -> (i32, i32) {
    %c0_i32 = arith.constant 0 : i32
    %c0_i32_0 = arith.constant 0 : i32
    %c0_i32_1 = arith.constant 0 : i32
    return %c0_i32, %c0_i32_0 : i32, i32
  }
  func.func @transform_11(%arg0: i32) -> (i32, i32, i32) {
    %c0_i32 = arith.constant 0 : i32
    %c0_i32_0 = arith.constant 0 : i32
    %c0_i32_1 = arith.constant 0 : i32
    %c0_i32_2 = arith.constant 0 : i32
    return %c0_i32, %c0_i32_0, %c0_i32_1 : i32, i32, i32
  }
  func.func @transform_12(%arg0: i32) -> (i32, i32) {
    %c0_i32 = arith.constant 0 : i32
    %c0_i32_0 = arith.constant 0 : i32
    %c0_i32_1 = arith.constant 0 : i32
    return %c0_i32, %c0_i32_0 : i32, i32
  }
}

module attributes {stable_mosaic.version = 11 : i64} {
  func.func @_moe_block_kernel(%arg0: i32, %arg1: memref<4xi32, #tpu.memory_space<smem>>, %arg2: memref<16x128xf32, #tpu.memory_space<vmem>>, %arg3: memref<1x16x1xf32, #tpu.memory_space<vmem>>, %arg4: memref<128x512xbf16, #tpu.memory_space<vmem>>, %arg5: memref<256x128xbf16, #tpu.memory_space<vmem>>, %arg6: memref<1x128x512xbf16, #tpu.memory_space<vmem>>, %arg7: memref<1x256x128xbf16, #tpu.memory_space<vmem>>, %arg8: memref<16x128xf32, #tpu.memory_space<vmem>>) attributes {dimension_semantics = [#tpu.dimension_semantics<arbitrary>], iteration_bounds = array<i64: 4>, scalar_prefetch = 1 : i64, scratch_operands = 0 : i64, tpu.core_type = #tpu.core_type<tc>, window_params = [{pipeline_mode = #tpu.pipeline_mode<synchronous>, transform_indices = @transform_0, window_bounds = array<i64: 16, 128>}, {transform_indices = @transform_1, window_bounds = array<i64: 1, 16, 1>}, {pipeline_mode = #tpu.pipeline_mode<synchronous>, transform_indices = @transform_2, window_bounds = array<i64: 128, 512>}, {pipeline_mode = #tpu.pipeline_mode<synchronous>, transform_indices = @transform_3, window_bounds = array<i64: 256, 128>}, {transform_indices = @transform_4, window_bounds = array<i64: 1, 128, 512>}, {transform_indices = @transform_5, window_bounds = array<i64: 1, 256, 128>}, {pipeline_mode = #tpu.pipeline_mode<synchronous>, transform_indices = @transform_6, window_bounds = array<i64: 16, 128>}]} {
    %c0 = arith.constant 0 : index
    %c0_0 = arith.constant 0 : index
    %0 = vector.load %arg2[%c0, %c0_0] : memref<16x128xf32, #tpu.memory_space<vmem>>, vector<16x128xf32>
    %1 = arith.truncf %0 : vector<16x128xf32> to vector<16x128xbf16>
    %c0_i32 = arith.constant 0 : i32
    %2 = arith.cmpi eq, %arg0, %c0_i32 : i32
    %3 = arith.extui %2 : i1 to i32
    %c0_i32_1 = arith.constant 0 : i32
    %4 = arith.cmpi ne, %3, %c0_i32_1 : i32
    scf.if %4 {
      %c0_4 = arith.constant 0 : index
      %c0_5 = arith.constant 0 : index
      %10 = vector.load %arg4[%c0_4, %c0_5] : memref<128x512xbf16, #tpu.memory_space<vmem>>, vector<128x512xbf16>
      %cst = arith.constant dense<0.000000e+00> : vector<16x512xf32>
      %11 = tpu.matmul %1, %10, %cst {dimension_numbers = #tpu.dot_dimension_numbers<[1], [0], [0], [1], [0, 0, 1, 1], [], []>} : vector<16x128xbf16>, vector<128x512xbf16>, vector<16x512xf32> -> vector<16x512xf32>
      %12 = vector.extract_strided_slice %11 {offsets = [0, 0], sizes = [16, 256], strides = [1, 1]} : vector<16x512xf32> to vector<16x256xf32>
      %13 = arith.negf %12 : vector<16x256xf32>
      %14 = math.exp %13 : vector<16x256xf32>
      %cst_6 = arith.constant 1.000000e+00 : f32
      %15 = vector.broadcast %cst_6 : f32 to vector<16x256xf32>
      %16 = arith.addf %15, %14 : vector<16x256xf32>
      %17 = arith.divf %15, %16 : vector<16x256xf32>
      %18 = arith.mulf %12, %17 : vector<16x256xf32>
      %19 = vector.extract_strided_slice %11 {offsets = [0, 256], sizes = [16, 256], strides = [1, 1]} : vector<16x512xf32> to vector<16x256xf32>
      %20 = arith.mulf %18, %19 : vector<16x256xf32>
      %21 = arith.truncf %20 : vector<16x256xf32> to vector<16x256xbf16>
      %c0_7 = arith.constant 0 : index
      %c0_8 = arith.constant 0 : index
      %22 = vector.load %arg5[%c0_7, %c0_8] : memref<256x128xbf16, #tpu.memory_space<vmem>>, vector<256x128xbf16>
      %cst_9 = arith.constant dense<0.000000e+00> : vector<16x128xf32>
      %23 = tpu.matmul %21, %22, %cst_9 {dimension_numbers = #tpu.dot_dimension_numbers<[1], [0], [0], [1], [0, 0, 1, 1], [], []>} : vector<16x256xbf16>, vector<256x128xbf16>, vector<16x128xf32> -> vector<16x128xf32>
      %c0_10 = arith.constant 0 : index
      %c0_11 = arith.constant 0 : index
      %24 = vector.load %arg8[%c0_10, %c0_11] : memref<16x128xf32, #tpu.memory_space<vmem>>, vector<16x128xf32>
      tpu.vector_store %arg8[%c0_10, %c0_11], %23 {strides = array<i32>} : memref<16x128xf32, #tpu.memory_space<vmem>>, vector<16x128xf32>,
    } else {
    }
    %5 = arith.index_cast %arg0 : i32 to index
    %6 = memref.load %arg1[%5] : memref<4xi32, #tpu.memory_space<smem>>
    %c0_i32_2 = arith.constant 0 : i32
    %7 = arith.cmpi sgt, %6, %c0_i32_2 : i32
    %8 = arith.extui %7 : i1 to i32
    %c0_i32_3 = arith.constant 0 : i32
    %9 = arith.cmpi ne, %8, %c0_i32_3 : i32
    scf.if %9 {
      %c0_4 = arith.constant 0 : index
      %c0_5 = arith.constant 0 : index
      %c0_6 = arith.constant 0 : index
      %10 = vector.load %arg6[%c0_4, %c0_5, %c0_6] : memref<1x128x512xbf16, #tpu.memory_space<vmem>>, vector<1x128x512xbf16>
      %11 = vector.shape_cast %10 : vector<1x128x512xbf16> to vector<128x512xbf16>
      %cst = arith.constant dense<0.000000e+00> : vector<16x512xf32>
      %12 = tpu.matmul %1, %11, %cst {dimension_numbers = #tpu.dot_dimension_numbers<[1], [0], [0], [1], [0, 0, 1, 1], [], []>} : vector<16x128xbf16>, vector<128x512xbf16>, vector<16x512xf32> -> vector<16x512xf32>
      %13 = vector.extract_strided_slice %12 {offsets = [0, 0], sizes = [16, 256], strides = [1, 1]} : vector<16x512xf32> to vector<16x256xf32>
      %14 = arith.negf %13 : vector<16x256xf32>
      %15 = math.exp %14 : vector<16x256xf32>
      %cst_7 = arith.constant 1.000000e+00 : f32
      %16 = vector.broadcast %cst_7 : f32 to vector<16x256xf32>
      %17 = arith.addf %16, %15 : vector<16x256xf32>
      %18 = arith.divf %16, %17 : vector<16x256xf32>
      %19 = arith.mulf %13, %18 : vector<16x256xf32>
      %20 = vector.extract_strided_slice %12 {offsets = [0, 256], sizes = [16, 256], strides = [1, 1]} : vector<16x512xf32> to vector<16x256xf32>
      %21 = arith.mulf %19, %20 : vector<16x256xf32>
      %22 = arith.truncf %21 : vector<16x256xf32> to vector<16x256xbf16>
      %c0_8 = arith.constant 0 : index
      %c0_9 = arith.constant 0 : index
      %c0_10 = arith.constant 0 : index
      %23 = vector.load %arg7[%c0_8, %c0_9, %c0_10] : memref<1x256x128xbf16, #tpu.memory_space<vmem>>, vector<1x256x128xbf16>
      %24 = vector.shape_cast %23 : vector<1x256x128xbf16> to vector<256x128xbf16>
      %cst_11 = arith.constant dense<0.000000e+00> : vector<16x128xf32>
      %25 = tpu.matmul %22, %24, %cst_11 {dimension_numbers = #tpu.dot_dimension_numbers<[1], [0], [0], [1], [0, 0, 1, 1], [], []>} : vector<16x256xbf16>, vector<256x128xbf16>, vector<16x128xf32> -> vector<16x128xf32>
      %c0_12 = arith.constant 0 : index
      %c0_13 = arith.constant 0 : index
      %26 = vector.load %arg8[%c0_12, %c0_13] : memref<16x128xf32, #tpu.memory_space<vmem>>, vector<16x128xf32>
      %c0_14 = arith.constant 0 : index
      %c0_15 = arith.constant 0 : index
      %c0_16 = arith.constant 0 : index
      %27 = vector.load %arg3[%c0_14, %c0_15, %c0_16] : memref<1x16x1xf32, #tpu.memory_space<vmem>>, vector<1x16x1xf32>
      %28 = vector.shape_cast %27 : vector<1x16x1xf32> to vector<16x1xf32>
      %29 = vector.broadcast %28 : vector<16x1xf32> to vector<16x128xf32>
      %30 = arith.mulf %25, %29 : vector<16x128xf32>
      %31 = arith.addf %26, %30 : vector<16x128xf32>
      %c0_17 = arith.constant 0 : index
      %c0_18 = arith.constant 0 : index
      %32 = vector.load %arg8[%c0_17, %c0_18] : memref<16x128xf32, #tpu.memory_space<vmem>>, vector<16x128xf32>
      tpu.vector_store %arg8[%c0_17, %c0_18], %31 {strides = array<i32>} : memref<16x128xf32, #tpu.memory_space<vmem>>, vector<16x128xf32>,
    } else {
    }
    return
  }
  func.func @transform_0(%arg0: i32, %arg1: memref<4xi32, #tpu.memory_space<smem>>) -> (i32, i32) {
    %c0_i32 = arith.constant 0 : i32
    %c0_i32_0 = arith.constant 0 : i32
    %c0_i32_1 = arith.constant 0 : i32
    return %c0_i32, %c0_i32_0 : i32, i32
  }
  func.func @transform_1(%arg0: i32, %arg1: memref<4xi32, #tpu.memory_space<smem>>) -> (i32, i32, i32) {
    %c0_i32 = arith.constant 0 : i32
    %c0_i32_0 = arith.constant 0 : i32
    %c0_i32_1 = arith.constant 0 : i32
    return %arg0, %c0_i32, %c0_i32_0 : i32, i32, i32
  }
  func.func @transform_2(%arg0: i32, %arg1: memref<4xi32, #tpu.memory_space<smem>>) -> (i32, i32) {
    %c0_i32 = arith.constant 0 : i32
    %c0_i32_0 = arith.constant 0 : i32
    %c0_i32_1 = arith.constant 0 : i32
    return %c0_i32, %c0_i32_0 : i32, i32
  }
  func.func @transform_3(%arg0: i32, %arg1: memref<4xi32, #tpu.memory_space<smem>>) -> (i32, i32) {
    %c0_i32 = arith.constant 0 : i32
    %c0_i32_0 = arith.constant 0 : i32
    %c0_i32_1 = arith.constant 0 : i32
    return %c0_i32, %c0_i32_0 : i32, i32
  }
  func.func @transform_4(%arg0: i32, %arg1: memref<4xi32, #tpu.memory_space<smem>>) -> (i32, i32, i32) {
    %c0_i32 = arith.constant 0 : i32
    %c0_i32_0 = arith.constant 0 : i32
    %c0_i32_1 = arith.constant 0 : i32
    return %arg0, %c0_i32, %c0_i32_0 : i32, i32, i32
  }
  func.func @transform_5(%arg0: i32, %arg1: memref<4xi32, #tpu.memory_space<smem>>) -> (i32, i32, i32) {
    %c0_i32 = arith.constant 0 : i32
    %c0_i32_0 = arith.constant 0 : i32
    %c0_i32_1 = arith.constant 0 : i32
    return %arg0, %c0_i32, %c0_i32_0 : i32, i32, i32
  }
  func.func @transform_6(%arg0: i32, %arg1: memref<4xi32, #tpu.memory_space<smem>>) -> (i32, i32) {
    %c0_i32 = arith.constant 0 : i32
    %c0_i32_0 = arith.constant 0 : i32
    %c0_i32_1 = arith.constant 0 : i32
    return %c0_i32, %c0_i32_0 : i32, i32
  }
}

module attributes {stable_mosaic.version = 11 : i64} {
  func.func @_attn_block_kernel(%arg0: i32, %arg1: memref<16x128xf32, #tpu.memory_space<vmem>>, %arg2: memref<16x128xf32, #tpu.memory_space<vmem>>, %arg3: memref<1x128xf32, #tpu.memory_space<vmem>>, %arg4: memref<128x256xbf16, #tpu.memory_space<vmem>>, %arg5: memref<16x256xf32, #tpu.memory_space<vmem>>, %arg6: memref<16x256xf32, #tpu.memory_space<vmem>>, %arg7: memref<128x128xbf16, #tpu.memory_space<vmem>>, %arg8: memref<1x128xf32, #tpu.memory_space<vmem>>, %arg9: memref<128x4xbf16, #tpu.memory_space<vmem>>, %arg10: memref<16x128xf32, #tpu.memory_space<vmem>>, %arg11: memref<16x128xf32, #tpu.memory_space<vmem>>, %arg12: memref<4x16x1xf32, #tpu.memory_space<vmem>>, %arg13: memref<1x4xi32, #tpu.memory_space<vmem>>) attributes {dimension_semantics = [#tpu.dimension_semantics<arbitrary>], iteration_bounds = array<i64: 1>, scalar_prefetch = 0 : i64, scratch_operands = 0 : i64, tpu.core_type = #tpu.core_type<tc>, window_params = [{pipeline_mode = #tpu.pipeline_mode<synchronous>, transform_indices = @transform_0, window_bounds = array<i64: 16, 128>}, {pipeline_mode = #tpu.pipeline_mode<synchronous>, transform_indices = @transform_1, window_bounds = array<i64: 16, 128>}, {pipeline_mode = #tpu.pipeline_mode<synchronous>, transform_indices = @transform_2, window_bounds = array<i64: 1, 128>}, {pipeline_mode = #tpu.pipeline_mode<synchronous>, transform_indices = @transform_3, window_bounds = array<i64: 128, 256>}, {pipeline_mode = #tpu.pipeline_mode<synchronous>, transform_indices = @transform_4, window_bounds = array<i64: 16, 256>}, {pipeline_mode = #tpu.pipeline_mode<synchronous>, transform_indices = @transform_5, window_bounds = array<i64: 16, 256>}, {pipeline_mode = #tpu.pipeline_mode<synchronous>, transform_indices = @transform_6, window_bounds = array<i64: 128, 128>}, {pipeline_mode = #tpu.pipeline_mode<synchronous>, transform_indices = @transform_7, window_bounds = array<i64: 1, 128>}, {pipeline_mode = #tpu.pipeline_mode<synchronous>, transform_indices = @transform_8, window_bounds = array<i64: 128, 4>}, {pipeline_mode = #tpu.pipeline_mode<synchronous>, transform_indices = @transform_9, window_bounds = array<i64: 16, 128>}, {pipeline_mode = #tpu.pipeline_mode<synchronous>, transform_indices = @transform_10, window_bounds = array<i64: 16, 128>}, {pipeline_mode = #tpu.pipeline_mode<synchronous>, transform_indices = @transform_11, window_bounds = array<i64: 4, 16, 1>}, {pipeline_mode = #tpu.pipeline_mode<synchronous>, transform_indices = @transform_12, window_bounds = array<i64: 1, 4>}]} {
    %c0 = arith.constant 0 : index
    %c0_0 = arith.constant 0 : index
    %0 = vector.load %arg1[%c0, %c0_0] : memref<16x128xf32, #tpu.memory_space<vmem>>, vector<16x128xf32>
    %c0_1 = arith.constant 0 : index
    %c0_2 = arith.constant 0 : index
    %1 = vector.load %arg2[%c0_1, %c0_2] : memref<16x128xf32, #tpu.memory_space<vmem>>, vector<16x128xf32>
    %2 = arith.addf %0, %1 : vector<16x128xf32>
    %3 = arith.mulf %2, %2 : vector<16x128xf32>
    %cst = arith.constant dense<0.000000e+00> : vector<16xf32>
    %4 = vector.multi_reduction <add>, %3, %cst [1] : vector<16x128xf32> to vector<16xf32>
    %5 = vector.shape_cast %4 : vector<16xf32> to vector<16x1xf32>
    %cst_3 = arith.constant 1.280000e+02 : f32
    %6 = vector.broadcast %cst_3 : f32 to vector<16x1xf32>
    %7 = arith.divf %5, %6 : vector<16x1xf32>
    %cst_4 = arith.constant 9.99999997E-7 : f32
    %8 = vector.broadcast %cst_4 : f32 to vector<16x1xf32>
    %9 = arith.addf %7, %8 : vector<16x1xf32>
    %10 = math.rsqrt %9 : vector<16x1xf32>
    %11 = vector.broadcast %10 : vector<16x1xf32> to vector<16x128xf32>
    %12 = arith.mulf %2, %11 : vector<16x128xf32>
    %c0_5 = arith.constant 0 : index
    %c0_6 = arith.constant 0 : index
    %13 = vector.load %arg3[%c0_5, %c0_6] : memref<1x128xf32, #tpu.memory_space<vmem>>, vector<1x128xf32>
    %14 = vector.broadcast %13 : vector<1x128xf32> to vector<16x128xf32>
    %15 = arith.mulf %12, %14 : vector<16x128xf32>
    %16 = arith.truncf %15 : vector<16x128xf32> to vector<16x128xbf16>
    %c0_7 = arith.constant 0 : index
    %c0_8 = arith.constant 0 : index
    %17 = vector.load %arg4[%c0_7, %c0_8] : memref<128x256xbf16, #tpu.memory_space<vmem>>, vector<128x256xbf16>
    %cst_9 = arith.constant dense<0.000000e+00> : vector<16x256xf32>
    %18 = tpu.matmul %16, %17, %cst_9 {dimension_numbers = #tpu.dot_dimension_numbers<[1], [0], [0], [1], [0, 0, 1, 1], [], []>} : vector<16x128xbf16>, vector<128x256xbf16>, vector<16x256xf32> -> vector<16x256xf32>
    %19 = tpu.iota {dimensions = array<i32: 1>} : vector<16x256xi32>
    %c32_i32 = arith.constant 32 : i32
    %c0_i32 = arith.constant 0 : i32
    %20 = arith.cmpi eq, %c32_i32, %c0_i32 : i32
    %c1_i32 = arith.constant 1 : i32
    %21 = arith.select %20, %c1_i32, %c32_i32 : i32
    %22 = vector.broadcast %21 : i32 to vector<16x256xi32>
    %23 = arith.remsi %19, %22 : vector<16x256xi32>
    %c0_i32_10 = arith.constant 0 : i32
    %24 = vector.broadcast %c0_i32_10 : i32 to vector<16x256xi32>
    %25 = arith.cmpi ne, %23, %24 : vector<16x256xi32>
    %c0_i32_11 = arith.constant 0 : i32
    %26 = vector.broadcast %c0_i32_11 : i32 to vector<16x256xi32>
    %27 = arith.cmpi slt, %23, %26 : vector<16x256xi32>
    %c0_i32_12 = arith.constant 0 : i32
    %28 = arith.cmpi slt, %21, %c0_i32_12 : i32
    %29 = vector.broadcast %28 : i1 to vector<16x256xi1>
    %30 = vector.broadcast %29 : vector<16x256xi1> to vector<16x256xi1>
    %31 = arith.xori %27, %30 : vector<16x256xi1>
    %32 = arith.andi %31, %25 : vector<16x256xi1>
    %33 = vector.broadcast %21 : i32 to vector<16x256xi32>
    %34 = arith.addi %23, %33 : vector<16x256xi32>
    %35 = arith.select %32, %34, %23 : vector<16x256xi1>, vector<16x256xi32>
    %c16_i32 = arith.constant 16 : i32
    %36 = vector.broadcast %c16_i32 : i32 to vector<16x256xi32>
    %37 = arith.cmpi slt, %35, %36 : vector<16x256xi32>
    %c240_i32 = arith.constant 240 : i32
    %38 = tpu.dynamic_rotate %18 by %c240_i32 dim 1 : vector<16x256xf32>, i32 -> vector<16x256xf32>
    %cst_13 = arith.constant 0.000000e+00 : f32
    %39 = vector.broadcast %cst_13 : f32 to vector<16x256xf32>
    %40 = arith.subf %39, %38 : vector<16x256xf32>
    %c16_i32_14 = arith.constant 16 : i32
    %41 = tpu.dynamic_rotate %18 by %c16_i32_14 dim 1 : vector<16x256xf32>, i32 -> vector<16x256xf32>
    %42 = arith.select %37, %40, %41 : vector<16x256xi1>, vector<16x256xf32>
    %c0_15 = arith.constant 0 : index
    %c0_16 = arith.constant 0 : index
    %43 = vector.load %arg5[%c0_15, %c0_16] : memref<16x256xf32, #tpu.memory_space<vmem>>, vector<16x256xf32>
    %44 = arith.mulf %18, %43 : vector<16x256xf32>
    %c0_17 = arith.constant 0 : index
    %c0_18 = arith.constant 0 : index
    %45 = vector.load %arg6[%c0_17, %c0_18] : memref<16x256xf32, #tpu.memory_space<vmem>>, vector<16x256xf32>
    %46 = arith.mulf %42, %45 : vector<16x256xf32>
    %47 = arith.addf %44, %46 : vector<16x256xf32>
    %48 = vector.extract_strided_slice %47 {offsets = [0, 0], sizes = [16, 128], strides = [1, 1]} : vector<16x256xf32> to vector<16x128xf32>
    %49 = vector.extract_strided_slice %47 {offsets = [0, 128], sizes = [16, 64], strides = [1, 1]} : vector<16x256xf32> to vector<16x64xf32>
    %50 = vector.extract_strided_slice %47 {offsets = [0, 192], sizes = [16, 64], strides = [1, 1]} : vector<16x256xf32> to vector<16x64xf32>
    %51 = vector.extract_strided_slice %48 {offsets = [0, 0], sizes = [16, 32], strides = [1, 1]} : vector<16x128xf32> to vector<16x32xf32>
    %52 = vector.extract_strided_slice %48 {offsets = [0, 32], sizes = [16, 32], strides = [1, 1]} : vector<16x128xf32> to vector<16x32xf32>
    %53 = vector.extract_strided_slice %48 {offsets = [0, 64], sizes = [16, 32], strides = [1, 1]} : vector<16x128xf32> to vector<16x32xf32>
    %54 = vector.extract_strided_slice %48 {offsets = [0, 96], sizes = [16, 32], strides = [1, 1]} : vector<16x128xf32> to vector<16x32xf32>
    %55 = vector.shape_cast %51 : vector<16x32xf32> to vector<1x16x32xf32>
    %56 = vector.shape_cast %52 : vector<16x32xf32> to vector<1x16x32xf32>
    %57 = vector.shape_cast %53 : vector<16x32xf32> to vector<1x16x32xf32>
    %58 = vector.shape_cast %54 : vector<16x32xf32> to vector<1x16x32xf32>
    %59 = tpu.concatenate %55, %56, %57, %58 in 0 : vector<1x16x32xf32>, vector<1x16x32xf32>, vector<1x16x32xf32>, vector<1x16x32xf32> -> vector<4x16x32xf32>
    %60 = vector.extract_strided_slice %49 {offsets = [0, 0], sizes = [16, 32], strides = [1, 1]} : vector<16x64xf32> to vector<16x32xf32>
    %61 = vector.extract_strided_slice %49 {offsets = [0, 32], sizes = [16, 32], strides = [1, 1]} : vector<16x64xf32> to vector<16x32xf32>
    %62 = vector.extract_strided_slice %50 {offsets = [0, 0], sizes = [16, 32], strides = [1, 1]} : vector<16x64xf32> to vector<16x32xf32>
    %63 = vector.extract_strided_slice %50 {offsets = [0, 32], sizes = [16, 32], strides = [1, 1]} : vector<16x64xf32> to vector<16x32xf32>
    %64 = vector.shape_cast %60 : vector<16x32xf32> to vector<1x16x32xf32>
    %65 = vector.shape_cast %60 : vector<16x32xf32> to vector<1x16x32xf32>
    %66 = vector.shape_cast %61 : vector<16x32xf32> to vector<1x16x32xf32>
    %67 = vector.shape_cast %61 : vector<16x32xf32> to vector<1x16x32xf32>
    %68 = tpu.concatenate %64, %65, %66, %67 in 0 : vector<1x16x32xf32>, vector<1x16x32xf32>, vector<1x16x32xf32>, vector<1x16x32xf32> -> vector<4x16x32xf32>
    %69 = vector.shape_cast %62 : vector<16x32xf32> to vector<1x16x32xf32>
    %70 = vector.shape_cast %62 : vector<16x32xf32> to vector<1x16x32xf32>
    %71 = vector.shape_cast %63 : vector<16x32xf32> to vector<1x16x32xf32>
    %72 = vector.shape_cast %63 : vector<16x32xf32> to vector<1x16x32xf32>
    %73 = tpu.concatenate %69, %70, %71, %72 in 0 : vector<1x16x32xf32>, vector<1x16x32xf32>, vector<1x16x32xf32>, vector<1x16x32xf32> -> vector<4x16x32xf32>
    %74 = tpu.iota {dimensions = array<i32: 0>} : vector<16x16xi32>
    %75 = tpu.iota {dimensions = array<i32: 1>} : vector<16x16xi32>
    %76 = arith.cmpi sle, %75, %74 : vector<16x16xi32>
    %77 = vector.shape_cast %76 : vector<16x16xi1> to vector<1x16x16xi1>
    %78 = arith.truncf %59 : vector<4x16x32xf32> to vector<4x16x32xbf16>
    %79 = arith.truncf %68 : vector<4x16x32xf32> to vector<4x16x32xbf16>
    "tpu.trace_start"() <{level = 10 : i32, message = "htd,hsd->hts"}> : () -> ()
    %cst_19 = arith.constant dense<0.000000e+00> : vector<4x16x16xf32>
    %80 = tpu.matmul %78, %79, %cst_19 {dimension_numbers = #tpu.dot_dimension_numbers<[2], [2], [1], [1], [0, 0, 0, 1, 1, 1], [0], [0]>} : vector<4x16x32xbf16>, vector<4x16x32xbf16>, vector<4x16x16xf32> -> vector<4x16x16xf32>
    %cst_20 = arith.constant -1.000000e+30 : f32
    "tpu.trace_stop"() : () -> ()
    %81 = vector.shape_cast %77 : vector<1x16x16xi1> to vector<1x16x16xi1>
    %82 = vector.broadcast %81 : vector<1x16x16xi1> to vector<4x16x16xi1>
    %83 = vector.broadcast %cst_20 : f32 to vector<4x16x16xf32>
    %84 = arith.select %82, %80, %83 : vector<4x16x16xi1>, vector<4x16x16xf32>
    %cst_21 = arith.constant dense<0xFF800000> : vector<4x16xf32>
    %85 = vector.multi_reduction <maximumf>, %84, %cst_21 [2] : vector<4x16x16xf32> to vector<4x16xf32>
    %86 = vector.shape_cast %85 : vector<4x16xf32> to vector<4x16x1xf32>
    %87 = vector.broadcast %86 : vector<4x16x1xf32> to vector<4x16x16xf32>
    %88 = arith.subf %84, %87 : vector<4x16x16xf32>
    %89 = math.exp %88 : vector<4x16x16xf32>
    %cst_22 = arith.constant dense<0.000000e+00> : vector<4x16xf32>
    %90 = vector.multi_reduction <add>, %89, %cst_22 [2] : vector<4x16x16xf32> to vector<4x16xf32>
    %91 = vector.shape_cast %90 : vector<4x16xf32> to vector<4x16x1xf32>
    %92 = tpu.reciprocal %91 {approx = true} : vector<4x16x1xf32> -> vector<4x16x1xf32>
    %93 = vector.broadcast %92 : vector<4x16x1xf32> to vector<4x16x16xf32>
    %94 = arith.mulf %89, %93 : vector<4x16x16xf32>
    %95 = arith.truncf %94 : vector<4x16x16xf32> to vector<4x16x16xbf16>
    %96 = arith.truncf %73 : vector<4x16x32xf32> to vector<4x16x32xbf16>
    "tpu.trace_start"() <{level = 10 : i32, message = "hts,hsd->htd"}> : () -> ()
    %cst_23 = arith.constant dense<0.000000e+00> : vector<4x16x32xf32>
    %97 = tpu.matmul %95, %96, %cst_23 {dimension_numbers = #tpu.dot_dimension_numbers<[2], [1], [1], [2], [0, 0, 0, 1, 1, 2], [0], [0]>} : vector<4x16x16xbf16>, vector<4x16x32xbf16>, vector<4x16x32xf32> -> vector<4x16x32xf32>
    "tpu.trace_stop"() : () -> ()
    %98 = vector.extract_strided_slice %97 {offsets = [0, 0, 0], sizes = [1, 16, 32], strides = [1, 1, 1]} : vector<4x16x32xf32> to vector<1x16x32xf32>
    %99 = vector.shape_cast %98 : vector<1x16x32xf32> to vector<16x32xf32>
    %100 = vector.extract_strided_slice %97 {offsets = [1, 0, 0], sizes = [1, 16, 32], strides = [1, 1, 1]} : vector<4x16x32xf32> to vector<1x16x32xf32>
    %101 = vector.shape_cast %100 : vector<1x16x32xf32> to vector<16x32xf32>
    %102 = vector.extract_strided_slice %97 {offsets = [2, 0, 0], sizes = [1, 16, 32], strides = [1, 1, 1]} : vector<4x16x32xf32> to vector<1x16x32xf32>
    %103 = vector.shape_cast %102 : vector<1x16x32xf32> to vector<16x32xf32>
    %104 = vector.extract_strided_slice %97 {offsets = [3, 0, 0], sizes = [1, 16, 32], strides = [1, 1, 1]} : vector<4x16x32xf32> to vector<1x16x32xf32>
    %105 = vector.shape_cast %104 : vector<1x16x32xf32> to vector<16x32xf32>
    %106 = tpu.concatenate %99, %101, %103, %105 in 1 : vector<16x32xf32>, vector<16x32xf32>, vector<16x32xf32>, vector<16x32xf32> -> vector<16x128xf32>
    %107 = arith.truncf %106 : vector<16x128xf32> to vector<16x128xbf16>
    %c0_24 = arith.constant 0 : index
    %c0_25 = arith.constant 0 : index
    %108 = vector.load %arg7[%c0_24, %c0_25] : memref<128x128xbf16, #tpu.memory_space<vmem>>, vector<128x128xbf16>
    %cst_26 = arith.constant dense<0.000000e+00> : vector<16x128xf32>
    %109 = tpu.matmul %107, %108, %cst_26 {dimension_numbers = #tpu.dot_dimension_numbers<[1], [0], [0], [1], [0, 0, 1, 1], [], []>} : vector<16x128xbf16>, vector<128x128xbf16>, vector<16x128xf32> -> vector<16x128xf32>
    %110 = arith.addf %109, %2 : vector<16x128xf32>
    %c0_27 = arith.constant 0 : index
    %c0_28 = arith.constant 0 : index
    %111 = vector.load %arg11[%c0_27, %c0_28] : memref<16x128xf32, #tpu.memory_space<vmem>>, vector<16x128xf32>
    tpu.vector_store %arg11[%c0_27, %c0_28], %110 {strides = array<i32>} : memref<16x128xf32, #tpu.memory_space<vmem>>, vector<16x128xf32>,
    %112 = arith.mulf %110, %110 : vector<16x128xf32>
    %cst_29 = arith.constant dense<0.000000e+00> : vector<16xf32>
    %113 = vector.multi_reduction <add>, %112, %cst_29 [1] : vector<16x128xf32> to vector<16xf32>
    %114 = vector.shape_cast %113 : vector<16xf32> to vector<16x1xf32>
    %cst_30 = arith.constant 1.280000e+02 : f32
    %115 = vector.broadcast %cst_30 : f32 to vector<16x1xf32>
    %116 = arith.divf %114, %115 : vector<16x1xf32>
    %cst_31 = arith.constant 9.99999997E-7 : f32
    %117 = vector.broadcast %cst_31 : f32 to vector<16x1xf32>
    %118 = arith.addf %116, %117 : vector<16x1xf32>
    %119 = math.rsqrt %118 : vector<16x1xf32>
    %120 = vector.broadcast %119 : vector<16x1xf32> to vector<16x128xf32>
    %121 = arith.mulf %110, %120 : vector<16x128xf32>
    %c0_32 = arith.constant 0 : index
    %c0_33 = arith.constant 0 : index
    %122 = vector.load %arg8[%c0_32, %c0_33] : memref<1x128xf32, #tpu.memory_space<vmem>>, vector<1x128xf32>
    %123 = vector.broadcast %122 : vector<1x128xf32> to vector<16x128xf32>
    %124 = arith.mulf %121, %123 : vector<16x128xf32>
    %c0_34 = arith.constant 0 : index
    %c0_35 = arith.constant 0 : index
    %125 = vector.load %arg10[%c0_34, %c0_35] : memref<16x128xf32, #tpu.memory_space<vmem>>, vector<16x128xf32>
    tpu.vector_store %arg10[%c0_34, %c0_35], %124 {strides = array<i32>} : memref<16x128xf32, #tpu.memory_space<vmem>>, vector<16x128xf32>,
    %126 = arith.truncf %124 : vector<16x128xf32> to vector<16x128xbf16>
    %c0_36 = arith.constant 0 : index
    %c0_37 = arith.constant 0 : index
    %127 = vector.load %arg9[%c0_36, %c0_37] : memref<128x4xbf16, #tpu.memory_space<vmem>>, vector<128x4xbf16>
    %cst_38 = arith.constant dense<0.000000e+00> : vector<16x4xf32>
    %128 = tpu.matmul %126, %127, %cst_38 {dimension_numbers = #tpu.dot_dimension_numbers<[1], [0], [0], [1], [0, 0, 1, 1], [], []>} : vector<16x128xbf16>, vector<128x4xbf16>, vector<16x4xf32> -> vector<16x4xf32>
    %cst_39 = arith.constant dense<0xFF800000> : vector<16xf32>
    %129 = vector.multi_reduction <maximumf>, %128, %cst_39 [1] : vector<16x4xf32> to vector<16xf32>
    %130 = vector.shape_cast %129 : vector<16xf32> to vector<16x1xf32>
    %131 = vector.broadcast %130 : vector<16x1xf32> to vector<16x4xf32>
    %132 = arith.subf %128, %131 : vector<16x4xf32>
    %133 = math.exp %132 : vector<16x4xf32>
    %cst_40 = arith.constant dense<0.000000e+00> : vector<16xf32>
    %134 = vector.multi_reduction <add>, %133, %cst_40 [1] : vector<16x4xf32> to vector<16xf32>
    %135 = vector.shape_cast %134 : vector<16xf32> to vector<16x1xf32>
    %136 = vector.broadcast %135 : vector<16x1xf32> to vector<16x4xf32>
    %137 = arith.divf %133, %136 : vector<16x4xf32>
    %138 = tpu.iota {dimensions = array<i32: 1>} : vector<16x4xi32>
    %c0_i32_41 = arith.constant 0 : i32
    %139 = vector.broadcast %c0_i32_41 : i32 to vector<16x4xi32>
    %cst_42 = arith.constant 0.000000e+00 : f32
    %140 = vector.broadcast %cst_42 : f32 to vector<16x1xf32>
    %cst_43 = arith.constant 0.000000e+00 : f32
    %141 = vector.broadcast %cst_43 : f32 to vector<16x1xf32>
    %cst_44 = arith.constant 0.000000e+00 : f32
    %142 = vector.broadcast %cst_44 : f32 to vector<16x1xf32>
    %cst_45 = arith.constant 0.000000e+00 : f32
    %143 = vector.broadcast %cst_45 : f32 to vector<16x1xf32>
    %cst_46 = arith.constant dense<0xFF800000> : vector<16xf32>
    %144 = vector.multi_reduction <maximumf>, %137, %cst_46 [1] : vector<16x4xf32> to vector<16xf32>
    %145 = vector.shape_cast %144 : vector<16xf32> to vector<16x1xf32>
    %146 = vector.broadcast %145 : vector<16x1xf32> to vector<16x4xf32>
    %147 = arith.cmpf oge, %137, %146 : vector<16x4xf32>
    %c4_i32 = arith.constant 4 : i32
    %148 = vector.broadcast %c4_i32 : i32 to vector<16x4xi32>
    %149 = arith.select %147, %138, %148 : vector<16x4xi1>, vector<16x4xi32>
    %cst_47 = arith.constant dense<2147483647> : vector<16xi32>
    %150 = vector.multi_reduction <minsi>, %149, %cst_47 [1] : vector<16x4xi32> to vector<16xi32>
    %151 = vector.shape_cast %150 : vector<16xi32> to vector<16x1xi32>
    %c0_i32_48 = arith.constant 0 : i32
    %152 = vector.broadcast %c0_i32_48 : i32 to vector<16x1xi32>
    %153 = arith.cmpi eq, %151, %152 : vector<16x1xi32>
    %cst_49 = arith.constant 0.000000e+00 : f32
    %154 = vector.broadcast %cst_49 : f32 to vector<16x1xf32>
    %155 = arith.select %153, %145, %154 : vector<16x1xi1>, vector<16x1xf32>
    %156 = arith.addf %140, %155 : vector<16x1xf32>
    %c1_i32_50 = arith.constant 1 : i32
    %157 = vector.broadcast %c1_i32_50 : i32 to vector<16x1xi32>
    %158 = arith.cmpi eq, %151, %157 : vector<16x1xi32>
    %cst_51 = arith.constant 0.000000e+00 : f32
    %159 = vector.broadcast %cst_51 : f32 to vector<16x1xf32>
    %160 = arith.select %158, %145, %159 : vector<16x1xi1>, vector<16x1xf32>
    %161 = arith.addf %141, %160 : vector<16x1xf32>
    %c2_i32 = arith.constant 2 : i32
    %162 = vector.broadcast %c2_i32 : i32 to vector<16x1xi32>
    %163 = arith.cmpi eq, %151, %162 : vector<16x1xi32>
    %cst_52 = arith.constant 0.000000e+00 : f32
    %164 = vector.broadcast %cst_52 : f32 to vector<16x1xf32>
    %165 = arith.select %163, %145, %164 : vector<16x1xi1>, vector<16x1xf32>
    %166 = arith.addf %142, %165 : vector<16x1xf32>
    %c3_i32 = arith.constant 3 : i32
    %167 = vector.broadcast %c3_i32 : i32 to vector<16x1xi32>
    %168 = arith.cmpi eq, %151, %167 : vector<16x1xi32>
    %cst_53 = arith.constant 0.000000e+00 : f32
    %169 = vector.broadcast %cst_53 : f32 to vector<16x1xf32>
    %170 = arith.select %168, %145, %169 : vector<16x1xi1>, vector<16x1xf32>
    %171 = arith.addf %143, %170 : vector<16x1xf32>
    %172 = vector.broadcast %151 : vector<16x1xi32> to vector<16x4xi32>
    %173 = arith.cmpi eq, %138, %172 : vector<16x4xi32>
    %174 = arith.extui %173 : vector<16x4xi1> to vector<16x4xi32>
    %175 = arith.maxsi %139, %174 : vector<16x4xi32>
    %176 = vector.broadcast %151 : vector<16x1xi32> to vector<16x4xi32>
    %177 = arith.cmpi eq, %138, %176 : vector<16x4xi32>
    %cst_54 = arith.constant 0xFF800000 : f32
    %178 = vector.broadcast %cst_54 : f32 to vector<16x4xf32>
    %179 = arith.select %177, %178, %137 : vector<16x4xi1>, vector<16x4xf32>
    %cst_55 = arith.constant dense<0xFF800000> : vector<16xf32>
    %180 = vector.multi_reduction <maximumf>, %179, %cst_55 [1] : vector<16x4xf32> to vector<16xf32>
    %181 = vector.shape_cast %180 : vector<16xf32> to vector<16x1xf32>
    %182 = vector.broadcast %181 : vector<16x1xf32> to vector<16x4xf32>
    %183 = arith.cmpf oge, %179, %182 : vector<16x4xf32>
    %c4_i32_56 = arith.constant 4 : i32
    %184 = vector.broadcast %c4_i32_56 : i32 to vector<16x4xi32>
    %185 = arith.select %183, %138, %184 : vector<16x4xi1>, vector<16x4xi32>
    %cst_57 = arith.constant dense<2147483647> : vector<16xi32>
    %186 = vector.multi_reduction <minsi>, %185, %cst_57 [1] : vector<16x4xi32> to vector<16xi32>
    %187 = vector.shape_cast %186 : vector<16xi32> to vector<16x1xi32>
    %c0_i32_58 = arith.constant 0 : i32
    %188 = vector.broadcast %c0_i32_58 : i32 to vector<16x1xi32>
    %189 = arith.cmpi eq, %187, %188 : vector<16x1xi32>
    %cst_59 = arith.constant 0.000000e+00 : f32
    %190 = vector.broadcast %cst_59 : f32 to vector<16x1xf32>
    %191 = arith.select %189, %181, %190 : vector<16x1xi1>, vector<16x1xf32>
    %192 = arith.addf %156, %191 : vector<16x1xf32>
    %c1_i32_60 = arith.constant 1 : i32
    %193 = vector.broadcast %c1_i32_60 : i32 to vector<16x1xi32>
    %194 = arith.cmpi eq, %187, %193 : vector<16x1xi32>
    %cst_61 = arith.constant 0.000000e+00 : f32
    %195 = vector.broadcast %cst_61 : f32 to vector<16x1xf32>
    %196 = arith.select %194, %181, %195 : vector<16x1xi1>, vector<16x1xf32>
    %197 = arith.addf %161, %196 : vector<16x1xf32>
    %c2_i32_62 = arith.constant 2 : i32
    %198 = vector.broadcast %c2_i32_62 : i32 to vector<16x1xi32>
    %199 = arith.cmpi eq, %187, %198 : vector<16x1xi32>
    %cst_63 = arith.constant 0.000000e+00 : f32
    %200 = vector.broadcast %cst_63 : f32 to vector<16x1xf32>
    %201 = arith.select %199, %181, %200 : vector<16x1xi1>, vector<16x1xf32>
    %202 = arith.addf %166, %201 : vector<16x1xf32>
    %c3_i32_64 = arith.constant 3 : i32
    %203 = vector.broadcast %c3_i32_64 : i32 to vector<16x1xi32>
    %204 = arith.cmpi eq, %187, %203 : vector<16x1xi32>
    %cst_65 = arith.constant 0.000000e+00 : f32
    %205 = vector.broadcast %cst_65 : f32 to vector<16x1xf32>
    %206 = arith.select %204, %181, %205 : vector<16x1xi1>, vector<16x1xf32>
    %207 = arith.addf %171, %206 : vector<16x1xf32>
    %208 = vector.broadcast %187 : vector<16x1xi32> to vector<16x4xi32>
    %209 = arith.cmpi eq, %138, %208 : vector<16x4xi32>
    %210 = arith.extui %209 : vector<16x4xi1> to vector<16x4xi32>
    %211 = arith.maxsi %175, %210 : vector<16x4xi32>
    %212 = vector.shape_cast %192 : vector<16x1xf32> to vector<1x16x1xf32>
    %213 = vector.shape_cast %197 : vector<16x1xf32> to vector<1x16x1xf32>
    %214 = vector.shape_cast %202 : vector<16x1xf32> to vector<1x16x1xf32>
    %215 = vector.shape_cast %207 : vector<16x1xf32> to vector<1x16x1xf32>
    %216 = tpu.concatenate %212, %213, %214, %215 in 0 : vector<1x16x1xf32>, vector<1x16x1xf32>, vector<1x16x1xf32>, vector<1x16x1xf32> -> vector<4x16x1xf32>
    %c0_66 = arith.constant 0 : index
    %c0_67 = arith.constant 0 : index
    %c0_68 = arith.constant 0 : index
    %217 = vector.load %arg12[%c0_66, %c0_67, %c0_68] : memref<4x16x1xf32, #tpu.memory_space<vmem>>, vector<4x16x1xf32>
    tpu.vector_store %arg12[%c0_66, %c0_67, %c0_68], %216 {strides = array<i32>} : memref<4x16x1xf32, #tpu.memory_space<vmem>>, vector<4x16x1xf32>,
    %cst_69 = arith.constant dense<0> : vector<4xi32>
    %218 = vector.multi_reduction <add>, %211, %cst_69 [0] : vector<16x4xi32> to vector<4xi32>
    %219 = vector.shape_cast %218 : vector<4xi32> to vector<1x4xi32>
    %c0_70 = arith.constant 0 : index
    %c0_71 = arith.constant 0 : index
    %220 = vector.load %arg13[%c0_70, %c0_71] : memref<1x4xi32, #tpu.memory_space<vmem>>, vector<1x4xi32>
    tpu.vector_store %arg13[%c0_70, %c0_71], %219 {strides = array<i32>} : memref<1x4xi32, #tpu.memory_space<vmem>>, vector<1x4xi32>,
    return
  }
  func.func @transform_0(%arg0: i32) -> (i32, i32) {
    %c0_i32 = arith.constant 0 : i32
    %c0_i32_0 = arith.constant 0 : i32
    %c0_i32_1 = arith.constant 0 : i32
    return %c0_i32, %c0_i32_0 : i32, i32
  }
  func.func @transform_1(%arg0: i32) -> (i32, i32) {
    %c0_i32 = arith.constant 0 : i32
    %c0_i32_0 = arith.constant 0 : i32
    %c0_i32_1 = arith.constant 0 : i32
    return %c0_i32, %c0_i32_0 : i32, i32
  }
  func.func @transform_2(%arg0: i32) -> (i32, i32) {
    %c0_i32 = arith.constant 0 : i32
    %c0_i32_0 = arith.constant 0 : i32
    %c0_i32_1 = arith.constant 0 : i32
    return %c0_i32, %c0_i32_0 : i32, i32
  }
  func.func @transform_3(%arg0: i32) -> (i32, i32) {
    %c0_i32 = arith.constant 0 : i32
    %c0_i32_0 = arith.constant 0 : i32
    %c0_i32_1 = arith.constant 0 : i32
    return %c0_i32, %c0_i32_0 : i32, i32
  }
  func.func @transform_4(%arg0: i32) -> (i32, i32) {
    %c0_i32 = arith.constant 0 : i32
    %c0_i32_0 = arith.constant 0 : i32
    %c0_i32_1 = arith.constant 0 : i32
    return %c0_i32, %c0_i32_0 : i32, i32
  }
  func.func @transform_5(%arg0: i32) -> (i32, i32) {
    %c0_i32 = arith.constant 0 : i32
    %c0_i32_0 = arith.constant 0 : i32
    %c0_i32_1 = arith.constant 0 : i32
    return %c0_i32, %c0_i32_0 : i32, i32
  }
  func.func @transform_6(%arg0: i32) -> (i32, i32) {
    %c0_i32 = arith.constant 0 : i32
    %c0_i32_0 = arith.constant 0 : i32
    %c0_i32_1 = arith.constant 0 : i32
    return %c0_i32, %c0_i32_0 : i32, i32
  }
  func.func @transform_7(%arg0: i32) -> (i32, i32) {
    %c0_i32 = arith.constant 0 : i32
    %c0_i32_0 = arith.constant 0 : i32
    %c0_i32_1 = arith.constant 0 : i32
    return %c0_i32, %c0_i32_0 : i32, i32
  }
  func.func @transform_8(%arg0: i32) -> (i32, i32) {
    %c0_i32 = arith.constant 0 : i32
    %c0_i32_0 = arith.constant 0 : i32
    %c0_i32_1 = arith.constant 0 : i32
    return %c0_i32, %c0_i32_0 : i32, i32
  }
  func.func @transform_9(%arg0: i32) -> (i32, i32) {
    %c0_i32 = arith.constant 0 : i32
    %c0_i32_0 = arith.constant 0 : i32
    %c0_i32_1 = arith.constant 0 : i32
    return %c0_i32, %c0_i32_0 : i32, i32
  }
  func.func @transform_10(%arg0: i32) -> (i32, i32) {
    %c0_i32 = arith.constant 0 : i32
    %c0_i32_0 = arith.constant 0 : i32
    %c0_i32_1 = arith.constant 0 : i32
    return %c0_i32, %c0_i32_0 : i32, i32
  }
  func.func @transform_11(%arg0: i32) -> (i32, i32, i32) {
    %c0_i32 = arith.constant 0 : i32
    %c0_i32_0 = arith.constant 0 : i32
    %c0_i32_1 = arith.constant 0 : i32
    %c0_i32_2 = arith.constant 0 : i32
    return %c0_i32, %c0_i32_0, %c0_i32_1 : i32, i32, i32
  }
  func.func @transform_12(%arg0: i32) -> (i32, i32) {
    %c0_i32 = arith.constant 0 : i32
    %c0_i32_0 = arith.constant 0 : i32
    %c0_i32_1 = arith.constant 0 : i32
    return %c0_i32, %c0_i32_0 : i32, i32
  }
}

module attributes {stable_mosaic.version = 11 : i64} {
  func.func @_final_norm_kernel(%arg0: i32, %arg1: memref<16x128xf32, #tpu.memory_space<vmem>>, %arg2: memref<16x128xf32, #tpu.memory_space<vmem>>, %arg3: memref<1x128xf32, #tpu.memory_space<vmem>>, %arg4: memref<16x128xf32, #tpu.memory_space<vmem>>) attributes {dimension_semantics = [#tpu.dimension_semantics<arbitrary>], iteration_bounds = array<i64: 1>, scalar_prefetch = 0 : i64, scratch_operands = 0 : i64, tpu.core_type = #tpu.core_type<tc>, window_params = [{pipeline_mode = #tpu.pipeline_mode<synchronous>, transform_indices = @transform_0, window_bounds = array<i64: 16, 128>}, {pipeline_mode = #tpu.pipeline_mode<synchronous>, transform_indices = @transform_1, window_bounds = array<i64: 16, 128>}, {pipeline_mode = #tpu.pipeline_mode<synchronous>, transform_indices = @transform_2, window_bounds = array<i64: 1, 128>}, {pipeline_mode = #tpu.pipeline_mode<synchronous>, transform_indices = @transform_3, window_bounds = array<i64: 16, 128>}]} {
    %c0 = arith.constant 0 : index
    %c0_0 = arith.constant 0 : index
    %0 = vector.load %arg1[%c0, %c0_0] : memref<16x128xf32, #tpu.memory_space<vmem>>, vector<16x128xf32>
    %c0_1 = arith.constant 0 : index
    %c0_2 = arith.constant 0 : index
    %1 = vector.load %arg2[%c0_1, %c0_2] : memref<16x128xf32, #tpu.memory_space<vmem>>, vector<16x128xf32>
    %2 = arith.addf %0, %1 : vector<16x128xf32>
    %3 = arith.mulf %2, %2 : vector<16x128xf32>
    %cst = arith.constant dense<0.000000e+00> : vector<16xf32>
    %4 = vector.multi_reduction <add>, %3, %cst [1] : vector<16x128xf32> to vector<16xf32>
    %5 = vector.shape_cast %4 : vector<16xf32> to vector<16x1xf32>
    %cst_3 = arith.constant 1.280000e+02 : f32
    %6 = vector.broadcast %cst_3 : f32 to vector<16x1xf32>
    %7 = arith.divf %5, %6 : vector<16x1xf32>
    %cst_4 = arith.constant 9.99999997E-7 : f32
    %8 = vector.broadcast %cst_4 : f32 to vector<16x1xf32>
    %9 = arith.addf %7, %8 : vector<16x1xf32>
    %10 = math.rsqrt %9 : vector<16x1xf32>
    %11 = vector.broadcast %10 : vector<16x1xf32> to vector<16x128xf32>
    %12 = arith.mulf %2, %11 : vector<16x128xf32>
    %c0_5 = arith.constant 0 : index
    %c0_6 = arith.constant 0 : index
    %13 = vector.load %arg3[%c0_5, %c0_6] : memref<1x128xf32, #tpu.memory_space<vmem>>, vector<1x128xf32>
    %14 = vector.broadcast %13 : vector<1x128xf32> to vector<16x128xf32>
    %15 = arith.mulf %12, %14 : vector<16x128xf32>
    %c0_7 = arith.constant 0 : index
    %c0_8 = arith.constant 0 : index
    %16 = vector.load %arg4[%c0_7, %c0_8] : memref<16x128xf32, #tpu.memory_space<vmem>>, vector<16x128xf32>
    tpu.vector_store %arg4[%c0_7, %c0_8], %15 {strides = array<i32>} : memref<16x128xf32, #tpu.memory_space<vmem>>, vector<16x128xf32>,
    return
  }
  func.func @transform_0(%arg0: i32) -> (i32, i32) {
    %c0_i32 = arith.constant 0 : i32
    %c0_i32_0 = arith.constant 0 : i32
    %c0_i32_1 = arith.constant 0 : i32
    return %c0_i32, %c0_i32_0 : i32, i32
  }
  func.func @transform_1(%arg0: i32) -> (i32, i32) {
    %c0_i32 = arith.constant 0 : i32
    %c0_i32_0 = arith.constant 0 : i32
    %c0_i32_1 = arith.constant 0 : i32
    return %c0_i32, %c0_i32_0 : i32, i32
  }
  func.func @transform_2(%arg0: i32) -> (i32, i32) {
    %c0_i32 = arith.constant 0 : i32
    %c0_i32_0 = arith.constant 0 : i32
    %c0_i32_1 = arith.constant 0 : i32
    return %c0_i32, %c0_i32_0 : i32, i32
  }
  func.func @transform_3(%arg0: i32) -> (i32, i32) {
    %c0_i32 = arith.constant 0 : i32
    %c0_i32_0 = arith.constant 0 : i32
    %c0_i32_1 = arith.constant 0 : i32
    return %c0_i32, %c0_i32_0 : i32, i32
  }
}

</mosaic_0001>

<bundles_post_ra>
// kernel: tile.39
= control target key start
LH: loop header
LB: loop body
LE: loop exit
PB: predicated region body
PF: predicated region fallthrough
CT: control target
= control target key end

     0   :  { %vm82_vm0 = vcmask 1047556   ;;  %vm84_vm1 = vcmask 261120   ;;  %vm103_vm2 = vcmask 523520   ;;  %s225_s0 = inlined_call_operand.vmem [shape: f32[16,2,32], index: 0, kind: input, shape index: {}]   ;;  %s226_s1 = inlined_call_operand.vmem [shape: f32[16,64], index: 1, kind: output, shape index: {}]  }
   0x1   :  { %v138_v0 = vld [vmem:[%s225_s0 + $0xe] sm:$0x3]  ;;  %v139_v1 = vld [vmem:[%s225_s0 + $0xc] sm:$0x3]  ;;  %v140_v2 = vld [vmem:[%s225_s0 + $0xa] sm:$0x3] }
   0x2   :  { %48 = vst [vmem:[#allocation0 + $0x38] sm:$0x3] %v138_v0  ;;  %53 = vst [vmem:[#allocation0 + $0x30] sm:$0x3] %v139_v1  ;;  %v141_v3 = vld [vmem:[%s225_s0 + $0x8] sm:$0x3] }
   0x3   :  { %58 = vst [vmem:[#allocation0 + $0x28] sm:$0x3] %v140_v2  ;;  %v142_v4 = vld [vmem:[%s225_s0 + $0x6] sm:$0x3]  ;;  %v143_v5 = vld [vmem:[%s225_s0 + $0x4] sm:$0x3] }
   0x4   :  { %63 = vst [vmem:[#allocation0 + $0x20] sm:$0x3] %v141_v3  ;;  %68 = vst [vmem:[#allocation0 + $0x18] sm:$0x3] %v142_v4  ;;  %v144_v6 = vld [vmem:[%s225_s0 + $0x2] sm:$0x3] }
   0x5   :  { %73 = vst [vmem:[#allocation0 + $0x10] sm:$0x3] %v143_v5  ;;  %v78_v7 = vld [vmem:[%s225_s0] sm:$0x3]  ;;  %77 = vst [vmem:[#allocation0 + $0x8] sm:$0x3] %v144_v6 }
   0x6   :  { %79 = vst [vmem:[#allocation0] sm:$0x3] %v78_v7  ;;  %v130_v8 = vld [vmem:[%s225_s0 + $0x1e] sm:$0x3]  ;;  %v131_v9 = vld [vmem:[%s225_s0 + $0x1c] sm:$0x3] }
   0x7   :  { %v132_v10 = vld [vmem:[%s225_s0 + $0x1a] sm:$0x3]  ;;  %8 = vst [vmem:[#allocation0 + $0x78] sm:$0x3] %v130_v8  ;;  %13 = vst [vmem:[#allocation0 + $0x70] sm:$0x3] %v131_v9 }
   0x8   :  { %18 = vst [vmem:[#allocation0 + $0x68] sm:$0x3] %v132_v10  ;;  %v133_v11 = vld [vmem:[%s225_s0 + $0x18] sm:$0x3]  ;;  %v134_v12 = vld [vmem:[%s225_s0 + $0x16] sm:$0x3] }
   0x9   :  { %v135_v13 = vld [vmem:[%s225_s0 + $0x14] sm:$0x3]  ;;  %23 = vst [vmem:[#allocation0 + $0x60] sm:$0x3] %v133_v11  ;;  %28 = vst [vmem:[#allocation0 + $0x58] sm:$0x3] %v134_v12 }
   0xa   :  { %33 = vst [vmem:[#allocation0 + $0x50] sm:$0x3] %v135_v13  ;;  %v136_v14 = vld [vmem:[%s225_s0 + $0x12] sm:$0x3]  ;;  %v137_v15 = vld [vmem:[%s225_s0 + $0x10] sm:$0x3] }
   0xb   :  { %38 = vst [vmem:[#allocation0 + $0x48] sm:$0x3] %v136_v14  ;;  %43 = vst [vmem:[#allocation0 + $0x40] sm:$0x3] %v137_v15  ;;  %s148_s0 = smov 32  }
   0xc   :  { %v98_v16 = vld [vmem:[#allocation0 + $0x1] ss:$8 sm:$0xf0]   ;;  %v81_v17 = vld [vmem:[#allocation0] ss:$8 sm:$0xf0]  }
   0xd   :  { %v96_v18 = vld [vmem:[#allocation0 + $0x1] ss:$8 sm:$0xf]   ;;  %v80_v19 = vld [vmem:[#allocation0] ss:$8 sm:$0xf]  }
   0xe   :  { %v100_v20 = vsel %vm82_vm0, %v98_v16, %v96_v18  ;;  %v83_v21 = vsel %vm82_vm0, %v81_v17, %v80_v19 }
   0xf   :  { %101 = vrot.lane.b32.xlu0 %v100_v20, %s148_s0  ;;  %85 = vst.msk [vmem:[%s226_s1] sm:$0xff] %vm84_vm1, %v83_v21  }
  0x10   :  { %v108_v22 = vld [vmem:[#allocation0 + $0x41] ss:$8 sm:$0xf0]   ;;  %v89_v23 = vld [vmem:[#allocation0 + $0x40] ss:$8 sm:$0xf0]  }
  0x12   :  { %v106_v24 = vld [vmem:[#allocation0 + $0x41] ss:$8 sm:$0xf]   ;;  %v87_v25 = vld [vmem:[#allocation0 + $0x40] ss:$8 sm:$0xf]  }
  0x13   :  { %v110_v26 = vsel %vm82_vm0, %v108_v22, %v106_v24  ;;  %v91_v27 = vsel %vm82_vm0, %v89_v23, %v87_v25 }
  0x14   :  { %145 = vst.msk [vmem:[%s226_s1 + $0x8] sm:$0xff] %vm84_vm1, %v91_v27   ;;  %111 = vrot.lane.b32.xlu0 %v110_v26, %s148_s0 }
  0x81   :  { %v102_v28 = vpop.permute.xlu0 %101  }
  0x82   :  { %104 = vst.msk [vmem:[%s226_s1] sm:$0xff] %vm103_vm2, %v102_v28  }
  0x86   :  { %v112_v29 = vpop.permute.xlu0 %111  }
  0x87   :  { %146 = vst.msk [vmem:[%s226_s1 + $0x8] sm:$0xff] %vm103_vm2, %v112_v29  }

// kernel: tile.34
= control target key start
LH: loop header
LB: loop body
LE: loop exit
PB: predicated region body
PF: predicated region fallthrough
CT: control target
= control target key end

     0   :  { %vm82_vm0 = vcmask 1047556   ;;  %vm84_vm1 = vcmask 261120   ;;  %s195_s9 = smov 96   ;;  %s196_s14 = smov 32   ;;  %vm103_vm2 = vcmask 1048320   ;;  %vm124_vm3 = vcmask 785920   ;;  %s289_s0 = inlined_call_operand.vmem [shape: f32[16,4,32], index: 0, kind: input, shape index: {}]   ;;  %s290_s1 = inlined_call_operand.vmem [shape: f32[16,128], index: 1, kind: output, shape index: {}]  }
   0x1   :  { %v180_v0 = vld [vmem:[%s289_s0 + $0x1c] sm:$0xf]  ;;  %v181_v1 = vld [vmem:[%s289_s0 + $0x18] sm:$0xf]  ;;  %v182_v2 = vld [vmem:[%s289_s0 + $0x14] sm:$0xf] }
   0x2   :  { %48 = vst [vmem:[#allocation0 + $0x38] sm:$0xf] %v180_v0  ;;  %53 = vst [vmem:[#allocation0 + $0x30] sm:$0xf] %v181_v1  ;;  %v183_v3 = vld [vmem:[%s289_s0 + $0x10] sm:$0xf] }
   0x3   :  { %58 = vst [vmem:[#allocation0 + $0x28] sm:$0xf] %v182_v2  ;;  %v184_v4 = vld [vmem:[%s289_s0 + $0xc] sm:$0xf]  ;;  %v185_v5 = vld [vmem:[%s289_s0 + $0x8] sm:$0xf] }
   0x4   :  { %63 = vst [vmem:[#allocation0 + $0x20] sm:$0xf] %v183_v3  ;;  %68 = vst [vmem:[#allocation0 + $0x18] sm:$0xf] %v184_v4  ;;  %v186_v6 = vld [vmem:[%s289_s0 + $0x4] sm:$0xf] }
   0x5   :  { %73 = vst [vmem:[#allocation0 + $0x10] sm:$0xf] %v185_v5  ;;  %v78_v7 = vld [vmem:[%s289_s0] sm:$0xf]  ;;  %77 = vst [vmem:[#allocation0 + $0x8] sm:$0xf] %v186_v6 }
   0x6   :  { %79 = vst [vmem:[#allocation0] sm:$0xf] %v78_v7  ;;  %v172_v8 = vld [vmem:[%s289_s0 + $0x3c] sm:$0xf]  ;;  %v173_v9 = vld [vmem:[%s289_s0 + $0x38] sm:$0xf] }
   0x7   :  { %8 = vst [vmem:[#allocation0 + $0x78] sm:$0xf] %v172_v8  ;;  %13 = vst [vmem:[#allocation0 + $0x70] sm:$0xf] %v173_v9  ;;  %v174_v10 = vld [vmem:[%s289_s0 + $0x34] sm:$0xf] }
   0x8   :  { %v175_v11 = vld [vmem:[%s289_s0 + $0x30] sm:$0xf]  ;;  %v176_v12 = vld [vmem:[%s289_s0 + $0x2c] sm:$0xf]  ;;  %18 = vst [vmem:[#allocation0 + $0x68] sm:$0xf] %v174_v10 }
   0x9   :  { %23 = vst [vmem:[#allocation0 + $0x60] sm:$0xf] %v175_v11  ;;  %28 = vst [vmem:[#allocation0 + $0x58] sm:$0xf] %v176_v12  ;;  %v177_v13 = vld [vmem:[%s289_s0 + $0x28] sm:$0xf] }
   0xa   :  { %v178_v14 = vld [vmem:[%s289_s0 + $0x24] sm:$0xf]  ;;  %v179_v15 = vld [vmem:[%s289_s0 + $0x20] sm:$0xf]  ;;  %33 = vst [vmem:[#allocation0 + $0x50] sm:$0xf] %v177_v13 }
   0xb   :  { %38 = vst [vmem:[#allocation0 + $0x48] sm:$0xf] %v178_v14  ;;  %43 = vst [vmem:[#allocation0 + $0x40] sm:$0xf] %v179_v15  ;;  %s194_s0 = smov 64   ;;  %vm145_vm4 = vcmask 523520  }
   0xc   :  { %v119_v16 = vld [vmem:[#allocation0 + $0x2] ss:$8 sm:$0xf0]   ;;  %v98_v17 = vld [vmem:[#allocation0 + $0x3] ss:$8 sm:$0xf0]  }
   0xd   :  { %v117_v18 = vld [vmem:[#allocation0 + $0x2] ss:$8 sm:$0xf]   ;;  %v96_v19 = vld [vmem:[#allocation0 + $0x3] ss:$8 sm:$0xf]  }
   0xe   :  { %v121_v20 = vsel %vm82_vm0, %v119_v16, %v117_v18  ;;  %v100_v21 = vsel %vm82_vm0, %v98_v17, %v96_v19  ;;  %v138_v24 = vld [vmem:[#allocation0 + $0x1] ss:$8 sm:$0xf]   ;;  %v80_v32 = vld [vmem:[#allocation0] ss:$8 sm:$0xf]  }
   0xf   :  { %122 = vrot.lane.b32.xlu1 %v121_v20, %s194_s0  ;;  %101 = vrot.lane.b32.xlu0 %v100_v21, %s195_s9  ;;  %v140_v25 = vld [vmem:[#allocation0 + $0x1] ss:$8 sm:$0xf0]   ;;  %v81_v33 = vld [vmem:[#allocation0] ss:$8 sm:$0xf0]  }
  0x10   :  { %v129_v22 = vld [vmem:[#allocation0 + $0x42] ss:$8 sm:$0xf0]   ;;  %v108_v23 = vld [vmem:[#allocation0 + $0x43] ss:$8 sm:$0xf0]   ;;  %v83_v34 = vsel %vm82_vm0, %v81_v33, %v80_v32  ;;  %v142_v38 = vsel %vm82_vm0, %v140_v25, %v138_v24 }
  0x11   :  { %v150_v31 = vld [vmem:[#allocation0 + $0x41] ss:$8 sm:$0xf0]   ;;  %v89_v36 = vld [vmem:[#allocation0 + $0x40] ss:$8 sm:$0xf0]  }
  0x12   :  { %v127_v26 = vld [vmem:[#allocation0 + $0x42] ss:$8 sm:$0xf]   ;;  %v106_v27 = vld [vmem:[#allocation0 + $0x43] ss:$8 sm:$0xf]  }
  0x13   :  { %v131_v28 = vsel %vm82_vm0, %v129_v22, %v127_v26  ;;  %v110_v29 = vsel %vm82_vm0, %v108_v23, %v106_v27  ;;  %v148_v30 = vld [vmem:[#allocation0 + $0x41] ss:$8 sm:$0xf]   ;;  %v87_v35 = vld [vmem:[#allocation0 + $0x40] ss:$8 sm:$0xf]  }
  0x14   :  { %132 = vrot.lane.b32.xlu1 %v131_v28, %s194_s0  ;;  %111 = vrot.lane.b32.xlu0 %v110_v29, %s195_s9  ;;  %v152_v37 = vsel %vm82_vm0, %v150_v31, %v148_v30  ;;  %85 = vst.msk [vmem:[%s290_s1] sm:$0xff] %vm84_vm1, %v83_v34   ;;  %v91_v39 = vsel %vm82_vm0, %v89_v36, %v87_v35 }
  0x15   :  { %187 = vst.msk [vmem:[%s290_s1 + $0x8] sm:$0xff] %vm84_vm1, %v91_v39  }
  0x18   :  { %153 = vrot.lane.b32.xlu1 %v152_v37, %s196_s14  ;;  %143 = vrot.lane.b32.xlu0 %v142_v38, %s196_s14 }
  0x81   :  { %v123_v40 = vpop.permute.xlu1 %122   ;;  %v102_v41 = vpop.permute.xlu0 %101  }
  0x82   :  { %104 = vst.msk [vmem:[%s290_s1] sm:$0xff] %vm103_vm2, %v102_v41  }
  0x83   :  { %125 = vst.msk [vmem:[%s290_s1] sm:$0xff] %vm124_vm3, %v123_v40  }
  0x86   :  { %v133_v42 = vpop.permute.xlu1 %132   ;;  %v112_v43 = vpop.permute.xlu0 %111  }
  0x87   :  { %188 = vst.msk [vmem:[%s290_s1 + $0x8] sm:$0xff] %vm103_vm2, %v112_v43  }
  0x88   :  { %189 = vst.msk [vmem:[%s290_s1 + $0x8] sm:$0xff] %vm124_vm3, %v133_v42  }
  0x8a   :  { %v154_v44 = vpop.permute.xlu1 %153   ;;  %v144_v45 = vpop.permute.xlu0 %143  }
  0x8b   :  { %190 = vst.msk [vmem:[%s290_s1 + $0x8] sm:$0xff] %vm145_vm4, %v154_v44   ;;  %146 = vst.msk [vmem:[%s290_s1] sm:$0xff] %vm145_vm4, %v144_v45  }

// kernel: xverse_model_forward.6
= control target key start
LH: loop header
LB: loop body
LE: loop exit
PB: predicated region body
PF: predicated region fallthrough
CT: control target
= control target key end

     0   :  { %s2208_s0 = inlined_call_operand.vmem [shape: s32[4], index: 0, kind: input, shape index: {}]   ;;  %s2209_s1 = inlined_call_operand.vmem [shape: f32[16,128], index: 1, kind: input, shape index: {}]   ;;  %s2210_s2 = inlined_call_operand.vmem [shape: f32[4,16,1], index: 2, kind: input, shape index: {}]   ;;  %s2211_s3 = inlined_call_operand.vmem [shape: bf16[128,512], index: 3, kind: input, shape index: {}]   ;;  %s2212_s4 = inlined_call_operand.vmem [shape: bf16[256,128], index: 4, kind: input, shape index: {}]   ;;  %s2213_s5 = inlined_call_operand.vmem [shape: bf16[4,128,512], index: 5, kind: input, shape index: {}]   ;;  %s2214_s6 = inlined_call_operand.hbm [shape: bf16[4,256,128], index: 6, kind: input, shape index: {}]   ;;  %s2215_s7 = inlined_call_operand.vmem [shape: f32[16,128], index: 7, kind: output, shape index: {}]  }
   0x1   :  { %s12_s26 = sshll.u32 %s2208_s0, 4  ;;  %s13_s26 = int_to_ptr.vmem [resolvable:$true] %s12_s26 }
   0x2   :  { %s1736_s27 = scalar_lea.vmem %s13_s26, 16  ;;  %p1741_p1 = scmp.lt.s32.totalorder %s13_s26, %s13_s26 }
   0x3   :  { %p1737_p0 = scmp.ne.s32.totalorder %s13_s26, %s1736_s27  ;;  %p1742_p2 = scmp.lt.s32.totalorder %s1736_s27, %s1736_s27 }
   0x5   :  { %p1743_p3 = por %p1742_p2, %p1741_p1 }
   0x7   :  { %p1744_p4 = pnand %p1743_p3, %p1737_p0 }
   0x9   :  { %1747 = shalt.err (!%p1744_p4)  }
   0xa   :  { %s1816_s28 = smov [#allocation3]  }
   0xb   :  { %15 = dma.vmem_to_smem %s13_s26, 16, %s1816_s28, [#allocation2] }
   0xc   :  { %1794 = dma.done.wait [#allocation2], 16 }
   0xd   :  { %1795 = vsyncadd [#allocation2], 4294967280 }
   0xe   :  { %17 = sfence }
   0xf   :  { %18 = vsyncpa [#allocation5], 0 }
  0x10   :  { %20 = vsyncpa [#allocation5 + $0x1], 0  ;;  %s1865_s29 = smov 0   ;;  %s1867_s30 = smov 0  }
  0x11   :  { %s1869_s0 = smov 0   ;;  %s1871_s8 = smov 0  }
  0x12 LB: > { %s1884_s9 = sadd.s32 4294967295, %s1814_s8   ;;  %s1887_s10 = sadd.s32 1, %s1814_s8   ;;  %s1814_s8 = sphi %s1871_s8, %s2222_s8   ;;  %s1810_s0 = sphi %s1869_s0, %s2221_s0   ;;  %s1806_s30 = sphi %s1867_s30, %s2220_s30   ;;  %s1802_s29 = sphi %s1865_s29, %s2219_s29  }
  0x13   : > { %s145_s11 = ssub.s32 %s1814_s8, %s1887_s10  ;;  %s148_s12 = sadd.s32 1, %s1810_s0 }
  0x14   : > { %p146_p5 = scmp.eq.s32.totalorder %s145_s11, 0  ;;  %p155_p6 = scmp.ne.s32.totalorder %s1810_s0, %s1806_s30 }
  0x15   : > { %p156_p7 = scmp.eq.s32.totalorder %s1814_s8, 0  ;;  %p161_p8 = scmp.ne.s32.totalorder %s1806_s30, %s1802_s29 }
  0x16   : > { %s1897_s13 = scalar_select %p146_p5, %s1810_s0, %s148_s12  }
  0x17   : > { %p157_p9 = por %p156_p7, %p155_p6  ;;  %p162_p10 = scmp.eq.s32.totalorder %s1884_s9, 0 }
  0x18   : > { %p1537_p11 = scmp.lt.s32.totalorder %s1814_s8, 4  ;;  %s231_s15 = sand.u32 1, %s1810_s0  }
  0x19   : > { %p1901_p12 = por %p162_p10, %p161_p8  ;;  %s1367_s16 = sshll.u32 %s231_s15, 7 }
  0x1a   : > { %s1484_s17 = sshll.u32 %s1814_s8, 11  ;;  %s235_s21 = scalar_lea.vmem [#allocation4], %s1367_s16 }
  0x1b   : > { %s1910_s20 = scalar_lea.hbm %s2214_s6, %s1484_s17  ;;  %s242_s22 = sshll.u32 %s235_s21, 4  ;;  %s1912_s22 = int_to_ptr.vmem [resolvable:$true] %s242_s22 }
  0x1c   : > { %p1914_p13 = pnand %p1537_p11, %p157_p9  ;;  %s1919_s24 = scalar_lea.sflag [#allocation5], %s231_s15 }
  0x1d   : > { %s1748_s25 = scalar_lea.hbm %s1910_s20, 2048  ;;  %s1753_s28 = scalar_lea.hbm %s2214_s6, 8192 }
  0x1e   : > { %p1749_p1 = scmp.ne.s32.totalorder %s1910_s20, %s1748_s25  ;;  %p1750_p2 = pneg %p1914_p13 }
  0x1f   : > { %p1754_p5 = scmp.lt.u32.totalorder %s1910_s20, %s2214_s6  ;;  %p1755_p6 = scmp.lt.u32.totalorder %s1753_s28, %s1748_s25 }
  0x20   : > { %p1751_p3 = pnand %p1750_p2, %p1749_p1  ;;  %p1757_p8 = scmp.lt.u32.totalorder %s1748_s25, %s1910_s20 }
  0x21   : > { %p1756_p7 = por %p1755_p6, %p1754_p5 }
  0x22   : > { %p1752_p4 = pneg %p1751_p3 }
  0x23   : > { %p1758_p9 = por %p1757_p8, %p1756_p7 }
  0x25   : > { %p1759_p10 = pnand %p1758_p9, %p1752_p4 }
  0x27   : > { %1762 = shalt.err (!%p1759_p10)
}
  0x28   : > { %s1763_s12 = scalar_lea.vmem %s1912_s22, 2048  ;;  %s1817_s15 = smov [#allocation4]  }
  0x29   : > { %p1764_p11 = scmp.ne.s32.totalorder %s1912_s22, %s1763_s12  ;;  %s1768_s16 = sshll.u32 %s1817_s15, 4  ;;  %s1769_s16 = int_to_ptr.vmem [resolvable:$false] %s1768_s16 }
  0x2a   : > { %s1770_s17 = scalar_lea.vmem %s1769_s16, 4096  ;;  %p1771_p0 = scmp.lt.s32.totalorder %s1912_s22, %s1769_s16 }
  0x2b   : > { %p1766_p1 = pnand %p1764_p11, %p1750_p2  ;;  %p1772_p5 = scmp.lt.s32.totalorder %s1770_s17, %s1763_s12 }
  0x2d   : > { %p1767_p3 = pneg %p1766_p1  ;;  %p1773_p6 = por %p1772_p5, %p1771_p0 }
  0x2f   : > { %p1774_p7 = pnand %p1773_p6, %p1767_p3 }
  0x31   : > { %1777 = shalt.err (!%p1774_p7)
}
  0x32   : > { %s1818_s18 = smov 64   ;;  %s1819_s19 = smov 4  }
  0x33   : > { %1536 = dma.hbm_to_vmem [thread:$0]  (!%p1914_p13), %s1910_s20, 2048, %s1912_s22, %s1919_s24, %s1818_s18, %s1818_s18, %s1819_s19  }
  0x34   : > { %p250_p2 = scmp.lt.s32.totalorder %s1814_s8, 5  ;;  %p2218_p4 = scmp.ge.s32.totalorder %s1814_s8, 1 }
  0x36   : > { %p251_p8 = pnand %p2218_p4, %p250_p2 }
  0x37   : > { %s256_s21 = sand.u32 (!%p251_p8), 1, %s1806_s30  }
  0x38   : > { %254 = sbr.rel (%p251_p8) target bundleno = 1077 (0x435), region = 44  ;;  %s1371_s25 = sshll.u32 (!%p251_p8), %s256_s21, 7 }
  0x39   : > { %s257_s26 = scalar_lea.sflag (!%p251_p8), [#allocation5], %s256_s21  ;;  %s1951_s27 = scalar_lea.vmem (!%p251_p8), [#allocation4], %s1371_s25 }
  0x3f   : > { %1797 = dma.done.wait (%p1901_p12), %s257_s26, 2048  }
  0x40   : > { %1799 = vsyncadd (%p1901_p12), %s257_s26, 4294965248  ;;  %p294_p0 = scmp.lt.s32.totalorder %s1884_s9, 3  ;;  %v305_v0 = vld [vmem:[%s2209_s1] sm:$0xff]  ;;  %v306_v1 = vld [vmem:[%s2209_s1 + $0x8] sm:$0xff]  ;;  %p1376_p12 = scmp.ne.s32.totalorder %s1884_s9, 0 }
  0x41   : > { %v1975_v2 = vpack.c.bf16 %v306_v1, %v305_v0  ;;  %v1575_v3 = vld [vmem:[%s2211_s3 + $0x4] ss:$16 sps:$4 sm:$0xff] (!%p1376_p12)   ;;  %v1577_v4 = vld [vmem:[%s2211_s3] ss:$16 sps:$4 sm:$0xff] (!%p1376_p12)   ;;  %v1820_v5 = vmov (!%p1376_p12), 0   ;;  %v1625_v38 = vld [vmem:[%s2212_s4 + $0x48] sm:$0xff] (!%p1376_p12)  }
  0x42   : > { %s295_s20 = scalar_select %p294_p0, %s1884_s9, 3 }
  0x43   : > { %311 = sbr.rel (%p1376_p12) target bundleno = 566 (0x236), region = 52  ;;  %536 = vmatprep.mubr.bf16.mxu0 (!%p1376_p12), %v1820_v5  ;;  %579 = vmatprep.mubr.bf16.mxu1 (!%p1376_p12), %v1820_v5  ;;  %v1578_v6 = vld [vmem:[%s2211_s3 + $0x24] ss:$16 sps:$4 sm:$0xff] (!%p1376_p12)   ;;  %v1580_v7 = vld [vmem:[%s2211_s3 + $0x20] ss:$16 sps:$4 sm:$0xff] (!%p1376_p12)   ;;  %v1626_v39 = vld [vmem:[%s2212_s4 + $0x8] sm:$0xff] (!%p1376_p12)  }
  0x44   : > { %s1485_s22 = sshll.u32 %s295_s20, 4  ;;  %s1486_s8 = sshll.u32 %s295_s20, 8  ;;  %504 = vmatprep.subr.bf16.mxu0 (!%p1376_p12), %v1575_v3  ;;  %v1581_v8 = vld [vmem:[%s2211_s3 + $0x44] ss:$16 sps:$4 sm:$0xff] (!%p1376_p12)   ;;  %v1583_v9 = vld [vmem:[%s2211_s3 + $0x40] ss:$16 sps:$4 sm:$0xff] (!%p1376_p12)  }
  0x45   : > { %s1962_s28 = scalar_lea.vmem %s2210_s2, %s1485_s22  ;;  %s1967_s12 = scalar_lea.vmem %s2213_s5, %s1486_s8  ;;  %505 = vmatpush1.bf16.msra.mxu0 (!%p1376_p12), %v1577_v4  ;;  %v1584_v10 = vld [vmem:[%s2211_s3 + $0x64] ss:$16 sps:$4 sm:$0xff] (!%p1376_p12)   ;;  %v1596_v11 = vld [vmem:[%s2211_s3 + $0xc] ss:$16 sps:$4 sm:$0xff] (!%p1376_p12)   ;;  %v1598_v12 = vld [vmem:[%s2211_s3 + $0x8] ss:$16 sps:$4 sm:$0xff] (!%p1376_p12)  }
  0x46   : > { %506 = vmatprep.subr.bf16.mxu0 (!%p1376_p12), %v1578_v6  ;;  %v1586_v13 = vld [vmem:[%s2211_s3 + $0x60] ss:$16 sps:$4 sm:$0xff] (!%p1376_p12)   ;;  %v1587_v14 = vld [vmem:[%s2211_s3 + $0x84] ss:$16 sps:$4 sm:$0xff] (!%p1376_p12)   ;;  %547 = vmatprep.subr.bf16.mxu1 (!%p1376_p12), %v1596_v11  ;;  %v1602_v15 = vld [vmem:[%s2211_s3 + $0x2c] ss:$16 sps:$4 sm:$0xff] (!%p1376_p12)  }
  0x47   : > { %548 = vmatpush1.bf16.msra.mxu1 (!%p1376_p12), %v1598_v12  ;;  %v1604_v16 = vld [vmem:[%s2211_s3 + $0x28] ss:$16 sps:$4 sm:$0xff] (!%p1376_p12)   ;;  %v1605_v17 = vld [vmem:[%s2211_s3 + $0x4c] ss:$16 sps:$4 sm:$0xff] (!%p1376_p12)   ;;  %v1589_v18 = vld [vmem:[%s2211_s3 + $0x80] ss:$16 sps:$4 sm:$0xff] (!%p1376_p12)  }
  0x48   : > { %549 = vmatprep.subr.bf16.mxu1 (!%p1376_p12), %v1602_v15  ;;  %v1590_v19 = vld [vmem:[%s2211_s3 + $0xa4] ss:$16 sps:$4 sm:$0xff] (!%p1376_p12)   ;;  %v1607_v20 = vld [vmem:[%s2211_s3 + $0x48] ss:$16 sps:$4 sm:$0xff] (!%p1376_p12)   ;;  %v1608_v21 = vld [vmem:[%s2211_s3 + $0x6c] ss:$16 sps:$4 sm:$0xff] (!%p1376_p12)  }
  0x49   : > { %507 = vmatpush1.bf16.msra.mxu0 (!%p1376_p12), %v1580_v7  ;;  %v1592_v22 = vld [vmem:[%s2211_s3 + $0xa0] ss:$16 sps:$4 sm:$0xff] (!%p1376_p12)   ;;  %v1593_v23 = vld [vmem:[%s2211_s3 + $0xc4] ss:$16 sps:$4 sm:$0xff] (!%p1376_p12)   ;;  %v1610_v24 = vld [vmem:[%s2211_s3 + $0x68] ss:$16 sps:$4 sm:$0xff] (!%p1376_p12)  }
  0x4a   : > { %508 = vmatprep.subr.bf16.mxu0 %v1581_v8  ;;  %v1595_v25 = vld [vmem:[%s2211_s3 + $0xc0] ss:$16 sps:$4 sm:$0xff]   ;;  %v1611_v26 = vld [vmem:[%s2211_s3 + $0x8c] ss:$16 sps:$4 sm:$0xff]   ;;  %v1599_v27 = vld [vmem:[%s2211_s3 + $0xe4] ss:$16 sps:$4 sm:$0xff]  }
  0x4b   : > { %550 = vmatpush1.bf16.msra.mxu1 %v1604_v16  ;;  %v1613_v28 = vld [vmem:[%s2211_s3 + $0x88] ss:$16 sps:$4 sm:$0xff]   ;;  %v1614_v29 = vld [vmem:[%s2211_s3 + $0xac] ss:$16 sps:$4 sm:$0xff]   ;;  %v1601_v30 = vld [vmem:[%s2211_s3 + $0xe0] ss:$16 sps:$4 sm:$0xff]  }
  0x4c   : > { %551 = vmatprep.subr.bf16.mxu1 %v1605_v17  ;;  %v1616_v31 = vld [vmem:[%s2211_s3 + $0xa8] ss:$16 sps:$4 sm:$0xff]   ;;  %v1617_v32 = vld [vmem:[%s2211_s3 + $0xcc] ss:$16 sps:$4 sm:$0xff]   ;;  %v1623_v36 = vld [vmem:[%s2212_s4 + $0x40] sm:$0xff]  }
  0x4d   : > { %509 = vmatpush1.bf16.msra.mxu0 %v1583_v9  ;;  %v1619_v33 = vld [vmem:[%s2211_s3 + $0xc8] ss:$16 sps:$4 sm:$0xff]   ;;  %v1620_v34 = vld [vmem:[%s2211_s3 + $0xec] ss:$16 sps:$4 sm:$0xff]   ;;  %v1624_v37 = vld [vmem:[%s2212_s4] sm:$0xff]  }
  0x4e   : > { %510 = vmatprep.subr.bf16.mxu0 %v1584_v10  ;;  %v1622_v35 = vld [vmem:[%s2211_s3 + $0xe8] ss:$16 sps:$4 sm:$0xff]   ;;  %v1627_v40 = vld [vmem:[%s2212_s4 + $0x50] sm:$0xff]   ;;  %v1631_v44 = vld [vmem:[%s2212_s4 + $0x60] sm:$0xff]  }
  0x4f   : > { %552 = vmatpush1.bf16.msra.mxu1 %v1607_v20  ;;  %v1628_v41 = vld [vmem:[%s2212_s4 + $0x10] sm:$0xff]   ;;  %v1629_v42 = vld [vmem:[%s2212_s4 + $0x58] sm:$0xff]   ;;  %v1632_v45 = vld [vmem:[%s2212_s4 + $0x20] sm:$0xff]  }
  0x50   : > { %553 = vmatprep.subr.bf16.mxu1 %v1608_v21  ;;  %v1630_v43 = vld [vmem:[%s2212_s4 + $0x18] sm:$0xff]   ;;  %v1633_v46 = vld [vmem:[%s2212_s4 + $0x68] sm:$0xff]   ;;  %v1635_v48 = vld [vmem:[%s2212_s4 + $0x70] sm:$0xff]  }
  0x51   : > { %511 = vmatpush1.bf16.msra.mxu0 %v1586_v13  ;;  %v1634_v47 = vld [vmem:[%s2212_s4 + $0x28] sm:$0xff]   ;;  %v1636_v49 = vld [vmem:[%s2212_s4 + $0x30] sm:$0xff]   ;;  %v1637_v50 = vld [vmem:[%s2212_s4 + $0x78] sm:$0xff]  }
  0x52   : > { %512 = vmatprep.subr.bf16.mxu0 %v1587_v14  ;;  %v1638_v51 = vld [vmem:[%s2212_s4 + $0x38] sm:$0xff]  }
  0x53   : > { %554 = vmatpush1.bf16.msra.mxu1 %v1610_v24 }
  0x54   : > { %555 = vmatprep.subr.bf16.mxu1 %v1611_v26 }
  0x55   : > { %513 = vmatpush1.bf16.msra.mxu0 %v1589_v18 }
  0x56   : > { %514 = vmatprep.subr.bf16.mxu0 %v1590_v19 }
  0x57   : > { %556 = vmatpush1.bf16.msra.mxu1 %v1613_v28 }
  0x58   : > { %557 = vmatprep.subr.bf16.mxu1 %v1614_v29 }
  0x59   : > { %515 = vmatpush1.bf16.msra.mxu0 %v1592_v22 }
  0x5a   : > { %516 = vmatprep.subr.bf16.mxu0 %v1593_v23 }
  0x5b   : > { %558 = vmatpush1.bf16.msra.mxu1 %v1616_v31 }
  0x5c   : > { %559 = vmatprep.subr.bf16.mxu1 %v1617_v32 }
  0x5d   : > { %517 = vmatpush1.bf16.msra.mxu0 %v1595_v25 }
  0x5e   : > { %518 = vmatprep.subr.bf16.mxu0 %v1599_v27 }
  0x5f   : > { %560 = vmatpush1.bf16.msra.mxu1 %v1619_v33 }
  0x60   : > { %561 = vmatprep.subr.bf16.mxu1 %v1620_v34 }
  0x61   : > { %519 = vmatpush1.bf16.msra.mxu0 %v1601_v30 }
  0x62   : > { %1487 = vmatprep.subr.bf16.mxu0 %v1623_v36 }
  0x63   : > { %562 = vmatpush1.bf16.msra.mxu1 %v1622_v35 }
  0x64   : > { %537 = vmatmul.mubr.bf16.vlgmr.msra.gmra.mrb[0].mxu0 %v1975_v2 }
  0x65   : > { %1488 = vmatpush3.bf16.msra.mxu0 %v1624_v37 }
  0x66   : > { %580 = vmatmul.mubr.bf16.vlgmr.msra.gmra.mrb[0].mxu1 %v1975_v2  ;;  %1489 = vmatprep.subr.bf16.mxu0 %v1625_v38 }
  0x69   : > { %1490 = vmatpush3.bf16.msra.mxu0 %v1626_v39 }
  0x6a   : > { %1491 = vmatprep.subr.bf16.mxu0 %v1627_v40 }
  0x6d   : > { %1492 = vmatpush3.bf16.msra.mxu0 %v1628_v41 }
  0x6e   : > { %1493 = vmatprep.subr.bf16.mxu0 %v1629_v42 }
  0x71   : > { %1494 = vmatpush3.bf16.msra.mxu0 %v1630_v43 }
  0x72   : > { %1495 = vmatprep.subr.bf16.mxu0 %v1631_v44 }
  0x75   : > { %1496 = vmatpush3.bf16.msra.mxu0 %v1632_v45 }
  0x76   : > { %1497 = vmatprep.subr.bf16.mxu0 %v1633_v46 }
  0x79   : > { %1498 = vmatpush3.bf16.msra.mxu0 %v1634_v47 }
  0x7a   : > { %1499 = vmatprep.subr.bf16.mxu0 %v1635_v48 }
  0x7d   : > { %1500 = vmatpush3.bf16.msra.mxu0 %v1636_v49 }
  0x7e   : > { %1501 = vmatprep.subr.bf16.mxu0 %v1637_v50 }
  0x81   : > { %1502 = vmatpush3.bf16.msra.mxu0 %v1638_v51 }
 0x137   : > { %v538_v52 = vpop.f32.mrb[0].mxu0 }
 0x138   : > { %v1409_v53 = vmul.f32 -1.442695, %v538_v52  ;;  %v540_v54 = vpop.f32.mrb[1].mxu0 }
 0x139   : > { %v1410_v55 = vmul.f32 -1.442695, %v540_v54  ;;  %v542_v56 = vpop.f32.mrb[2].mxu0  ;;  %v581_v60 = vpop.f32.mrb[0].mxu1 }
 0x13a   : > { %1639 = vpow2.f32 %v1409_v53  ;;  %v1411_v57 = vmul.f32 -1.442695, %v542_v56  ;;  %v544_v58 = vpop.f32.mrb[3].mxu0  ;;  %v583_v61 = vpop.f32.mrb[1].mxu1 }
 0x13b   : > { %1641 = vpow2.f32 %v1410_v55  ;;  %v1412_v59 = vmul.f32 -1.442695, %v544_v58  ;;  %v585_v62 = vpop.f32.mrb[2].mxu1 }
 0x13c   : > { %1643 = vpow2.f32 %v1411_v57  ;;  %v587_v0 = vpop.f32.mrb[3].mxu1 }
 0x13d   : > { %1645 = vpow2.f32 %v1412_v59 }
 0x144   : > { %v1640_v63 = vpop.eup %1639 }
 0x145   : > { %v1642_v1 = vpop.eup %1641  ;;  %v602_v3 = vadd.f32 1.0, %v1640_v63 }
 0x146   : > { %v1644_v4 = vpop.eup %1643  ;;  %v603_v5 = vadd.f32 1.0, %v1642_v1 }
 0x147   : > { %v1646_v6 = vpop.eup %1645  ;;  %1647 = vrcp.f32 %v602_v3  ;;  %v604_v7 = vadd.f32 1.0, %v1644_v4 }
 0x148   : > { %1649 = vrcp.f32 %v603_v5  ;;  %v605_v8 = vadd.f32 1.0, %v1646_v6 }
 0x149   : > { %1651 = vrcp.f32 %v604_v7 }
 0x14a   : > { %1653 = vrcp.f32 %v605_v8 }
 0x151   : > { %v1648_v9 = vpop.eup %1647 }
 0x152   : > { %v1650_v10 = vpop.eup %1649  ;;  %v614_v11 = vmul.f32 %v1648_v9, %v538_v52 }
 0x153   : > { %v1652_v12 = vpop.eup %1651  ;;  %v615_v13 = vmul.f32 %v1650_v10, %v540_v54 }
 0x154   : > { %v1654_v14 = vpop.eup %1653  ;;  %v616_v15 = vmul.f32 %v1652_v12, %v542_v56  ;;  %v618_v16 = vmul.f32 %v614_v11, %v581_v60 }
 0x155   : > { %v617_v17 = vmul.f32 %v1654_v14, %v544_v58  ;;  %v619_v18 = vmul.f32 %v615_v13, %v583_v61 }
 0x156   : > { %v620_v19 = vmul.f32 %v616_v15, %v585_v62 }
 0x157   : > { %v621_v20 = vmul.f32 %v617_v17, %v587_v0 }
 0x158   : > { %v622_v21 = vpack.c.bf16 %v620_v19, %v618_v16 }
 0x159   : > { %v623_v22 = vpack.c.bf16 %v621_v20, %v619_v18 }
 0x15b   : > { %784 = vmatprep.mubr.bf16.mxu0 %v623_v22 }
 0x15c   : > { %785 = vmatmul.mubr.bf16.vlgmr.msra.gmra.mrb[4].mxu0 %v622_v21 }
 0x22f   : > { %v1503_v23 = vpop.f32.mrb[4].mxu0 }
 0x230   : > { %v1504_v24 = vpop.f32.mrb[5].mxu0 }
 0x231   : > { %v1505_v25 = vadd.f32 %v1504_v24, %v1503_v23  ;;  %v1506_v26 = vpop.f32.mrb[6].mxu0 }
 0x232   : > { %v1507_v27 = vpop.f32.mrb[7].mxu0 }
 0x233   : > { %793 = vst [vmem:[%s2215_s7] sm:$0xff] %v1505_v25  ;;  %v1508_v28 = vadd.f32 %v1507_v27, %v1506_v26 }
 0x235   : > { %794 = vst [vmem:[%s2215_s7 + $0x8] sm:$0xff] %v1508_v28 }
 0x236 PF: > { %s795_s26 = sld [smem:[#allocation3 + %s1884_s9]] }
 0x23c   : > { %p1429_p13 = scmp.le.s32.totalorder %s795_s26, 0 }
 0x23d   : > { %v1656_v29 = vld [vmem:[%s1967_s12 + $0x4] ss:$16 sps:$4 sm:$0xff] (!%p1429_p13)   ;;  %v1658_v30 = vld [vmem:[%s1967_s12] ss:$16 sps:$4 sm:$0xff] (!%p1429_p13)   ;;  %v1821_v31 = vmov (!%p1429_p13), 0   ;;  %v1706_v0 = vld [vmem:[%s1951_s27 + $0x48] sm:$0xff] (!%p1429_p13)  }
 0x23e   : > { %799 = sbr.rel (%p1429_p13) target bundleno = 1077 (0x435), region = 56  ;;  %1024 = vmatprep.mubr.bf16.mxu0 (!%p1429_p13), %v1821_v31  ;;  %1067 = vmatprep.mubr.bf16.mxu1 (!%p1429_p13), %v1821_v31  ;;  %v1659_v32 = vld [vmem:[%s1967_s12 + $0x24] ss:$16 sps:$4 sm:$0xff] (!%p1429_p13)   ;;  %v1661_v33 = vld [vmem:[%s1967_s12 + $0x20] ss:$16 sps:$4 sm:$0xff] (!%p1429_p13)   ;;  %v1707_v1 = vld [vmem:[%s1951_s27 + $0x8] sm:$0xff] (!%p1429_p13)  }
 0x23f   : > { %992 = vmatprep.subr.bf16.mxu0 (!%p1429_p13), %v1656_v29  ;;  %1655 = vset.pattern.permute.xlu0 (!%p1429_p13), %v1821_v31  ;;  %v1662_v34 = vld [vmem:[%s1967_s12 + $0x44] ss:$16 sps:$4 sm:$0xff] (!%p1429_p13)   ;;  %v1664_v35 = vld [vmem:[%s1967_s12 + $0x40] ss:$16 sps:$4 sm:$0xff] (!%p1429_p13)   ;;  %v1677_v37 = vld [vmem:[%s1967_s12 + $0xc] ss:$16 sps:$4 sm:$0xff] (!%p1429_p13)  }
 0x240   : > { %993 = vmatpush1.bf16.msra.mxu0 (!%p1429_p13), %v1658_v30  ;;  %v1665_v36 = vld [vmem:[%s1967_s12 + $0x64] ss:$16 sps:$4 sm:$0xff] (!%p1429_p13)   ;;  %v1679_v38 = vld [vmem:[%s1967_s12 + $0x8] ss:$16 sps:$4 sm:$0xff] (!%p1429_p13)   ;;  %v1667_v39 = vld [vmem:[%s1967_s12 + $0x60] ss:$16 sps:$4 sm:$0xff] (!%p1429_p13)   ;;  %1035 = vmatprep.subr.bf16.mxu1 (!%p1429_p13), %v1677_v37 }
 0x241   : > { %994 = vmatprep.subr.bf16.mxu0 (!%p1429_p13), %v1659_v32  ;;  %v1668_v40 = vld [vmem:[%s1967_s12 + $0x84] ss:$16 sps:$4 sm:$0xff] (!%p1429_p13)   ;;  %v1683_v41 = vld [vmem:[%s1967_s12 + $0x2c] ss:$16 sps:$4 sm:$0xff] (!%p1429_p13)   ;;  %1036 = vmatpush1.bf16.msra.mxu1 (!%p1429_p13), %v1679_v38  ;;  %v1685_v42 = vld [vmem:[%s1967_s12 + $0x28] ss:$16 sps:$4 sm:$0xff] (!%p1429_p13)  }
 0x242   : > { %1037 = vmatprep.subr.bf16.mxu1 (!%p1429_p13), %v1683_v41  ;;  %v1686_v43 = vld [vmem:[%s1967_s12 + $0x4c] ss:$16 sps:$4 sm:$0xff] (!%p1429_p13)   ;;  %v1670_v44 = vld [vmem:[%s1967_s12 + $0x80] ss:$16 sps:$4 sm:$0xff] (!%p1429_p13)   ;;  %v1671_v45 = vld [vmem:[%s1967_s12 + $0xa4] ss:$16 sps:$4 sm:$0xff] (!%p1429_p13)  }
 0x243   : > { %v1688_v46 = vld [vmem:[%s1967_s12 + $0x48] ss:$16 sps:$4 sm:$0xff] (!%p1429_p13)   ;;  %v1689_v47 = vld [vmem:[%s1967_s12 + $0x6c] ss:$16 sps:$4 sm:$0xff] (!%p1429_p13)   ;;  %v1673_v48 = vld [vmem:[%s1967_s12 + $0xa0] ss:$16 sps:$4 sm:$0xff] (!%p1429_p13)  }
 0x244   : > { %995 = vmatpush1.bf16.msra.mxu0 (!%p1429_p13), %v1661_v33  ;;  %v1674_v49 = vld [vmem:[%s1967_s12 + $0xc4] ss:$16 sps:$4 sm:$0xff] (!%p1429_p13)   ;;  %v1691_v50 = vld [vmem:[%s1967_s12 + $0x68] ss:$16 sps:$4 sm:$0xff] (!%p1429_p13)   ;;  %v1676_v51 = vld [vmem:[%s1967_s12 + $0xc0] ss:$16 sps:$4 sm:$0xff] (!%p1429_p13)  }
 0x245   : > { %996 = vmatprep.subr.bf16.mxu0 %v1662_v34  ;;  %1038 = vmatpush1.bf16.msra.mxu1 %v1685_v42  ;;  %v1692_v52 = vld [vmem:[%s1967_s12 + $0x8c] ss:$16 sps:$4 sm:$0xff]   ;;  %v1680_v53 = vld [vmem:[%s1967_s12 + $0xe4] ss:$16 sps:$4 sm:$0xff]   ;;  %v1694_v54 = vld [vmem:[%s1967_s12 + $0x88] ss:$16 sps:$4 sm:$0xff]  }
 0x246   : > { %1039 = vmatprep.subr.bf16.mxu1 %v1686_v43  ;;  %v1695_v55 = vld [vmem:[%s1967_s12 + $0xac] ss:$16 sps:$4 sm:$0xff]   ;;  %v1682_v56 = vld [vmem:[%s1967_s12 + $0xe0] ss:$16 sps:$4 sm:$0xff]   ;;  %v1697_v57 = vld [vmem:[%s1967_s12 + $0xa8] ss:$16 sps:$4 sm:$0xff]  }
 0x247   : > { %v1698_v58 = vld [vmem:[%s1967_s12 + $0xcc] ss:$16 sps:$4 sm:$0xff]   ;;  %v1700_v59 = vld [vmem:[%s1967_s12 + $0xc8] ss:$16 sps:$4 sm:$0xff]   ;;  %v1704_v62 = vld [vmem:[%s1951_s27 + $0x40] sm:$0xff]  }
 0x248   : > { %997 = vmatpush1.bf16.msra.mxu0 %v1664_v35  ;;  %v1701_v60 = vld [vmem:[%s1967_s12 + $0xec] ss:$16 sps:$4 sm:$0xff]   ;;  %v1703_v61 = vld [vmem:[%s1967_s12 + $0xe8] ss:$16 sps:$4 sm:$0xff]   ;;  %v1705_v63 = vld [vmem:[%s1951_s27] sm:$0xff]  }
 0x249   : > { %998 = vmatprep.subr.bf16.mxu0 %v1665_v36  ;;  %1040 = vmatpush1.bf16.msra.mxu1 %v1688_v46  ;;  %v1708_v3 = vld [vmem:[%s1951_s27 + $0x50] sm:$0xff]   ;;  %v1710_v5 = vld [vmem:[%s1951_s27 + $0x58] sm:$0xff]   ;;  %v1712_v6 = vld [vmem:[%s1951_s27 + $0x60] sm:$0xff]  }
 0x24a   : > { %1041 = vmatprep.subr.bf16.mxu1 %v1689_v47  ;;  %v1709_v4 = vld [vmem:[%s1951_s27 + $0x10] sm:$0xff]   ;;  %v1713_v7 = vld [vmem:[%s1951_s27 + $0x20] sm:$0xff]   ;;  %v1714_v8 = vld [vmem:[%s1951_s27 + $0x68] sm:$0xff]  }
 0x24b   : > { %v1715_v9 = vld [vmem:[%s1951_s27 + $0x28] sm:$0xff]   ;;  %v1716_v10 = vld [vmem:[%s1951_s27 + $0x70] sm:$0xff]   ;;  %v1718_v12 = vld [vmem:[%s1951_s27 + $0x78] sm:$0xff]  }
 0x24c   : > { %999 = vmatpush1.bf16.msra.mxu0 %v1667_v39  ;;  %v1717_v11 = vld [vmem:[%s1951_s27 + $0x30] sm:$0xff]   ;;  %v1719_v13 = vld [vmem:[%s1951_s27 + $0x38] sm:$0xff]   ;;  %v1283_v14 = vld [vmem:[%s1962_s28] sm:$0xff] }
 0x24d   : > { %1000 = vmatprep.subr.bf16.mxu0 %v1668_v40  ;;  %1042 = vmatpush1.bf16.msra.mxu1 %v1691_v50  ;;  %v1284_v15 = vld [vmem:[%s1962_s28 + $0x8] sm:$0xff] }
 0x24e   : > { %1043 = vmatprep.subr.bf16.mxu1 %v1692_v52  ;;  %1287 = vperm.xlu0 %1655, %v1283_v14  }
 0x250   : > { %1001 = vmatpush1.bf16.msra.mxu0 %v1670_v44 }
 0x251   : > { %1002 = vmatprep.subr.bf16.mxu0 %v1671_v45  ;;  %1044 = vmatpush1.bf16.msra.mxu1 %v1694_v54 }
 0x252   : > { %1045 = vmatprep.subr.bf16.mxu1 %v1695_v55  ;;  %1292 = vperm.xlu0 %1655, %v1284_v15   ;;  %v1281_v55 = vld [vmem:[%s2215_s7] sm:$0xff] }
 0x254   : > { %1003 = vmatpush1.bf16.msra.mxu0 %v1673_v48 }
 0x255   : > { %1004 = vmatprep.subr.bf16.mxu0 %v1674_v49  ;;  %1046 = vmatpush1.bf16.msra.mxu1 %v1697_v57 }
 0x256   : > { %1047 = vmatprep.subr.bf16.mxu1 %v1698_v58 }
 0x258   : > { %1005 = vmatpush1.bf16.msra.mxu0 %v1676_v51 }
 0x259   : > { %1006 = vmatprep.subr.bf16.mxu0 %v1680_v53  ;;  %1048 = vmatpush1.bf16.msra.mxu1 %v1700_v59 }
 0x25a   : > { %1049 = vmatprep.subr.bf16.mxu1 %v1701_v60  ;;  %v1282_v60 = vld [vmem:[%s2215_s7 + $0x8] sm:$0xff] }
 0x25c   : > { %1007 = vmatpush1.bf16.msra.mxu0 %v1682_v56 }
 0x25d   : > { %1050 = vmatpush1.bf16.msra.mxu1 %v1703_v61  ;;  %1509 = vmatprep.subr.bf16.mxu0 %v1704_v62 }
 0x25f   : > { %1025 = vmatmul.mubr.bf16.vlgmr.msra.gmra.mrb[0].mxu0 %v1975_v2 }
 0x260   : > { %1068 = vmatmul.mubr.bf16.vlgmr.msra.gmra.mrb[0].mxu1 %v1975_v2  ;;  %1510 = vmatpush3.bf16.msra.mxu0 %v1705_v63  ;;  %v1711_v2 = vld [vmem:[%s1951_s27 + $0x18] sm:$0xff]  }
 0x261   : > { %1511 = vmatprep.subr.bf16.mxu0 %v1706_v0 }
 0x264   : > { %1512 = vmatpush3.bf16.msra.mxu0 %v1707_v1 }
 0x265   : > { %1513 = vmatprep.subr.bf16.mxu0 %v1708_v3 }
 0x268   : > { %1514 = vmatpush3.bf16.msra.mxu0 %v1709_v4 }
 0x269   : > { %1515 = vmatprep.subr.bf16.mxu0 %v1710_v5 }
 0x26c   : > { %1516 = vmatpush3.bf16.msra.mxu0 %v1711_v2 }
 0x26d   : > { %1517 = vmatprep.subr.bf16.mxu0 %v1712_v6 }
 0x270   : > { %1518 = vmatpush3.bf16.msra.mxu0 %v1713_v7 }
 0x271   : > { %1519 = vmatprep.subr.bf16.mxu0 %v1714_v8 }
 0x274   : > { %1520 = vmatpush3.bf16.msra.mxu0 %v1715_v9 }
 0x275   : > { %1521 = vmatprep.subr.bf16.mxu0 %v1716_v10 }
 0x278   : > { %1522 = vmatpush3.bf16.msra.mxu0 %v1717_v11 }
 0x279   : > { %1523 = vmatprep.subr.bf16.mxu0 %v1718_v12 }
 0x27c   : > { %1524 = vmatpush3.bf16.msra.mxu0 %v1719_v13 }
 0x2cd   : > { %v1288_v50 = vpop.permute.xlu0 %1287 }
 0x2d1   : > { %v1293_v59 = vpop.permute.xlu0 %1292 }
 0x332   : > { %v1026_v16 = vpop.f32.mrb[0].mxu0 }
 0x333   : > { %v1462_v17 = vmul.f32 -1.442695, %v1026_v16  ;;  %v1028_v18 = vpop.f32.mrb[1].mxu0  ;;  %v1069_v24 = vpop.f32.mrb[0].mxu1 }
 0x334   : > { %v1463_v19 = vmul.f32 -1.442695, %v1028_v18  ;;  %v1030_v20 = vpop.f32.mrb[2].mxu0  ;;  %v1071_v25 = vpop.f32.mrb[1].mxu1 }
 0x335   : > { %1720 = vpow2.f32 %v1462_v17  ;;  %v1464_v21 = vmul.f32 -1.442695, %v1030_v20  ;;  %v1032_v22 = vpop.f32.mrb[3].mxu0  ;;  %v1073_v26 = vpop.f32.mrb[2].mxu1 }
 0x336   : > { %1722 = vpow2.f32 %v1463_v19  ;;  %v1465_v23 = vmul.f32 -1.442695, %v1032_v22  ;;  %v1075_v28 = vpop.f32.mrb[3].mxu1 }
 0x337   : > { %1724 = vpow2.f32 %v1464_v21 }
 0x338   : > { %1726 = vpow2.f32 %v1465_v23 }
 0x33f   : > { %v1721_v27 = vpop.eup %1720 }
 0x340   : > { %v1723_v29 = vpop.eup %1722  ;;  %v1090_v30 = vadd.f32 1.0, %v1721_v27 }
 0x341   : > { %v1725_v31 = vpop.eup %1724  ;;  %v1091_v32 = vadd.f32 1.0, %v1723_v29 }
 0x342   : > { %v1727_v33 = vpop.eup %1726  ;;  %1728 = vrcp.f32 %v1090_v30  ;;  %v1092_v34 = vadd.f32 1.0, %v1725_v31 }
 0x343   : > { %1730 = vrcp.f32 %v1091_v32  ;;  %v1093_v35 = vadd.f32 1.0, %v1727_v33 }
 0x344   : > { %1732 = vrcp.f32 %v1092_v34 }
 0x345   : > { %1734 = vrcp.f32 %v1093_v35 }
 0x34c   : > { %v1729_v36 = vpop.eup %1728 }
 0x34d   : > { %v1731_v37 = vpop.eup %1730  ;;  %v1102_v38 = vmul.f32 %v1729_v36, %v1026_v16 }
 0x34e   : > { %v1733_v39 = vpop.eup %1732  ;;  %v1103_v40 = vmul.f32 %v1731_v37, %v1028_v18 }
 0x34f   : > { %v1735_v41 = vpop.eup %1734  ;;  %v1104_v42 = vmul.f32 %v1733_v39, %v1030_v20  ;;  %v1106_v43 = vmul.f32 %v1102_v38, %v1069_v24 }
 0x350   : > { %v1105_v44 = vmul.f32 %v1735_v41, %v1032_v22  ;;  %v1107_v45 = vmul.f32 %v1103_v40, %v1071_v25 }
 0x351   : > { %v1108_v46 = vmul.f32 %v1104_v42, %v1073_v26 }
 0x352   : > { %v1109_v47 = vmul.f32 %v1105_v44, %v1075_v28 }
 0x353   : > { %v1110_v48 = vpack.c.bf16 %v1108_v46, %v1106_v43 }
 0x354   : > { %v1111_v49 = vpack.c.bf16 %v1109_v47, %v1107_v45 }
 0x356   : > { %1272 = vmatprep.mubr.bf16.mxu0 %v1111_v49 }
 0x357   : > { %1273 = vmatmul.mubr.bf16.vlgmr.msra.gmra.mrb[4].mxu0 %v1110_v48 }
 0x42a   : > { %v1525_v51 = vpop.f32.mrb[4].mxu0 }
 0x42b   : > { %v1526_v52 = vpop.f32.mrb[5].mxu0 }
 0x42c   : > { %v1527_v53 = vadd.f32 %v1526_v52, %v1525_v51  ;;  %v1528_v54 = vpop.f32.mrb[6].mxu0 }
 0x42d   : > { %v1529_v56 = vpop.f32.mrb[7].mxu0 }
 0x42e   : > { %v1295_v57 = vmul.f32 %v1527_v53, %v1288_v50  ;;  %v1530_v58 = vadd.f32 %v1529_v56, %v1528_v54 }
 0x430   : > { %v1297_v61 = vadd.f32 %v1295_v57, %v1281_v55  ;;  %v1296_v62 = vmul.f32 %v1530_v58, %v1293_v59 }
 0x432   : > { %1299 = vst [vmem:[%s2215_s7] sm:$0xff] %v1297_v61  ;;  %v1298_v63 = vadd.f32 %v1296_v62, %v1282_v60 }
 0x434   : > { %1300 = vst [vmem:[%s2215_s7 + $0x8] sm:$0xff] %v1298_v63 }
 0x435 PF: > { %p23_p9 = scmp.ge.s32.totalorder %s1887_s10, 6   ;;  %s2219_s29 = smov %s1806_s30 }
 0x436   : > { %s2220_s30 = smov %s1810_s0  ;;  %s2221_s0 = smov %s1897_s13 }
 0x437   : > { %s2222_s8 = smov %s1887_s10  ;;  %25 = sbr.rel (!%p23_p9) target bundleno = 18 (0x12), region = 94 }
 0x43e   :  { %1312 = vsyncpa [#allocation5], 1 }
 0x43f   :  { %1314 = vsyncpa [#allocation5 + $0x1], 1 }

// kernel: xverse_model_forward.8
= control target key start
LH: loop header
LB: loop body
LE: loop exit
PB: predicated region body
PF: predicated region fallthrough
CT: control target
= control target key end

     0   :  { %s2064_s0 = inlined_call_operand.vmem [shape: s32[4], index: 0, kind: input, shape index: {}]   ;;  %s2065_s1 = inlined_call_operand.vmem [shape: f32[16,128], index: 1, kind: input, shape index: {}]   ;;  %s2066_s2 = inlined_call_operand.vmem [shape: f32[4,16,1], index: 2, kind: input, shape index: {}]   ;;  %s2067_s3 = inlined_call_operand.vmem [shape: bf16[128,512], index: 3, kind: input, shape index: {}]   ;;  %s2068_s4 = inlined_call_operand.vmem [shape: bf16[256,128], index: 4, kind: input, shape index: {}]   ;;  %s2069_s5 = inlined_call_operand.vmem [shape: bf16[4,128,512], index: 5, kind: input, shape index: {}]   ;;  %s2070_s6 = inlined_call_operand.vmem [shape: bf16[4,256,128], index: 6, kind: input, shape index: {}]   ;;  %s2071_s7 = inlined_call_operand.hbm [shape: f32[16,128], index: 7, kind: output, shape index: {}]  }
   0x1   :  { %s12_s26 = sshll.u32 %s2064_s0, 4  ;;  %s13_s26 = int_to_ptr.vmem [resolvable:$true] %s12_s26 }
   0x2   :  { %s1702_s27 = scalar_lea.vmem %s13_s26, 16  ;;  %p1707_p1 = scmp.lt.s32.totalorder %s13_s26, %s13_s26 }
   0x3   :  { %p1703_p0 = scmp.ne.s32.totalorder %s13_s26, %s1702_s27  ;;  %p1708_p2 = scmp.lt.s32.totalorder %s1702_s27, %s1702_s27 }
   0x5   :  { %p1709_p3 = por %p1708_p2, %p1707_p1 }
   0x7   :  { %p1710_p4 = pnand %p1709_p3, %p1703_p0 }
   0x9   :  { %1713 = shalt.err (!%p1710_p4)  }
   0xa   :  { %s1754_s28 = smov [#allocation3]  }
   0xb   :  { %15 = dma.vmem_to_smem %s13_s26, 16, %s1754_s28, [#allocation2] }
   0xc   :  { %1744 = dma.done.wait [#allocation2], 16 }
   0xd   :  { %1745 = vsyncadd [#allocation2], 4294967280 }
   0xe   :  { %17 = sfence }
   0xf   :  { %18 = vsyncpa [#allocation5], 0  ;;  %s1803_s29 = smov 0  }
  0x10 LB: > { %s1809_s0 = sadd.s32 4294967295, %s1752_s29   ;;  %p1357_p5 = scmp.ge.s32.totalorder %s1752_s29, 1  ;;  %s1752_s29 = sphi %s1803_s29, %s24_s29  }
  0x11   : > { %p235_p6 = scmp.lt.s32.totalorder %s1752_s29, 5 }
  0x13   : > { %p236_p7 = pnand %p1357_p5, %p235_p6 }
  0x14   : > { %p270_p8 = scmp.lt.s32.totalorder (!%p236_p7), %s1809_s0, 3  ;;  %v286_v0 = vld [vmem:[%s2065_s1] sm:$0xff] (!%p236_p7)  ;;  %v287_v1 = vld [vmem:[%s2065_s1 + $0x8] sm:$0xff] (!%p236_p7)  ;;  %p1364_p9 = scmp.ne.s32.totalorder (!%p236_p7), %s1809_s0, 0 }
  0x15   : > { %239 = sbr.rel (%p236_p7) target bundleno = 1066 (0x42a), region = 44  ;;  %v1820_v2 = vpack.c.bf16 (!%p236_p7), %v287_v1, %v286_v0 }
  0x1c   : > { %s271_s11 = scalar_select %p270_p8, %s1809_s0, 3 }
  0x1d   : > { %292 = sbr.rel (%p1364_p9) target bundleno = 529 (0x211), region = 48  ;;  %v1541_v3 = vld [vmem:[%s2067_s3 + $0x4] ss:$16 sps:$4 sm:$0xff] (!%p1364_p9)   ;;  %v1543_v4 = vld [vmem:[%s2067_s3] ss:$16 sps:$4 sm:$0xff] (!%p1364_p9)   ;;  %v1755_v5 = vmov (!%p1364_p9), 0  }
  0x1e   : > { %s1474_s12 = sshll.u32 %s271_s11, 4  ;;  %s1475_s13 = sshll.u32 %s271_s11, 8  ;;  %517 = vmatprep.mubr.bf16.mxu0 (!%p1364_p9), %v1755_v5  ;;  %560 = vmatprep.mubr.bf16.mxu1 (!%p1364_p9), %v1755_v5  ;;  %v1544_v6 = vld [vmem:[%s2067_s3 + $0x24] ss:$16 sps:$4 sm:$0xff] (!%p1364_p9)   ;;  %v1546_v7 = vld [vmem:[%s2067_s3 + $0x20] ss:$16 sps:$4 sm:$0xff] (!%p1364_p9)  }
  0x1f   : > { %s1826_s16 = scalar_lea.vmem %s2066_s2, %s1474_s12  ;;  %s1831_s19 = scalar_lea.vmem %s2069_s5, %s1475_s13  ;;  %485 = vmatprep.subr.bf16.mxu0 (!%p1364_p9), %v1541_v3  ;;  %v1547_v8 = vld [vmem:[%s2067_s3 + $0x44] ss:$16 sps:$4 sm:$0xff] (!%p1364_p9)   ;;  %v1549_v9 = vld [vmem:[%s2067_s3 + $0x40] ss:$16 sps:$4 sm:$0xff] (!%p1364_p9)   ;;  %v1562_v11 = vld [vmem:[%s2067_s3 + $0xc] ss:$16 sps:$4 sm:$0xff] (!%p1364_p9)  }
  0x20   : > { %s1476_s20 = sshll.u32 %s271_s11, 7  ;;  %486 = vmatpush1.bf16.msra.mxu0 (!%p1364_p9), %v1543_v4  ;;  %v1550_v10 = vld [vmem:[%s2067_s3 + $0x64] ss:$16 sps:$4 sm:$0xff] (!%p1364_p9)   ;;  %v1564_v12 = vld [vmem:[%s2067_s3 + $0x8] ss:$16 sps:$4 sm:$0xff] (!%p1364_p9)   ;;  %528 = vmatprep.subr.bf16.mxu1 (!%p1364_p9), %v1562_v11 }
  0x21   : > { %s1836_s23 = scalar_lea.vmem %s2070_s6, %s1476_s20  ;;  %487 = vmatprep.subr.bf16.mxu0 (!%p1364_p9), %v1544_v6  ;;  %v1552_v13 = vld [vmem:[%s2067_s3 + $0x60] ss:$16 sps:$4 sm:$0xff] (!%p1364_p9)   ;;  %v1553_v14 = vld [vmem:[%s2067_s3 + $0x84] ss:$16 sps:$4 sm:$0xff] (!%p1364_p9)   ;;  %v1568_v15 = vld [vmem:[%s2067_s3 + $0x2c] ss:$16 sps:$4 sm:$0xff] (!%p1364_p9)   ;;  %529 = vmatpush1.bf16.msra.mxu1 (!%p1364_p9), %v1564_v12 }
  0x22   : > { %v1570_v16 = vld [vmem:[%s2067_s3 + $0x28] ss:$16 sps:$4 sm:$0xff] (!%p1364_p9)   ;;  %530 = vmatprep.subr.bf16.mxu1 (!%p1364_p9), %v1568_v15  ;;  %v1571_v17 = vld [vmem:[%s2067_s3 + $0x4c] ss:$16 sps:$4 sm:$0xff] (!%p1364_p9)   ;;  %v1555_v18 = vld [vmem:[%s2067_s3 + $0x80] ss:$16 sps:$4 sm:$0xff] (!%p1364_p9)  }
  0x23   : > { %v1556_v19 = vld [vmem:[%s2067_s3 + $0xa4] ss:$16 sps:$4 sm:$0xff] (!%p1364_p9)   ;;  %v1573_v20 = vld [vmem:[%s2067_s3 + $0x48] ss:$16 sps:$4 sm:$0xff] (!%p1364_p9)   ;;  %v1574_v21 = vld [vmem:[%s2067_s3 + $0x6c] ss:$16 sps:$4 sm:$0xff] (!%p1364_p9)  }
  0x24   : > { %488 = vmatpush1.bf16.msra.mxu0 %v1546_v7  ;;  %v1558_v22 = vld [vmem:[%s2067_s3 + $0xa0] ss:$16 sps:$4 sm:$0xff]   ;;  %v1559_v23 = vld [vmem:[%s2067_s3 + $0xc4] ss:$16 sps:$4 sm:$0xff]   ;;  %v1576_v24 = vld [vmem:[%s2067_s3 + $0x68] ss:$16 sps:$4 sm:$0xff]  }
  0x25   : > { %489 = vmatprep.subr.bf16.mxu0 %v1547_v8  ;;  %531 = vmatpush1.bf16.msra.mxu1 %v1570_v16  ;;  %v1561_v25 = vld [vmem:[%s2067_s3 + $0xc0] ss:$16 sps:$4 sm:$0xff]   ;;  %v1577_v26 = vld [vmem:[%s2067_s3 + $0x8c] ss:$16 sps:$4 sm:$0xff]   ;;  %v1565_v27 = vld [vmem:[%s2067_s3 + $0xe4] ss:$16 sps:$4 sm:$0xff]  }
  0x26   : > { %532 = vmatprep.subr.bf16.mxu1 %v1571_v17  ;;  %v1579_v28 = vld [vmem:[%s2067_s3 + $0x88] ss:$16 sps:$4 sm:$0xff]   ;;  %v1580_v29 = vld [vmem:[%s2067_s3 + $0xac] ss:$16 sps:$4 sm:$0xff]   ;;  %v1567_v30 = vld [vmem:[%s2067_s3 + $0xe0] ss:$16 sps:$4 sm:$0xff]  }
  0x27   : > { %v1582_v31 = vld [vmem:[%s2067_s3 + $0xa8] ss:$16 sps:$4 sm:$0xff]   ;;  %v1583_v32 = vld [vmem:[%s2067_s3 + $0xcc] ss:$16 sps:$4 sm:$0xff]   ;;  %v1589_v36 = vld [vmem:[%s2068_s4 + $0x40] sm:$0xff]  }
  0x28   : > { %490 = vmatpush1.bf16.msra.mxu0 %v1549_v9  ;;  %v1585_v33 = vld [vmem:[%s2067_s3 + $0xc8] ss:$16 sps:$4 sm:$0xff]   ;;  %v1586_v34 = vld [vmem:[%s2067_s3 + $0xec] ss:$16 sps:$4 sm:$0xff]   ;;  %v1590_v37 = vld [vmem:[%s2068_s4] sm:$0xff]  }
  0x29   : > { %491 = vmatprep.subr.bf16.mxu0 %v1550_v10  ;;  %533 = vmatpush1.bf16.msra.mxu1 %v1573_v20  ;;  %v1588_v35 = vld [vmem:[%s2067_s3 + $0xe8] ss:$16 sps:$4 sm:$0xff]   ;;  %v1593_v40 = vld [vmem:[%s2068_s4 + $0x50] sm:$0xff]   ;;  %v1597_v44 = vld [vmem:[%s2068_s4 + $0x60] sm:$0xff]  }
  0x2a   : > { %534 = vmatprep.subr.bf16.mxu1 %v1574_v21  ;;  %v1591_v38 = vld [vmem:[%s2068_s4 + $0x48] sm:$0xff]   ;;  %v1594_v41 = vld [vmem:[%s2068_s4 + $0x10] sm:$0xff]   ;;  %v1595_v42 = vld [vmem:[%s2068_s4 + $0x58] sm:$0xff]  }
  0x2b   : > { %v1592_v39 = vld [vmem:[%s2068_s4 + $0x8] sm:$0xff]   ;;  %v1596_v43 = vld [vmem:[%s2068_s4 + $0x18] sm:$0xff]   ;;  %v1598_v45 = vld [vmem:[%s2068_s4 + $0x20] sm:$0xff]  }
  0x2c   : > { %492 = vmatpush1.bf16.msra.mxu0 %v1552_v13  ;;  %v1599_v46 = vld [vmem:[%s2068_s4 + $0x68] sm:$0xff]   ;;  %v1601_v48 = vld [vmem:[%s2068_s4 + $0x70] sm:$0xff]   ;;  %v1603_v50 = vld [vmem:[%s2068_s4 + $0x78] sm:$0xff]  }
  0x2d   : > { %493 = vmatprep.subr.bf16.mxu0 %v1553_v14  ;;  %535 = vmatpush1.bf16.msra.mxu1 %v1576_v24  ;;  %v1600_v47 = vld [vmem:[%s2068_s4 + $0x28] sm:$0xff]   ;;  %v1602_v49 = vld [vmem:[%s2068_s4 + $0x30] sm:$0xff]   ;;  %v1604_v51 = vld [vmem:[%s2068_s4 + $0x38] sm:$0xff]  }
  0x2e   : > { %536 = vmatprep.subr.bf16.mxu1 %v1577_v26 }
  0x30   : > { %494 = vmatpush1.bf16.msra.mxu0 %v1555_v18 }
  0x31   : > { %495 = vmatprep.subr.bf16.mxu0 %v1556_v19  ;;  %537 = vmatpush1.bf16.msra.mxu1 %v1579_v28 }
  0x32   : > { %538 = vmatprep.subr.bf16.mxu1 %v1580_v29 }
  0x34   : > { %496 = vmatpush1.bf16.msra.mxu0 %v1558_v22 }
  0x35   : > { %497 = vmatprep.subr.bf16.mxu0 %v1559_v23  ;;  %539 = vmatpush1.bf16.msra.mxu1 %v1582_v31 }
  0x36   : > { %540 = vmatprep.subr.bf16.mxu1 %v1583_v32 }
  0x38   : > { %498 = vmatpush1.bf16.msra.mxu0 %v1561_v25 }
  0x39   : > { %499 = vmatprep.subr.bf16.mxu0 %v1565_v27  ;;  %541 = vmatpush1.bf16.msra.mxu1 %v1585_v33 }
  0x3a   : > { %542 = vmatprep.subr.bf16.mxu1 %v1586_v34 }
  0x3c   : > { %500 = vmatpush1.bf16.msra.mxu0 %v1567_v30 }
  0x3d   : > { %543 = vmatpush1.bf16.msra.mxu1 %v1588_v35  ;;  %1477 = vmatprep.subr.bf16.mxu0 %v1589_v36 }
  0x3f   : > { %518 = vmatmul.mubr.bf16.vlgmr.msra.gmra.mrb[0].mxu0 %v1820_v2 }
  0x40   : > { %561 = vmatmul.mubr.bf16.vlgmr.msra.gmra.mrb[0].mxu1 %v1820_v2  ;;  %1478 = vmatpush3.bf16.msra.mxu0 %v1590_v37 }
  0x41   : > { %1479 = vmatprep.subr.bf16.mxu0 %v1591_v38 }
  0x44   : > { %1480 = vmatpush3.bf16.msra.mxu0 %v1592_v39 }
  0x45   : > { %1481 = vmatprep.subr.bf16.mxu0 %v1593_v40 }
  0x48   : > { %1482 = vmatpush3.bf16.msra.mxu0 %v1594_v41 }
  0x49   : > { %1483 = vmatprep.subr.bf16.mxu0 %v1595_v42 }
  0x4c   : > { %1484 = vmatpush3.bf16.msra.mxu0 %v1596_v43 }
  0x4d   : > { %1485 = vmatprep.subr.bf16.mxu0 %v1597_v44 }
  0x50   : > { %1486 = vmatpush3.bf16.msra.mxu0 %v1598_v45 }
  0x51   : > { %1487 = vmatprep.subr.bf16.mxu0 %v1599_v46 }
  0x54   : > { %1488 = vmatpush3.bf16.msra.mxu0 %v1600_v47 }
  0x55   : > { %1489 = vmatprep.subr.bf16.mxu0 %v1601_v48 }
  0x58   : > { %1490 = vmatpush3.bf16.msra.mxu0 %v1602_v49 }
  0x59   : > { %1491 = vmatprep.subr.bf16.mxu0 %v1603_v50 }
  0x5c   : > { %1492 = vmatpush3.bf16.msra.mxu0 %v1604_v51 }
 0x112   : > { %v519_v52 = vpop.f32.mrb[0].mxu0 }
 0x113   : > { %v1397_v53 = vmul.f32 -1.442695, %v519_v52  ;;  %v521_v54 = vpop.f32.mrb[1].mxu0  ;;  %v562_v60 = vpop.f32.mrb[0].mxu1 }
 0x114   : > { %v1398_v55 = vmul.f32 -1.442695, %v521_v54  ;;  %v523_v56 = vpop.f32.mrb[2].mxu0  ;;  %v564_v61 = vpop.f32.mrb[1].mxu1 }
 0x115   : > { %1605 = vpow2.f32 %v1397_v53  ;;  %v1399_v57 = vmul.f32 -1.442695, %v523_v56  ;;  %v525_v58 = vpop.f32.mrb[3].mxu0  ;;  %v566_v62 = vpop.f32.mrb[2].mxu1 }
 0x116   : > { %1607 = vpow2.f32 %v1398_v55  ;;  %v1400_v59 = vmul.f32 -1.442695, %v525_v58  ;;  %v568_v0 = vpop.f32.mrb[3].mxu1 }
 0x117   : > { %1609 = vpow2.f32 %v1399_v57 }
 0x118   : > { %1611 = vpow2.f32 %v1400_v59 }
 0x11f   : > { %v1606_v63 = vpop.eup %1605 }
 0x120   : > { %v1608_v1 = vpop.eup %1607  ;;  %v583_v3 = vadd.f32 1.0, %v1606_v63 }
 0x121   : > { %v1610_v4 = vpop.eup %1609  ;;  %v584_v5 = vadd.f32 1.0, %v1608_v1 }
 0x122   : > { %v1612_v6 = vpop.eup %1611  ;;  %1613 = vrcp.f32 %v583_v3  ;;  %v585_v7 = vadd.f32 1.0, %v1610_v4 }
 0x123   : > { %1615 = vrcp.f32 %v584_v5  ;;  %v586_v8 = vadd.f32 1.0, %v1612_v6 }
 0x124   : > { %1617 = vrcp.f32 %v585_v7 }
 0x125   : > { %1619 = vrcp.f32 %v586_v8 }
 0x12c   : > { %v1614_v9 = vpop.eup %1613 }
 0x12d   : > { %v1616_v10 = vpop.eup %1615  ;;  %v595_v11 = vmul.f32 %v1614_v9, %v519_v52 }
 0x12e   : > { %v1618_v12 = vpop.eup %1617  ;;  %v596_v13 = vmul.f32 %v1616_v10, %v521_v54 }
 0x12f   : > { %v1620_v14 = vpop.eup %1619  ;;  %v597_v15 = vmul.f32 %v1618_v12, %v523_v56  ;;  %v599_v16 = vmul.f32 %v595_v11, %v562_v60 }
 0x130   : > { %v598_v17 = vmul.f32 %v1620_v14, %v525_v58  ;;  %v600_v18 = vmul.f32 %v596_v13, %v564_v61 }
 0x131   : > { %v601_v19 = vmul.f32 %v597_v15, %v566_v62 }
 0x132   : > { %v602_v20 = vmul.f32 %v598_v17, %v568_v0 }
 0x133   : > { %v603_v21 = vpack.c.bf16 %v601_v19, %v599_v16 }
 0x134   : > { %v604_v22 = vpack.c.bf16 %v602_v20, %v600_v18 }
 0x136   : > { %765 = vmatprep.mubr.bf16.mxu0 %v604_v22 }
 0x137   : > { %766 = vmatmul.mubr.bf16.vlgmr.msra.gmra.mrb[4].mxu0 %v603_v21 }
 0x20a   : > { %v1493_v23 = vpop.f32.mrb[4].mxu0 }
 0x20b   : > { %v1494_v24 = vpop.f32.mrb[5].mxu0 }
 0x20c   : > { %v1495_v25 = vadd.f32 %v1494_v24, %v1493_v23  ;;  %v1496_v26 = vpop.f32.mrb[6].mxu0 }
 0x20d   : > { %v1497_v27 = vpop.f32.mrb[7].mxu0 }
 0x20e   : > { %774 = vst [vmem:[#allocation4] sm:$0xff] %v1495_v25  ;;  %v1498_v28 = vadd.f32 %v1497_v27, %v1496_v26 }
 0x210   : > { %775 = vst [vmem:[#allocation4 + $0x8] sm:$0xff] %v1498_v28 }
 0x211 PF: > { %s776_s25 = sld [smem:[#allocation3 + %s1809_s0]] }
 0x217   : > { %p1417_p10 = scmp.le.s32.totalorder %s776_s25, 0 }
 0x218   : > { %v1622_v29 = vld [vmem:[%s1831_s19 + $0x4] ss:$16 sps:$4 sm:$0xff] (!%p1417_p10)   ;;  %v1624_v30 = vld [vmem:[%s1831_s19] ss:$16 sps:$4 sm:$0xff] (!%p1417_p10)   ;;  %v1756_v31 = vmov (!%p1417_p10), 0   ;;  %v1672_v0 = vld [vmem:[%s1836_s23 + $0x48] sm:$0xff] (!%p1417_p10)  }
 0x219   : > { %780 = sbr.rel (%p1417_p10) target bundleno = 1040 (0x410), region = 52  ;;  %1005 = vmatprep.mubr.bf16.mxu0 (!%p1417_p10), %v1756_v31  ;;  %1048 = vmatprep.mubr.bf16.mxu1 (!%p1417_p10), %v1756_v31  ;;  %v1625_v32 = vld [vmem:[%s1831_s19 + $0x24] ss:$16 sps:$4 sm:$0xff] (!%p1417_p10)   ;;  %v1627_v33 = vld [vmem:[%s1831_s19 + $0x20] ss:$16 sps:$4 sm:$0xff] (!%p1417_p10)   ;;  %v1673_v1 = vld [vmem:[%s1836_s23 + $0x8] sm:$0xff] (!%p1417_p10)  }
 0x21a   : > { %973 = vmatprep.subr.bf16.mxu0 (!%p1417_p10), %v1622_v29  ;;  %1621 = vset.pattern.permute.xlu0 (!%p1417_p10), %v1756_v31  ;;  %v1628_v34 = vld [vmem:[%s1831_s19 + $0x44] ss:$16 sps:$4 sm:$0xff] (!%p1417_p10)   ;;  %v1630_v35 = vld [vmem:[%s1831_s19 + $0x40] ss:$16 sps:$4 sm:$0xff] (!%p1417_p10)   ;;  %v1643_v37 = vld [vmem:[%s1831_s19 + $0xc] ss:$16 sps:$4 sm:$0xff] (!%p1417_p10)  }
 0x21b   : > { %974 = vmatpush1.bf16.msra.mxu0 (!%p1417_p10), %v1624_v30  ;;  %v1631_v36 = vld [vmem:[%s1831_s19 + $0x64] ss:$16 sps:$4 sm:$0xff] (!%p1417_p10)   ;;  %v1645_v38 = vld [vmem:[%s1831_s19 + $0x8] ss:$16 sps:$4 sm:$0xff] (!%p1417_p10)   ;;  %v1633_v39 = vld [vmem:[%s1831_s19 + $0x60] ss:$16 sps:$4 sm:$0xff] (!%p1417_p10)   ;;  %1016 = vmatprep.subr.bf16.mxu1 (!%p1417_p10), %v1643_v37 }
 0x21c   : > { %975 = vmatprep.subr.bf16.mxu0 (!%p1417_p10), %v1625_v32  ;;  %v1634_v40 = vld [vmem:[%s1831_s19 + $0x84] ss:$16 sps:$4 sm:$0xff] (!%p1417_p10)   ;;  %v1649_v41 = vld [vmem:[%s1831_s19 + $0x2c] ss:$16 sps:$4 sm:$0xff] (!%p1417_p10)   ;;  %1017 = vmatpush1.bf16.msra.mxu1 (!%p1417_p10), %v1645_v38  ;;  %v1651_v42 = vld [vmem:[%s1831_s19 + $0x28] ss:$16 sps:$4 sm:$0xff] (!%p1417_p10)  }
 0x21d   : > { %1018 = vmatprep.subr.bf16.mxu1 (!%p1417_p10), %v1649_v41  ;;  %v1652_v43 = vld [vmem:[%s1831_s19 + $0x4c] ss:$16 sps:$4 sm:$0xff] (!%p1417_p10)   ;;  %v1636_v44 = vld [vmem:[%s1831_s19 + $0x80] ss:$16 sps:$4 sm:$0xff] (!%p1417_p10)   ;;  %v1637_v45 = vld [vmem:[%s1831_s19 + $0xa4] ss:$16 sps:$4 sm:$0xff] (!%p1417_p10)  }
 0x21e   : > { %v1654_v46 = vld [vmem:[%s1831_s19 + $0x48] ss:$16 sps:$4 sm:$0xff] (!%p1417_p10)   ;;  %v1655_v47 = vld [vmem:[%s1831_s19 + $0x6c] ss:$16 sps:$4 sm:$0xff] (!%p1417_p10)   ;;  %v1639_v48 = vld [vmem:[%s1831_s19 + $0xa0] ss:$16 sps:$4 sm:$0xff] (!%p1417_p10)  }
 0x21f   : > { %976 = vmatpush1.bf16.msra.mxu0 (!%p1417_p10), %v1627_v33  ;;  %v1640_v49 = vld [vmem:[%s1831_s19 + $0xc4] ss:$16 sps:$4 sm:$0xff] (!%p1417_p10)   ;;  %v1657_v50 = vld [vmem:[%s1831_s19 + $0x68] ss:$16 sps:$4 sm:$0xff] (!%p1417_p10)   ;;  %v1642_v51 = vld [vmem:[%s1831_s19 + $0xc0] ss:$16 sps:$4 sm:$0xff] (!%p1417_p10)  }
 0x220   : > { %977 = vmatprep.subr.bf16.mxu0 %v1628_v34  ;;  %1019 = vmatpush1.bf16.msra.mxu1 %v1651_v42  ;;  %v1658_v52 = vld [vmem:[%s1831_s19 + $0x8c] ss:$16 sps:$4 sm:$0xff]   ;;  %v1646_v53 = vld [vmem:[%s1831_s19 + $0xe4] ss:$16 sps:$4 sm:$0xff]   ;;  %v1660_v54 = vld [vmem:[%s1831_s19 + $0x88] ss:$16 sps:$4 sm:$0xff]  }
 0x221   : > { %1020 = vmatprep.subr.bf16.mxu1 %v1652_v43  ;;  %v1661_v55 = vld [vmem:[%s1831_s19 + $0xac] ss:$16 sps:$4 sm:$0xff]   ;;  %v1648_v56 = vld [vmem:[%s1831_s19 + $0xe0] ss:$16 sps:$4 sm:$0xff]   ;;  %v1663_v57 = vld [vmem:[%s1831_s19 + $0xa8] ss:$16 sps:$4 sm:$0xff]  }
 0x222   : > { %v1664_v58 = vld [vmem:[%s1831_s19 + $0xcc] ss:$16 sps:$4 sm:$0xff]   ;;  %v1666_v59 = vld [vmem:[%s1831_s19 + $0xc8] ss:$16 sps:$4 sm:$0xff]   ;;  %v1670_v62 = vld [vmem:[%s1836_s23 + $0x40] sm:$0xff]  }
 0x223   : > { %978 = vmatpush1.bf16.msra.mxu0 %v1630_v35  ;;  %v1667_v60 = vld [vmem:[%s1831_s19 + $0xec] ss:$16 sps:$4 sm:$0xff]   ;;  %v1669_v61 = vld [vmem:[%s1831_s19 + $0xe8] ss:$16 sps:$4 sm:$0xff]   ;;  %v1671_v63 = vld [vmem:[%s1836_s23] sm:$0xff]  }
 0x224   : > { %979 = vmatprep.subr.bf16.mxu0 %v1631_v36  ;;  %1021 = vmatpush1.bf16.msra.mxu1 %v1654_v46  ;;  %v1674_v3 = vld [vmem:[%s1836_s23 + $0x50] sm:$0xff]   ;;  %v1676_v5 = vld [vmem:[%s1836_s23 + $0x58] sm:$0xff]   ;;  %v1678_v6 = vld [vmem:[%s1836_s23 + $0x60] sm:$0xff]  }
 0x225   : > { %1022 = vmatprep.subr.bf16.mxu1 %v1655_v47  ;;  %v1675_v4 = vld [vmem:[%s1836_s23 + $0x10] sm:$0xff]   ;;  %v1679_v7 = vld [vmem:[%s1836_s23 + $0x20] sm:$0xff]   ;;  %v1680_v8 = vld [vmem:[%s1836_s23 + $0x68] sm:$0xff]  }
 0x226   : > { %v1681_v9 = vld [vmem:[%s1836_s23 + $0x28] sm:$0xff]   ;;  %v1682_v10 = vld [vmem:[%s1836_s23 + $0x70] sm:$0xff]   ;;  %v1684_v12 = vld [vmem:[%s1836_s23 + $0x78] sm:$0xff]  }
 0x227   : > { %980 = vmatpush1.bf16.msra.mxu0 %v1633_v39  ;;  %v1683_v11 = vld [vmem:[%s1836_s23 + $0x30] sm:$0xff]   ;;  %v1685_v13 = vld [vmem:[%s1836_s23 + $0x38] sm:$0xff]   ;;  %v1264_v14 = vld [vmem:[%s1826_s16] sm:$0xff] }
 0x228   : > { %981 = vmatprep.subr.bf16.mxu0 %v1634_v40  ;;  %1023 = vmatpush1.bf16.msra.mxu1 %v1657_v50  ;;  %v1265_v15 = vld [vmem:[%s1826_s16 + $0x8] sm:$0xff] }
 0x229   : > { %1024 = vmatprep.subr.bf16.mxu1 %v1658_v52  ;;  %1268 = vperm.xlu0 %1621, %v1264_v14  }
 0x22b   : > { %982 = vmatpush1.bf16.msra.mxu0 %v1636_v44 }
 0x22c   : > { %983 = vmatprep.subr.bf16.mxu0 %v1637_v45  ;;  %1025 = vmatpush1.bf16.msra.mxu1 %v1660_v54 }
 0x22d   : > { %1026 = vmatprep.subr.bf16.mxu1 %v1661_v55  ;;  %1273 = vperm.xlu0 %1621, %v1265_v15   ;;  %v1262_v55 = vld [vmem:[#allocation4] sm:$0xff] }
 0x22f   : > { %984 = vmatpush1.bf16.msra.mxu0 %v1639_v48 }
 0x230   : > { %985 = vmatprep.subr.bf16.mxu0 %v1640_v49  ;;  %1027 = vmatpush1.bf16.msra.mxu1 %v1663_v57 }
 0x231   : > { %1028 = vmatprep.subr.bf16.mxu1 %v1664_v58 }
 0x233   : > { %986 = vmatpush1.bf16.msra.mxu0 %v1642_v51 }
 0x234   : > { %987 = vmatprep.subr.bf16.mxu0 %v1646_v53  ;;  %1029 = vmatpush1.bf16.msra.mxu1 %v1666_v59 }
 0x235   : > { %1030 = vmatprep.subr.bf16.mxu1 %v1667_v60  ;;  %v1263_v60 = vld [vmem:[#allocation4 + $0x8] sm:$0xff] }
 0x237   : > { %988 = vmatpush1.bf16.msra.mxu0 %v1648_v56 }
 0x238   : > { %1031 = vmatpush1.bf16.msra.mxu1 %v1669_v61  ;;  %1499 = vmatprep.subr.bf16.mxu0 %v1670_v62 }
 0x23a   : > { %1006 = vmatmul.mubr.bf16.vlgmr.msra.gmra.mrb[0].mxu0 %v1820_v2 }
 0x23b   : > { %1049 = vmatmul.mubr.bf16.vlgmr.msra.gmra.mrb[0].mxu1 %v1820_v2  ;;  %1500 = vmatpush3.bf16.msra.mxu0 %v1671_v63  ;;  %v1677_v2 = vld [vmem:[%s1836_s23 + $0x18] sm:$0xff]  }
 0x23c   : > { %1501 = vmatprep.subr.bf16.mxu0 %v1672_v0 }
 0x23f   : > { %1502 = vmatpush3.bf16.msra.mxu0 %v1673_v1 }
 0x240   : > { %1503 = vmatprep.subr.bf16.mxu0 %v1674_v3 }
 0x243   : > { %1504 = vmatpush3.bf16.msra.mxu0 %v1675_v4 }
 0x244   : > { %1505 = vmatprep.subr.bf16.mxu0 %v1676_v5 }
 0x247   : > { %1506 = vmatpush3.bf16.msra.mxu0 %v1677_v2 }
 0x248   : > { %1507 = vmatprep.subr.bf16.mxu0 %v1678_v6 }
 0x24b   : > { %1508 = vmatpush3.bf16.msra.mxu0 %v1679_v7 }
 0x24c   : > { %1509 = vmatprep.subr.bf16.mxu0 %v1680_v8 }
 0x24f   : > { %1510 = vmatpush3.bf16.msra.mxu0 %v1681_v9 }
 0x250   : > { %1511 = vmatprep.subr.bf16.mxu0 %v1682_v10 }
 0x253   : > { %1512 = vmatpush3.bf16.msra.mxu0 %v1683_v11 }
 0x254   : > { %1513 = vmatprep.subr.bf16.mxu0 %v1684_v12 }
 0x257   : > { %1514 = vmatpush3.bf16.msra.mxu0 %v1685_v13 }
 0x2a8   : > { %v1269_v50 = vpop.permute.xlu0 %1268 }
 0x2ac   : > { %v1274_v59 = vpop.permute.xlu0 %1273 }
 0x30d   : > { %v1007_v16 = vpop.f32.mrb[0].mxu0 }
 0x30e   : > { %v1450_v17 = vmul.f32 -1.442695, %v1007_v16  ;;  %v1009_v18 = vpop.f32.mrb[1].mxu0  ;;  %v1050_v24 = vpop.f32.mrb[0].mxu1 }
 0x30f   : > { %v1451_v19 = vmul.f32 -1.442695, %v1009_v18  ;;  %v1011_v20 = vpop.f32.mrb[2].mxu0  ;;  %v1052_v25 = vpop.f32.mrb[1].mxu1 }
 0x310   : > { %1686 = vpow2.f32 %v1450_v17  ;;  %v1452_v21 = vmul.f32 -1.442695, %v1011_v20  ;;  %v1013_v22 = vpop.f32.mrb[3].mxu0  ;;  %v1054_v26 = vpop.f32.mrb[2].mxu1 }
 0x311   : > { %1688 = vpow2.f32 %v1451_v19  ;;  %v1453_v23 = vmul.f32 -1.442695, %v1013_v22  ;;  %v1056_v28 = vpop.f32.mrb[3].mxu1 }
 0x312   : > { %1690 = vpow2.f32 %v1452_v21 }
 0x313   : > { %1692 = vpow2.f32 %v1453_v23 }
 0x31a   : > { %v1687_v27 = vpop.eup %1686 }
 0x31b   : > { %v1689_v29 = vpop.eup %1688  ;;  %v1071_v30 = vadd.f32 1.0, %v1687_v27 }
 0x31c   : > { %v1691_v31 = vpop.eup %1690  ;;  %v1072_v32 = vadd.f32 1.0, %v1689_v29 }
 0x31d   : > { %v1693_v33 = vpop.eup %1692  ;;  %1694 = vrcp.f32 %v1071_v30  ;;  %v1073_v34 = vadd.f32 1.0, %v1691_v31 }
 0x31e   : > { %1696 = vrcp.f32 %v1072_v32  ;;  %v1074_v35 = vadd.f32 1.0, %v1693_v33 }
 0x31f   : > { %1698 = vrcp.f32 %v1073_v34 }
 0x320   : > { %1700 = vrcp.f32 %v1074_v35 }
 0x327   : > { %v1695_v36 = vpop.eup %1694 }
 0x328   : > { %v1697_v37 = vpop.eup %1696  ;;  %v1083_v38 = vmul.f32 %v1695_v36, %v1007_v16 }
 0x329   : > { %v1699_v39 = vpop.eup %1698  ;;  %v1084_v40 = vmul.f32 %v1697_v37, %v1009_v18 }
 0x32a   : > { %v1701_v41 = vpop.eup %1700  ;;  %v1085_v42 = vmul.f32 %v1699_v39, %v1011_v20  ;;  %v1087_v43 = vmul.f32 %v1083_v38, %v1050_v24 }
 0x32b   : > { %v1086_v44 = vmul.f32 %v1701_v41, %v1013_v22  ;;  %v1088_v45 = vmul.f32 %v1084_v40, %v1052_v25 }
 0x32c   : > { %v1089_v46 = vmul.f32 %v1085_v42, %v1054_v26 }
 0x32d   : > { %v1090_v47 = vmul.f32 %v1086_v44, %v1056_v28 }
 0x32e   : > { %v1091_v48 = vpack.c.bf16 %v1089_v46, %v1087_v43 }
 0x32f   : > { %v1092_v49 = vpack.c.bf16 %v1090_v47, %v1088_v45 }
 0x331   : > { %1253 = vmatprep.mubr.bf16.mxu0 %v1092_v49 }
 0x332   : > { %1254 = vmatmul.mubr.bf16.vlgmr.msra.gmra.mrb[4].mxu0 %v1091_v48 }
 0x405   : > { %v1515_v51 = vpop.f32.mrb[4].mxu0 }
 0x406   : > { %v1516_v52 = vpop.f32.mrb[5].mxu0 }
 0x407   : > { %v1517_v53 = vadd.f32 %v1516_v52, %v1515_v51  ;;  %v1518_v54 = vpop.f32.mrb[6].mxu0 }
 0x408   : > { %v1519_v56 = vpop.f32.mrb[7].mxu0 }
 0x409   : > { %v1276_v57 = vmul.f32 %v1517_v53, %v1269_v50  ;;  %v1520_v58 = vadd.f32 %v1519_v56, %v1518_v54 }
 0x40b   : > { %v1278_v61 = vadd.f32 %v1276_v57, %v1262_v55  ;;  %v1277_v62 = vmul.f32 %v1520_v58, %v1274_v59 }
 0x40d   : > { %1280 = vst [vmem:[#allocation4] sm:$0xff] %v1278_v61  ;;  %v1279_v63 = vadd.f32 %v1277_v62, %v1263_v60 }
 0x40f   : > { %1281 = vst [vmem:[#allocation4 + $0x8] sm:$0xff] %v1279_v63 }
 0x410 PF: > { %p1525_p11 = scmp.eq.s32.totalorder %s1809_s0, 3  ;;  %s1757_s16 = smov [#allocation4]  }
 0x411   : > { %s1288_s19 = sshll.u32 %s1757_s16, 4  ;;  %s1289_s19 = int_to_ptr.vmem [resolvable:$true] %s1288_s19 }
 0x412   : > { %s1714_s23 = scalar_lea.vmem %s1289_s19, 256  ;;  %p1721_p1 = scmp.lt.s32.totalorder %s1289_s19, %s1289_s19 }
 0x413   : > { %p1715_p12 = scmp.ne.s32.totalorder %s1289_s19, %s1714_s23  ;;  %p1722_p2 = scmp.lt.s32.totalorder %s1714_s23, %s1714_s23 }
 0x415   : > { %p1716_p13 = pnand %p1715_p12, %p1525_p11  ;;  %p1723_p3 = por %p1722_p2, %p1721_p1 }
 0x417   : > { %p1717_p0 = pneg %p1716_p13 }
 0x419   : > { %p1724_p4 = pnand %p1723_p3, %p1717_p0 }
 0x41b   : > { %1727 = shalt.err (!%p1724_p4)
}
 0x41c   : > { %s1728_s28 = scalar_lea.hbm %s2071_s7, 256 }
 0x41d   : > { %p1729_p5 = scmp.ne.s32.totalorder %s2071_s7, %s1728_s28  ;;  %p1734_p8 = scmp.lt.u32.totalorder %s1728_s28, %s2071_s7 }
 0x41f   : > { %p1730_p6 = pnand %p1729_p5, %p1525_p11 }
 0x421   : > { %p1731_p7 = pneg %p1730_p6 }
 0x423   : > { %p1736_p9 = pnand %p1734_p8, %p1731_p7 }
 0x425   : > { %1739 = shalt.err (!%p1736_p9)
}
 0x426   : > { %s1758_s11 = smov 128   ;;  %s1759_s12 = smov 8  }
 0x427   : > { %1522 = dma.vmem_to_hbm [thread:$0]  (%p1525_p11), %s1289_s19, 256, %s2071_s7, [#allocation5], %s1758_s11, %s1758_s11, %s1759_s12  }
 0x428   : > { %1747 = dma.done.wait (%p1525_p11), [#allocation5], 256  }
 0x429   : > { %1749 = vsyncadd (%p1525_p11), [#allocation5], 4294967040 }
 0x42a PF: > { %s24_s29 = sadd.s32 1, %s1752_s29  }
 0x42b   : > { %p21_p10 = scmp.ge.s32.totalorder %s24_s29, 6  }
 0x42d   :  { %23 = sbr.rel (!%p21_p10) target bundleno = 16 (0x10), region = 85 }
 0x434   :  { %1304 = vsyncpa [#allocation5], 1 }
 0x435   :  { %1306 = vsyncpa [#allocation5 + $0x1], 1 }

// kernel: xverse_model_forward.5
= control target key start
LH: loop header
LB: loop body
LE: loop exit
PB: predicated region body
PF: predicated region fallthrough
CT: control target
= control target key end

     0   :  { %18 = vsyncpa [#allocation3], 0  ;;  %s2123_s0 = inlined_call_operand.vmem [shape: f32[16,128], index: 0, kind: input, shape index: {}, may-alias: {0,9}]   ;;  %s2124_s1 = inlined_call_operand.vmem [shape: f32[16,128], index: 1, kind: input, shape index: {}, may-alias: {1,10}]   ;;  %s2125_s2 = inlined_call_operand.vmem [shape: f32[1,128], index: 2, kind: input, shape index: {}]   ;;  %s2126_s3 = inlined_call_operand.hbm [shape: bf16[128,256], index: 3, kind: input, shape index: {}]   ;;  %s2127_s4 = inlined_call_operand.vmem [shape: f32[16,256], index: 4, kind: input, shape index: {}]   ;;  %s2128_s5 = inlined_call_operand.vmem [shape: f32[16,256], index: 5, kind: input, shape index: {}]   ;;  %s2129_s6 = inlined_call_operand.hbm [shape: bf16[128,128], index: 6, kind: input, shape index: {}]   ;;  %s2130_s7 = inlined_call_operand.vmem [shape: f32[1,128], index: 7, kind: input, shape index: {}]   ;;  %s2131_s8 = inlined_call_operand.vmem [shape: bf16[128,4], index: 8, kind: input, shape index: {}]   ;;  %s2132_s9 = inlined_call_operand.vmem [shape: f32[16,128], index: 9, kind: output, shape index: {0}, may-alias: {0,9}]   ;;  %s2133_s10 = inlined_call_operand.vmem [shape: f32[16,128], index: 10, kind: output, shape index: {1}, may-alias: {1,10}]   ;;  %s2134_s11 = inlined_call_operand.vmem [shape: f32[4,16,1], index: 11, kind: output, shape index: {2}]   ;;  %s2135_s12 = inlined_call_operand.vmem [shape: s32[1,4], index: 12, kind: output, shape index: {3}]  }
   0x1   :  { %19 = vsyncpa [#allocation5], 0  ;;  %s1653_s21 = smov [#allocation2]   ;;  %s1605_s25 = scalar_lea.hbm %s2126_s3, 2048 }
   0x2   :  { %s31_s22 = sshll.u32 %s1653_s21, 4  ;;  %p1606_p0 = scmp.ne.s32.totalorder %s2126_s3, %s1605_s25  ;;  %s32_s22 = int_to_ptr.vmem [resolvable:$true] %s31_s22 }
   0x3   :  { %p1609_p1 = scmp.lt.u32.totalorder %s1605_s25, %s2126_s3 }
   0x5   :  { %p1611_p2 = pnand %p1609_p1, %p1606_p0 }
   0x7   :  { %1614 = shalt.err (!%p1611_p2)
}
   0x8   :  { %s1615_s30 = scalar_lea.vmem %s32_s22, 2048  ;;  %p1620_p4 = scmp.lt.s32.totalorder %s32_s22, %s32_s22 }
   0x9   :  { %p1616_p3 = scmp.ne.s32.totalorder %s32_s22, %s1615_s30  ;;  %p1621_p5 = scmp.lt.s32.totalorder %s1615_s30, %s1615_s30 }
   0xb   :  { %p1622_p6 = por %p1621_p5, %p1620_p4 }
   0xd   :  { %p1623_p7 = pnand %p1622_p6, %p1616_p3 }
   0xf   :  { %1626 = shalt.err (!%p1623_p7)
}
  0x10   :  { %s1654_s13 = smov 128   ;;  %s1655_s14 = smov 8  }
  0x11   :  { %37 = dma.hbm_to_vmem [thread:$0]  %s2126_s3, 2048, %s32_s22, [#allocation3], %s1654_s13, %s1654_s13, %s1655_s14  }
  0x12   :  { %s1656_s17 = smov [#allocation4]   ;;  %s1627_s21 = scalar_lea.hbm %s2129_s6, 1024 }
  0x13   :  { %s47_s18 = sshll.u32 %s1656_s17, 4  ;;  %p1628_p8 = scmp.ne.s32.totalorder %s2129_s6, %s1627_s21  ;;  %s48_s18 = int_to_ptr.vmem [resolvable:$true] %s47_s18 }
  0x14   :  { %p1631_p9 = scmp.lt.u32.totalorder %s1627_s21, %s2129_s6 }
  0x16   :  { %p1633_p10 = pnand %p1631_p9, %p1628_p8 }
  0x18   :  { %1636 = shalt.err (!%p1633_p10)
}
  0x19   :  { %s1637_s27 = scalar_lea.vmem %s48_s18, 1024  ;;  %p1642_p12 = scmp.lt.s32.totalorder %s48_s18, %s48_s18 }
  0x1a   :  { %p1638_p11 = scmp.ne.s32.totalorder %s48_s18, %s1637_s27  ;;  %p1643_p13 = scmp.lt.s32.totalorder %s1637_s27, %s1637_s27 }
  0x1c   :  { %p1644_p0 = por %p1643_p13, %p1642_p12 }
  0x1e   :  { %p1645_p1 = pnand %p1644_p0, %p1638_p11 }
  0x20   :  { %1648 = shalt.err (!%p1645_p1)
}
  0x21   :  { %s1657_s3 = smov 64   ;;  %s1658_s22 = smov 4  }
  0x22   :  { %53 = dma.hbm_to_vmem [thread:$0]  %s2129_s6, 1024, %s48_s18, [#allocation5], %s1657_s3, %s1657_s3, %s1658_s22  }
  0x23   :  { %1649 = dma.done.wait [#allocation3], 2048  }
  0x24   :  { %1650 = vsyncadd [#allocation3], 4294965248 }
  0x25   :  { %1651 = dma.done.wait [#allocation5], 1024  }
  0x26   :  { %1652 = vsyncadd [#allocation5], 4294966272  ;;  %v65_v0 = vld [vmem:[%s2123_s0] sm:$0xff]  ;;  %v66_v2 = vld [vmem:[%s2123_s0 + $0x8] sm:$0xff]  ;;  %v1659_v21 = vmov 0   ;;  %s1660_s18 = smov 112   ;;  %v235_v46 = vlaneseq }
  0x27   :  { %v67_v1 = vld [vmem:[%s2124_s1] sm:$0xff]  ;;  %v68_v4 = vld [vmem:[%s2124_s1 + $0x8] sm:$0xff]  ;;  %v1520_v9 = vld [vmem:[#allocation2 + $0x14] ss:$8 sps:$4 sm:$0xff]   ;;  %224 = vmatprep.mubr.bf16.mxu0 %v1659_v21  ;;  %s1661_s20 = smov 16   ;;  %v1662_v43 = vmov 0.0  }
  0x28   :  { %v1766_v3 = vadd.f32 %v67_v1, %v65_v0  ;;  %v1771_v5 = vadd.f32 %v68_v4, %v66_v2  ;;  %v1517_v6 = vld [vmem:[#allocation2 + $0x4] ss:$8 sps:$4 sm:$0xff]   ;;  %v1519_v7 = vld [vmem:[#allocation2] ss:$8 sps:$4 sm:$0xff]   ;;  %v1522_v10 = vld [vmem:[#allocation2 + $0x10] ss:$8 sps:$4 sm:$0xff]   ;;  %1381 = vmatprep.subr.bf16.mxu1 %v1662_v43 }
  0x29   :  { %192 = vmatprep.subr.bf16.mxu0 %v1517_v6  ;;  %v1523_v12 = vld [vmem:[#allocation2 + $0x24] ss:$8 sps:$4 sm:$0xff]   ;;  %v1525_v13 = vld [vmem:[#allocation2 + $0x20] ss:$8 sps:$4 sm:$0xff]   ;;  %v1526_v14 = vld [vmem:[#allocation2 + $0x34] ss:$8 sps:$4 sm:$0xff]  }
  0x2a   :  { %v71_v8 = vmul.f32 %v1766_v3, %v1766_v3  ;;  %v72_v11 = vmul.f32 %v1771_v5, %v1771_v5  ;;  %193 = vmatpush1.bf16.msra.mxu0 %v1519_v7  ;;  %v1528_v15 = vld [vmem:[#allocation2 + $0x30] ss:$8 sps:$4 sm:$0xff]   ;;  %v1529_v16 = vld [vmem:[#allocation2 + $0x44] ss:$8 sps:$4 sm:$0xff]   ;;  %v1531_v17 = vld [vmem:[#allocation2 + $0x40] ss:$8 sps:$4 sm:$0xff]  }
  0x2b   :  { %194 = vmatprep.subr.bf16.mxu0 %v1520_v9  ;;  %v1532_v18 = vld [vmem:[#allocation2 + $0x54] ss:$8 sps:$4 sm:$0xff]   ;;  %v1534_v19 = vld [vmem:[#allocation2 + $0x50] ss:$8 sps:$4 sm:$0xff]   ;;  %v1535_v20 = vld [vmem:[#allocation2 + $0x64] ss:$8 sps:$4 sm:$0xff]  }
  0x2c   :  { %73 = vadd.xlane.f32.xlu0 %v71_v8  ;;  %v1537_v22 = vld [vmem:[#allocation2 + $0x60] ss:$8 sps:$4 sm:$0xff]   ;;  %v1538_v23 = vld [vmem:[#allocation2 + $0x74] ss:$8 sps:$4 sm:$0xff]   ;;  %v1540_v24 = vld [vmem:[#allocation2 + $0x70] ss:$8 sps:$4 sm:$0xff]  }
  0x2d   :  { %v1305_v34 = vld [vmem:[%s2125_s2] ss:$0 sm:$0xff]  ;;  %vm1663_vm0 = vmmov 0   ;;  %v1790_v48 = vand.u32 127, %v235_v46  ;;  %v307_v4 = vld [vmem:[%s2128_s5 + $0x8] sm:$0xff]  ;;  %vm357_vm5 = vcmask 261120  }
  0x2e   :  { %195 = vmatpush1.bf16.msra.mxu0 %v1522_v10  ;;  %1383 = vmatprep.mubr.msk.bf16.mxu1 %vm1663_vm0, %v1662_v43  ;;  %v306_v2 = vld [vmem:[%s2128_s5] sm:$0xff]  ;;  %v299_v9 = vld [vmem:[%s2127_s4 + $0x8] sm:$0xff]  ;;  %v300_v10 = vld [vmem:[%s2127_s4 + $0x10] sm:$0xff]  ;;  %vm552_vm7 = vcmask 130048   ;;  %vm855_vm9 = vcmask 523264   ;;  %vm858_vm10 = vcmask 785408  }
  0x2f   :  { %196 = vmatprep.subr.bf16.mxu0 %v1523_v12  ;;  %v237_v49 = vadd.s32 128, %v1790_v48  ;;  %vm272_vm1 = vcmp.lt.s32.totalorder %v1790_v48, 112  ;;  %v242_v52 = vand.u32 31, %v1790_v48  ;;  %vm289_vm2 = vcmp.lt.s32.totalorder %v1790_v48, 16  ;;  %v298_v8 = vld [vmem:[%s2127_s4] sm:$0xff] }
  0x30   :  { %75 = vadd.xlane.f32.xlu0 %v72_v11  ;;  %v301_v11 = vld [vmem:[%s2127_s4 + $0x18] sm:$0xff]  ;;  %s1664_s4 = smov 96   ;;  %vm1100_vm11 = vcmask 31744  }
  0x31   :  { %v249_v53 = vand.u32 31, %v237_v49  ;;  %vm1800_vm3 = vcmp.lt.s32.totalorder %v242_v52, 16 }
  0x32   :  { %197 = vmatpush1.bf16.msra.mxu0 %v1525_v13 }
  0x33   :  { %198 = vmatprep.subr.bf16.mxu0 %v1526_v14  ;;  %vm1804_vm4 = vcmp.lt.s32.totalorder %v249_v53, 16  ;;  %v308_v14 = vld [vmem:[%s2128_s5 + $0x10] sm:$0xff] }
  0x36   :  { %199 = vmatpush1.bf16.msra.mxu0 %v1528_v15  ;;  %v309_v15 = vld [vmem:[%s2128_s5 + $0x18] sm:$0xff]  ;;  %s1665_s5 = smov 32  }
  0x37   :  { %200 = vmatprep.subr.bf16.mxu0 %v1529_v16 }
  0x3a   :  { %201 = vmatpush1.bf16.msra.mxu0 %v1531_v17 }
  0x3b   :  { %202 = vmatprep.subr.bf16.mxu0 %v1532_v18 }
  0x3e   :  { %203 = vmatpush1.bf16.msra.mxu0 %v1534_v19 }
  0x3f   :  { %204 = vmatprep.subr.bf16.mxu0 %v1535_v20 }
  0x42   :  { %205 = vmatpush1.bf16.msra.mxu0 %v1537_v22 }
  0x43   :  { %206 = vmatprep.subr.bf16.mxu0 %v1538_v23 }
  0x46   :  { %207 = vmatpush1.bf16.msra.mxu0 %v1540_v24 }
  0x47   :  { %1405 = vmatprep.subr.bf16.mxu0 %v1662_v43 }
  0xb9   :  { %v74_v25 = vpop.xlane.xlu0 %73 }
  0xba   :  { %v78_v26 = vmul.f32 0.0078125, %v74_v25 }
  0xbc   :  { %v80_v27 = vadd.f32 1e-06, %v78_v26 }
  0xbd   :  { %v76_v28 = vpop.xlane.xlu0 %75 }
  0xbe   :  { %1557 = vrsqrt.f32 %v80_v27  ;;  %v79_v29 = vmul.f32 0.0078125, %v76_v28 }
  0xc0   :  { %v81_v30 = vadd.f32 1e-06, %v79_v29 }
  0xc2   :  { %1559 = vrsqrt.f32 %v81_v30 }
  0xc8   :  { %v1558_v31 = vpop.eup %1557 }
  0xc9   :  { %v84_v32 = vmul.f32 %v1558_v31, %v1766_v3 }
  0xcb   :  { %v93_v36 = vmul.f32 %v1305_v34, %v84_v32 }
  0xcc   :  { %v1560_v33 = vpop.eup %1559 }
  0xcd   :  { %v85_v35 = vmul.f32 %v1560_v33, %v1771_v5 }
  0xcf   :  { %v94_v37 = vmul.f32 %v1305_v34, %v85_v35 }
  0xd1   :  { %v95_v38 = vpack.c.bf16 %v94_v37, %v93_v36 }
  0xd3   :  { %225 = vmatmul.mubr.bf16.vlgmr.msra.gmra.mrb[0].mxu0 %v95_v38 }
  0xd4   :  { %1407 = vmatprep.mubr.msk.bf16.mxu0 %vm1663_vm0, %v1662_v43 }
 0x1a6   :  { %v226_v39 = vpop.f32.mrb[0].mxu0 }
 0x1a7   :  { %264 = vrot.lane.b32.xlu1 %v226_v39, %s1660_s18  ;;  %v228_v40 = vpop.f32.mrb[1].mxu0  ;;  %v302_v22 = vmul.f32 %v298_v8, %v226_v39 }
 0x1a8   :  { %268 = vrot.lane.b32.xlu0 %v228_v40, %s1660_s18  ;;  %v230_v41 = vpop.f32.mrb[2].mxu0  ;;  %v303_v23 = vmul.f32 %v299_v9, %v228_v40 }
 0x1a9   :  { %v232_v42 = vpop.f32.mrb[3].mxu0  ;;  %v304_v26 = vmul.f32 %v300_v10, %v230_v41 }
 0x1aa   :  { %v305_v27 = vmul.f32 %v301_v11, %v232_v42 }
 0x1ab   :  { %281 = vrot.lane.b32.xlu1 %v226_v39, %s1661_s20 }
 0x1af   :  { %285 = vrot.lane.b32.xlu1 %v228_v40, %s1661_s20 }
 0x1b3   :  { %266 = vrot.lane.b32.xlu1 %v230_v41, %s1660_s18 }
 0x1b7   :  { %283 = vrot.lane.b32.xlu1 %v230_v41, %s1661_s20 }
 0x1bb   :  { %270 = vrot.lane.b32.xlu1 %v232_v42, %s1660_s18 }
 0x1bf   :  { %287 = vrot.lane.b32.xlu1 %v232_v42, %s1661_s20 }
 0x219   :  { %v265_v44 = vpop.permute.xlu1 %264 }
 0x21a   :  { %v269_v51 = vpop.permute.xlu0 %268 }
 0x21b   :  { %v273_v55 = vsel %vm272_vm1, %v265_v44, %v269_v51  ;;  %v275_v56 = vsel %vm272_vm1, %v269_v51, %v265_v44 }
 0x21c   :  { %v277_v61 = vsub.f32 0.0, %v273_v55  ;;  %v278_v62 = vsub.f32 0.0, %v275_v56 }
 0x21d   :  { %v282_v45 = vpop.permute.xlu1 %281 }
 0x221   :  { %v286_v47 = vpop.permute.xlu1 %285 }
 0x222   :  { %v290_v59 = vsel %vm289_vm2, %v282_v45, %v286_v47  ;;  %v292_v60 = vsel %vm289_vm2, %v286_v47, %v282_v45 }
 0x223   :  { %v294_v6 = vsel %vm1800_vm3, %v277_v61, %v292_v60  ;;  %v295_v7 = vsel %vm1804_vm4, %v278_v62, %v290_v59  ;;  %v347_v59 = vshrl.u32 %v235_v46, 7 }
 0x224   :  { %v310_v17 = vmul.f32 %v306_v2, %v294_v6  ;;  %v311_v18 = vmul.f32 %v307_v4, %v295_v7 }
 0x225   :  { %v267_v50 = vpop.permute.xlu1 %266  ;;  %v348_v60 = vadd.s32 8, %v347_v59  ;;  %vm349_vm6 = vcmp.le.s32.totalorder %v1790_v48, %v347_v59 }
 0x226   :  { %v314_v30 = vadd.f32 %v310_v17, %v302_v22  ;;  %v315_v32 = vadd.f32 %v311_v18, %v303_v23 }
 0x227   :  { %vm350_vm8 = vcmp.le.s32.totalorder %v1790_v48, %v348_v60 }
 0x229   :  { %v284_v54 = vpop.permute.xlu1 %283 }
 0x22d   :  { %v271_v63 = vpop.permute.xlu1 %270 }
 0x22e   :  { %v274_v0 = vsel %vm272_vm1, %v267_v50, %v271_v63  ;;  %v276_v1 = vsel %vm272_vm1, %v271_v63, %v267_v50 }
 0x22f   :  { %v279_v12 = vsub.f32 0.0, %v274_v0  ;;  %v280_v13 = vsub.f32 0.0, %v276_v1 }
 0x231   :  { %v288_v16 = vpop.permute.xlu1 %287 }
 0x232   :  { %v291_v19 = vsel %vm289_vm2, %v284_v54, %v288_v16  ;;  %v293_v20 = vsel %vm289_vm2, %v288_v16, %v284_v54 }
 0x233   :  { %v296_v24 = vsel %vm1800_vm3, %v279_v12, %v293_v20  ;;  %v297_v25 = vsel %vm1804_vm4, %v280_v13, %v291_v19 }
 0x234   :  { %v312_v28 = vmul.f32 %v308_v14, %v296_v24  ;;  %v313_v29 = vmul.f32 %v309_v15, %v297_v25 }
 0x236   :  { %v316_v31 = vadd.f32 %v312_v28, %v304_v26  ;;  %v317_v33 = vadd.f32 %v313_v29, %v305_v27 }
 0x238   :  { %v1482_v34 = vpack.i.bf16 %v316_v31, %v314_v30  ;;  %v1487_v35 = vpack.i.bf16 %v317_v33, %v315_v32  ;;  %v1852_v36 = vpack.c.bf16 %v317_v33, %v315_v32  ;;  %v351_v37 = vpack.c.bf16 %v316_v31, %v314_v30 }
 0x23a   :  { %1483 = vrot.lane.b32.xlu1 %v1482_v34, %s1664_s4  ;;  %1488 = vrot.lane.b32.xlu0 %v1487_v35, %s1664_s4  ;;  %v362_v38 = vsel %vm357_vm5, %v1852_v36, 0 }
 0x23b   :  { %1382 = vmatpush3.bf16.xpose.msra.mxu1 %v362_v38 }
 0x23c   :  { %1387 = vmatprep.subr.bf16.mxu1 %v1662_v43 }
 0x23e   :  { %1493 = vrot.lane.b32.xlu1 %v1482_v34, %s1657_s3  ;;  %1498 = vrot.lane.b32.xlu0 %v1482_v34, %s1665_s5 }
 0x242   :  { %1384 = vmatmul.mubr.msk.bf16.vlgmr.msra.gmra.mrb[0].mxu1 %vm357_vm5, %v351_v37 }
 0x243   :  { %1388 = vmatpush3.bf16.xpose.msra.mxu1 %v362_v38  ;;  %1389 = vmatprep.mubr.msk.bf16.mxu1 %vm1663_vm0, %v1662_v43 }
 0x244   :  { %1393 = vmatprep.subr.bf16.mxu1 %v1662_v43 }
 0x2ac   :  { %v1484_v39 = vpop.permute.xlu1 %1483  ;;  %v1489_v40 = vpop.permute.xlu0 %1488 }
 0x2ad   :  { %v1486_v41 = vunpack.i.h.bf16 %v1484_v39  ;;  %v1485_v42 = vunpack.i.l.bf16 %v1484_v39  ;;  %v1491_v44 = vunpack.i.h.bf16 %v1489_v40  ;;  %v1490_v45 = vunpack.i.l.bf16 %v1489_v40 }
 0x2af   :  { %v352_v47 = vpack.c.bf16 %v1486_v41, %v1485_v42  ;;  %v1865_v49 = vpack.c.bf16 %v1491_v44, %v1490_v45 }
 0x2b0   :  { %v1494_v50 = vpop.permute.xlu1 %1493  ;;  %v1499_v55 = vpop.permute.xlu0 %1498 }
 0x2b1   :  { %1390 = vmatmul.mubr.msk.bf16.vlgmr.msra.gmra.mrb[4].mxu1 %vm357_vm5, %v352_v47  ;;  %v453_v51 = vsel %vm357_vm5, %v1865_v49, 0  ;;  %v1496_v52 = vunpack.i.h.bf16 %v1494_v50  ;;  %v1495_v53 = vunpack.i.l.bf16 %v1494_v50  ;;  %v1501_v56 = vunpack.i.h.bf16 %v1499_v55 }
 0x2b2   :  { %1395 = vmatprep.mubr.msk.bf16.mxu1 %vm1663_vm0, %v1662_v43  ;;  %1394 = vmatpush3.bf16.xpose.msra.mxu1 %v453_v51  ;;  %v1500_v57 = vunpack.i.l.bf16 %v1499_v55 }
 0x2b3   :  { %1399 = vmatprep.subr.bf16.mxu1 %v1662_v43  ;;  %v353_v54 = vpack.c.bf16 %v1496_v52, %v1495_v53 }
 0x2b4   :  { %v354_v58 = vpack.c.bf16 %v1501_v56, %v1500_v57 }
 0x2b9   :  { %1396 = vmatmul.mubr.msk.bf16.vlgmr.msra.gmra.mrb[8].mxu1 %vm357_vm5, %v353_v54 }
 0x2ba   :  { %1400 = vmatpush3.bf16.xpose.msra.mxu1 %v453_v51  ;;  %1401 = vmatprep.mubr.msk.bf16.mxu1 %vm1663_vm0, %v1662_v43 }
 0x2bb   :  { %1411 = vmatprep.subr.bf16.mxu1 %v1662_v43 }
 0x2c1   :  { %1402 = vmatmul.mubr.msk.bf16.vlgmr.msra.gmra.mrb[12].mxu1 %vm357_vm5, %v354_v58 }
 0x2c2   :  { %1413 = vmatprep.mubr.msk.bf16.mxu1 %vm1663_vm0, %v1662_v43 }
 0x315   :  { %v398_v61 = vpop.f32.mrb[0].mxu1 }
 0x316   :  { %v544_v62 = vsel %vm349_vm6, %v398_v61, -1e+30  ;;  %v1385_v63 = vpop.f32.mrb[1].mxu1 }
 0x317   :  { %v401_v0 = vpop.f32.mrb[2].mxu1  ;;  %v553_v1 = vsel %vm552_vm7, %v544_v62, -inf }
 0x318   :  { %v545_v2 = vsel %vm350_vm8, %v401_v0, -1e+30  ;;  %554 = vmax.xlane.f32.xlu1 %v553_v1  ;;  %v1386_v4 = vpop.f32.mrb[3].mxu1 }
 0x319   :  { %v556_v46 = vsel %vm552_vm7, %v545_v2, -inf }
 0x31a   :  { %557 = vmax.xlane.f32.xlu0 %v556_v46 }
 0x384   :  { %v442_v6 = vpop.f32.mrb[4].mxu1 }
 0x385   :  { %v546_v7 = vsel %vm349_vm6, %v442_v6, -1e+30  ;;  %v1391_v8 = vpop.f32.mrb[5].mxu1 }
 0x386   :  { %v445_v9 = vpop.f32.mrb[6].mxu1  ;;  %v559_v10 = vsel %vm552_vm7, %v546_v7, -inf }
 0x387   :  { %v547_v11 = vsel %vm350_vm8, %v445_v9, -1e+30  ;;  %560 = vmax.xlane.f32.xlu0 %v559_v10  ;;  %v1392_v12 = vpop.f32.mrb[7].mxu1 }
 0x388   :  { %v562_v13 = vsel %vm552_vm7, %v547_v11, -inf }
 0x389   :  { %563 = vmax.xlane.f32.xlu1 %v562_v13 }
 0x38c   :  { %v489_v14 = vpop.f32.mrb[8].mxu1 }
 0x38d   :  { %v548_v15 = vsel %vm349_vm6, %v489_v14, -1e+30  ;;  %v1397_v16 = vpop.f32.mrb[9].mxu1 }
 0x38e   :  { %v492_v17 = vpop.f32.mrb[10].mxu1  ;;  %v565_v18 = vsel %vm552_vm7, %v548_v15, -inf }
 0x38f   :  { %v549_v19 = vsel %vm350_vm8, %v492_v17, -1e+30  ;;  %566 = vmax.xlane.f32.xlu0 %v565_v18  ;;  %v1398_v20 = vpop.f32.mrb[11].mxu1 }
 0x390   :  { %v568_v22 = vsel %vm552_vm7, %v549_v19, -inf }
 0x391   :  { %569 = vmax.xlane.f32.xlu1 %v568_v22 }
 0x394   :  { %v533_v23 = vpop.f32.mrb[12].mxu1 }
 0x395   :  { %v550_v24 = vsel %vm349_vm6, %v533_v23, -1e+30  ;;  %v1403_v25 = vpop.f32.mrb[13].mxu1 }
 0x396   :  { %v536_v26 = vpop.f32.mrb[14].mxu1  ;;  %v571_v27 = vsel %vm552_vm7, %v550_v24, -inf }
 0x397   :  { %v551_v28 = vsel %vm350_vm8, %v536_v26, -1e+30  ;;  %572 = vmax.xlane.f32.xlu0 %v571_v27  ;;  %v1404_v29 = vpop.f32.mrb[15].mxu1 }
 0x398   :  { %v574_v30 = vsel %vm552_vm7, %v551_v28, -inf }
 0x399   :  { %575 = vmax.xlane.f32.xlu1 %v574_v30 }
 0x3a5   :  { %v555_v31 = vpop.xlane.xlu1 %554 }
 0x3a6   :  { %v577_v32 = vsub.f32 %v544_v62, %v555_v31 }
 0x3a7   :  { %v558_v33 = vpop.xlane.xlu0 %557 }
 0x3a8   :  { %v585_v34 = vmul.f32 1.442695, %v577_v32  ;;  %v578_v35 = vsub.f32 %v545_v2, %v558_v33 }
 0x3aa   :  { %1561 = vpow2.f32 %v585_v34  ;;  %v587_v37 = vmul.f32 1.442695, %v578_v35 }
 0x3ac   :  { %1563 = vpow2.f32 %v587_v37 }
 0x3b4   :  { %v1907_v38 = vpop.eup %1561 }
 0x3b5   :  { %v601_v39 = vsel %vm552_vm7, %v1907_v38, 0.0 }
 0x3b6   :  { %v1911_v40 = vpop.eup %1563  ;;  %602 = vadd.xlane.f32.xlu0 %v601_v39 }
 0x3b7   :  { %v604_v41 = vsel %vm552_vm7, %v1911_v40, 0.0 }
 0x3b8   :  { %605 = vadd.xlane.f32.xlu1 %v604_v41 }
 0x414   :  { %v561_v42 = vpop.xlane.xlu0 %560 }
 0x415   :  { %v579_v44 = vsub.f32 %v546_v7, %v561_v42 }
 0x416   :  { %v564_v45 = vpop.xlane.xlu1 %563 }
 0x417   :  { %v589_v47 = vmul.f32 1.442695, %v579_v44  ;;  %v580_v50 = vsub.f32 %v547_v11, %v564_v45  ;;  %v1541_v44 = vld [vmem:[#allocation4] sm:$0xff]   ;;  %v1542_v45 = vld [vmem:[#allocation4 + $0x8] sm:$0xff]  }
 0x419   :  { %1565 = vpow2.f32 %v589_v47  ;;  %v591_v51 = vmul.f32 1.442695, %v580_v50  ;;  %v1543_v47 = vld [vmem:[#allocation4 + $0x10] sm:$0xff]   ;;  %v1544_v50 = vld [vmem:[#allocation4 + $0x18] sm:$0xff]  }
 0x41b   :  { %1567 = vpow2.f32 %v591_v51  ;;  %v1545_v51 = vld [vmem:[#allocation4 + $0x20] sm:$0xff]  }
 0x41c   :  { %v567_v52 = vpop.xlane.xlu0 %566 }
 0x41d   :  { %v581_v53 = vsub.f32 %v548_v15, %v567_v52  ;;  %v1546_v52 = vld [vmem:[#allocation4 + $0x28] sm:$0xff]  }
 0x41e   :  { %v570_v54 = vpop.xlane.xlu1 %569 }
 0x41f   :  { %v593_v55 = vmul.f32 1.442695, %v581_v53  ;;  %v582_v56 = vsub.f32 %v549_v19, %v570_v54  ;;  %v1547_v53 = vld [vmem:[#allocation4 + $0x30] sm:$0xff]  }
 0x421   :  { %1569 = vpow2.f32 %v593_v55  ;;  %v595_v57 = vmul.f32 1.442695, %v582_v56 }
 0x423   :  { %v1566_v58 = vpop.eup %1565  ;;  %1571 = vpow2.f32 %v595_v57 }
 0x424   :  { %v607_v59 = vsel %vm552_vm7, %v1566_v58, 0.0  ;;  %v573_v61 = vpop.xlane.xlu0 %572 }
 0x425   :  { %v1568_v60 = vpop.eup %1567  ;;  %608 = vadd.xlane.f32.xlu0 %v607_v59  ;;  %v583_v62 = vsub.f32 %v550_v24, %v573_v61 }
 0x426   :  { %v610_v63 = vsel %vm552_vm7, %v1568_v60, 0.0  ;;  %v576_v0 = vpop.xlane.xlu1 %575 }
 0x427   :  { %611 = vadd.xlane.f32.xlu1 %v610_v63  ;;  %v597_v1 = vmul.f32 1.442695, %v583_v62  ;;  %v584_v2 = vsub.f32 %v551_v28, %v576_v0 }
 0x429   :  { %1573 = vpow2.f32 %v597_v1  ;;  %v599_v4 = vmul.f32 1.442695, %v584_v2 }
 0x42b   :  { %v1570_v46 = vpop.eup %1569  ;;  %1575 = vpow2.f32 %v599_v4 }
 0x42c   :  { %v613_v6 = vsel %vm552_vm7, %v1570_v46, 0.0 }
 0x42d   :  { %v1572_v7 = vpop.eup %1571  ;;  %614 = vadd.xlane.f32.xlu0 %v613_v6 }
 0x42e   :  { %v616_v8 = vsel %vm552_vm7, %v1572_v7, 0.0 }
 0x42f   :  { %617 = vadd.xlane.f32.xlu1 %v616_v8 }
 0x433   :  { %v1574_v9 = vpop.eup %1573 }
 0x434   :  { %v619_v10 = vsel %vm552_vm7, %v1574_v9, 0.0 }
 0x435   :  { %v1576_v11 = vpop.eup %1575  ;;  %620 = vadd.xlane.f32.xlu0 %v619_v10 }
 0x436   :  { %v622_v12 = vsel %vm552_vm7, %v1576_v11, 0.0 }
 0x437   :  { %623 = vadd.xlane.f32.xlu1 %v622_v12 }
 0x443   :  { %v603_v14 = vpop.xlane.xlu0 %602 }
 0x445   :  { %v606_v13 = vpop.xlane.xlu1 %605 }
 0x446   :  { %1577 = vrcp.f32 %v606_v13 }
 0x448   :  { %738 = vrot.lane.b32.xlu1 %v1865_v49, %s1657_s3 }
 0x44b   :  { %646 = vrot.lane.b32.xlu0 %v1852_v36, %s1657_s3 }
 0x450   :  { %v1578_v19 = vpop.eup %1577 }
 0x451   :  { %v634_v36 = vmul.f32 %v1578_v19, %v1911_v40 }
 0x4b2   :  { %v609_v16 = vpop.xlane.xlu0 %608 }
 0x4b4   :  { %v612_v15 = vpop.xlane.xlu1 %611 }
 0x4b5   :  { %1579 = vrcp.f32 %v612_v15 }
 0x4b6   :  { %1581 = vrcp.f32 %v603_v14 }
 0x4b7   :  { %1583 = vrcp.f32 %v609_v16 }
 0x4ba   :  { %v615_v18 = vpop.xlane.xlu0 %614 }
 0x4bc   :  { %v618_v17 = vpop.xlane.xlu1 %617 }
 0x4bd   :  { %1585 = vrcp.f32 %v618_v17 }
 0x4be   :  { %1587 = vrcp.f32 %v615_v18 }
 0x4bf   :  { %v1580_v20 = vpop.eup %1579 }
 0x4c0   :  { %v1582_v22 = vpop.eup %1581  ;;  %v636_v24 = vmul.f32 %v1580_v20, %v1568_v60  ;;  %v1548_v60 = vld [vmem:[#allocation4 + $0x38] sm:$0xff]  }
 0x4c1   :  { %v1584_v49 = vpop.eup %1583  ;;  %v633_v26 = vmul.f32 %v1582_v22, %v1907_v38 }
 0x4c2   :  { %v621_v23 = vpop.xlane.xlu0 %620  ;;  %v635_v27 = vmul.f32 %v1584_v49, %v1566_v58 }
 0x4c3   :  { %1589 = vrcp.f32 %v621_v23  ;;  %v641_v29 = vpack.c.bf16 %v634_v36, %v633_v26  ;;  %v1549_v26 = vld [vmem:[%s2131_s8] sm:$0xff]  }
 0x4c4   :  { %v624_v25 = vpop.xlane.xlu1 %623  ;;  %v642_v30 = vpack.c.bf16 %v636_v24, %v635_v27  ;;  %v1550_v27 = vld [vmem:[%s2131_s8 + $0x8] sm:$0xff]  }
 0x4c5   :  { %1591 = vrcp.f32 %v624_v25 }
 0x4c6   :  { %v647_v28 = vpop.permute.xlu0 %646 }
 0x4c7   :  { %1406 = vmatpush3.bf16.msra.mxu0 %v647_v28  ;;  %1412 = vmatpush3.bf16.msra.mxu1 %v647_v28  ;;  %v1586_v31 = vpop.eup %1585 }
 0x4c8   :  { %1417 = vmatprep.subr.bf16.mxu0 %v1662_v43  ;;  %1423 = vmatprep.subr.bf16.mxu1 %v1662_v43  ;;  %v739_v32 = vpop.permute.xlu1 %738  ;;  %v1588_v33 = vpop.eup %1587  ;;  %v638_v34 = vmul.f32 %v1586_v31, %v1572_v7 }
 0x4c9   :  { %v637_v37 = vmul.f32 %v1588_v33, %v1570_v46 }
 0x4ca   :  { %1408 = vmatmul.mubr.msk.bf16.vlgmr.msra.gmra.mrb[4].mxu0 %vm552_vm7, %v641_v29  ;;  %1414 = vmatmul.mubr.msk.bf16.vlgmr.msra.gmra.mrb[16].mxu1 %vm552_vm7, %v642_v30 }
 0x4cb   :  { %1418 = vmatpush3.bf16.msra.mxu0 %v739_v32  ;;  %1424 = vmatpush3.bf16.msra.mxu1 %v739_v32  ;;  %v643_v41 = vpack.c.bf16 %v638_v34, %v637_v37  ;;  %v1553_v37 = vld [vmem:[%s2131_s8 + $0x20] sm:$0xff]  }
 0x4cc   :  { %1419 = vmatprep.mubr.msk.bf16.mxu0 %vm1663_vm0, %v1662_v43  ;;  %1425 = vmatprep.mubr.msk.bf16.mxu1 %vm1663_vm0, %v1662_v43 }
 0x4cd   :  { %v1590_v35 = vpop.eup %1589  ;;  %1429 = vmatprep.subr.bf16.mxu0 %v1662_v43  ;;  %1449 = vmatprep.subr.bf16.mxu1 %v1662_v43 }
 0x4ce   :  { %v639_v39 = vmul.f32 %v1590_v35, %v1574_v9 }
 0x4cf   :  { %v1592_v38 = vpop.eup %1591 }
 0x4d0   :  { %v640_v40 = vmul.f32 %v1592_v38, %v1576_v11  ;;  %v1554_v38 = vld [vmem:[%s2131_s8 + $0x28] sm:$0xff]  }
 0x4d2   :  { %1420 = vmatmul.mubr.msk.bf16.vlgmr.msra.gmra.mrb[8].mxu0 %vm552_vm7, %v643_v41  ;;  %v644_v42 = vpack.c.bf16 %v640_v40, %v639_v39  ;;  %v1555_v39 = vld [vmem:[%s2131_s8 + $0x30] sm:$0xff]   ;;  %v1556_v40 = vld [vmem:[%s2131_s8 + $0x38] sm:$0xff]  }
 0x4d3   :  { %1445 = vmatprep.mubr.msk.bf16.mxu0 %vm1663_vm0, %v1662_v43  ;;  %1430 = vmatpush3.bf16.msra.mxu0 %v1541_v44 }
 0x4d4   :  { %1426 = vmatmul.mubr.msk.bf16.vlgmr.msra.gmra.mrb[20].mxu1 %vm552_vm7, %v644_v42  ;;  %1431 = vmatprep.subr.bf16.mxu0 %v1662_v43 }
 0x4d5   :  { %1465 = vmatprep.mubr.msk.bf16.mxu1 %vm1663_vm0, %v1662_v43  ;;  %1450 = vmatpush3.bf16.msra.mxu1 %v1549_v26 }
 0x4d6   :  { %1451 = vmatprep.subr.bf16.mxu1 %v1662_v43 }
 0x4d7   :  { %1432 = vmatpush3.bf16.msra.mxu0 %v1542_v45 }
 0x4d8   :  { %1433 = vmatprep.subr.bf16.mxu0 %v1662_v43 }
 0x4d9   :  { %1452 = vmatpush3.bf16.msra.mxu1 %v1550_v27 }
 0x4da   :  { %1453 = vmatprep.subr.bf16.mxu1 %v1662_v43 }
 0x4db   :  { %1434 = vmatpush3.bf16.msra.mxu0 %v1543_v47 }
 0x4dc   :  { %1435 = vmatprep.subr.bf16.mxu0 %v1662_v43 }
 0x4df   :  { %1436 = vmatpush3.bf16.msra.mxu0 %v1544_v50 }
 0x4e0   :  { %1437 = vmatprep.subr.bf16.mxu0 %v1662_v43 }
 0x4e3   :  { %1438 = vmatpush3.bf16.msra.mxu0 %v1545_v51 }
 0x4e4   :  { %1439 = vmatprep.subr.bf16.mxu0 %v1662_v43 }
 0x4e7   :  { %1440 = vmatpush3.bf16.msra.mxu0 %v1546_v52  ;;  %v1338_v52 = vld [vmem:[%s2130_s7] ss:$0 sm:$0xff] }
 0x4e8   :  { %1441 = vmatprep.subr.bf16.mxu0 %v1662_v43 }
 0x4eb   :  { %1442 = vmatpush3.bf16.msra.mxu0 %v1547_v53 }
 0x4ec   :  { %1443 = vmatprep.subr.bf16.mxu0 %v1662_v43 }
 0x4ef   :  { %1444 = vmatpush3.bf16.msra.mxu0 %v1548_v60 }
 0x59d   :  { %v686_v54 = vpop.f32.mrb[4].mxu0  ;;  %v730_v55 = vpop.f32.mrb[16].mxu1 }
 0x59e   :  { %v1409_v56 = vpop.f32.mrb[5].mxu0  ;;  %v1415_v57 = vpop.f32.mrb[17].mxu1 }
 0x59f   :  { %v689_v58 = vpop.f32.mrb[6].mxu0  ;;  %v733_v59 = vpop.f32.mrb[18].mxu1 }
 0x5a0   :  { %v1502_v61 = vpack.i.bf16 %v733_v59, %v730_v55  ;;  %v1410_v62 = vpop.f32.mrb[7].mxu0  ;;  %v1416_v63 = vpop.f32.mrb[19].mxu1 }
 0x5a2   :  { %1503 = vrot.lane.b32.xlu1 %v1502_v61, %s1665_s5 }
 0x5a5   :  { %v778_v0 = vpop.f32.mrb[8].mxu0 }
 0x5a6   :  { %v1421_v1 = vpop.f32.mrb[9].mxu0 }
 0x5a7   :  { %v781_v2 = vpop.f32.mrb[10].mxu0  ;;  %v822_v4 = vpop.f32.mrb[20].mxu1 }
 0x5a8   :  { %v1507_v46 = vpack.i.bf16 %v781_v2, %v778_v0  ;;  %v1422_v6 = vpop.f32.mrb[11].mxu0  ;;  %v1427_v7 = vpop.f32.mrb[21].mxu1 }
 0x5a9   :  { %v825_v8 = vpop.f32.mrb[22].mxu1 }
 0x5aa   :  { %v1512_v9 = vpack.i.bf16 %v825_v8, %v822_v4  ;;  %1508 = vrot.lane.b32.xlu0 %v1507_v46, %s1657_s3  ;;  %v1428_v10 = vpop.f32.mrb[23].mxu1 }
 0x5ac   :  { %1513 = vrot.lane.b32.xlu1 %v1512_v9, %s1664_s4 }
 0x614   :  { %v1504_v11 = vpop.permute.xlu1 %1503 }
 0x615   :  { %v1506_v12 = vunpack.i.h.bf16 %v1504_v11  ;;  %v1505_v13 = vunpack.i.l.bf16 %v1504_v11 }
 0x617   :  { %v854_v17 = vsel %vm357_vm5, %v689_v58, %v1506_v12  ;;  %v853_v18 = vsel %vm357_vm5, %v686_v54, %v1505_v13 }
 0x61c   :  { %v1509_v14 = vpop.permute.xlu0 %1508 }
 0x61d   :  { %v1511_v15 = vunpack.i.h.bf16 %v1509_v14  ;;  %v1510_v16 = vunpack.i.l.bf16 %v1509_v14 }
 0x61e   :  { %v1514_v19 = vpop.permute.xlu1 %1513 }
 0x61f   :  { %v856_v20 = vsel %vm855_vm9, %v853_v18, %v1510_v16  ;;  %v857_v22 = vsel %vm855_vm9, %v854_v17, %v1511_v15  ;;  %v1516_v23 = vunpack.i.h.bf16 %v1514_v19  ;;  %v1515_v49 = vunpack.i.l.bf16 %v1514_v19 }
 0x621   :  { %v860_v36 = vsel %vm858_vm10, %v857_v22, %v1516_v23  ;;  %v859_v24 = vsel %vm858_vm10, %v856_v20, %v1515_v49 }
 0x622   :  { %v861_v25 = vpack.c.bf16 %v860_v36, %v859_v24 }
 0x624   :  { %1446 = vmatmul.mubr.bf16.vlgmr.msra.gmra.mrb[12].mxu0 %v861_v25 }
 0x6f7   :  { %v960_v28 = vpop.f32.mrb[12].mxu0 }
 0x6f8   :  { %v961_v29 = vadd.f32 %v960_v28, %v1766_v3  ;;  %v1447_v30 = vpop.f32.mrb[13].mxu0  ;;  %v1551_v3 = vld [vmem:[%s2131_s8 + $0x10] sm:$0xff]  }
 0x6f9   :  { %v963_v31 = vpop.f32.mrb[14].mxu0  ;;  %1454 = vmatpush3.bf16.msra.mxu1 %v1551_v3 }
 0x6fa   :  { %967 = vst [vmem:[%s2133_s10] sm:$0xff] %v961_v29  ;;  %v964_v32 = vadd.f32 %v963_v31, %v1771_v5  ;;  %v1448_v33 = vpop.f32.mrb[15].mxu0  ;;  %v969_v34 = vmul.f32 %v961_v29, %v961_v29  ;;  %1455 = vmatprep.subr.bf16.mxu1 %v1662_v43  ;;  %v1552_v5 = vld [vmem:[%s2131_s8 + $0x18] sm:$0xff]  }
 0x6fc   :  { %968 = vst [vmem:[%s2133_s10 + $0x8] sm:$0xff] %v964_v32  ;;  %971 = vadd.xlane.f32.xlu0 %v969_v34  ;;  %v970_v35 = vmul.f32 %v964_v32, %v964_v32 }
 0x6fd   :  { %1456 = vmatpush3.bf16.msra.mxu1 %v1552_v5 }
 0x6fe   :  { %973 = vadd.xlane.f32.xlu1 %v970_v35  ;;  %1457 = vmatprep.subr.bf16.mxu1 %v1662_v43 }
 0x701   :  { %1458 = vmatpush3.bf16.msra.mxu1 %v1553_v37 }
 0x702   :  { %1459 = vmatprep.subr.bf16.mxu1 %v1662_v43 }
 0x705   :  { %1460 = vmatpush3.bf16.msra.mxu1 %v1554_v38 }
 0x706   :  { %1461 = vmatprep.subr.bf16.mxu1 %v1662_v43 }
 0x709   :  { %1462 = vmatpush3.bf16.msra.mxu1 %v1555_v39 }
 0x70a   :  { %1463 = vmatprep.subr.bf16.mxu1 %v1662_v43 }
 0x70d   :  { %1464 = vmatpush3.bf16.msra.mxu1 %v1556_v40 }
 0x789   :  { %v972_v41 = vpop.xlane.xlu0 %971 }
 0x78a   :  { %v975_v42 = vmul.f32 0.0078125, %v972_v41 }
 0x78b   :  { %v974_v44 = vpop.xlane.xlu1 %973 }
 0x78c   :  { %v977_v45 = vadd.f32 1e-06, %v975_v42  ;;  %v976_v47 = vmul.f32 0.0078125, %v974_v44 }
 0x78e   :  { %1593 = vrsqrt.f32 %v977_v45  ;;  %v978_v50 = vadd.f32 1e-06, %v976_v47 }
 0x790   :  { %1595 = vrsqrt.f32 %v978_v50 }
 0x798   :  { %v1594_v51 = vpop.eup %1593 }
 0x799   :  { %v981_v53 = vmul.f32 %v1594_v51, %v961_v29 }
 0x79a   :  { %v1596_v54 = vpop.eup %1595 }
 0x79b   :  { %v982_v55 = vmul.f32 %v1596_v54, %v964_v32  ;;  %v990_v56 = vmul.f32 %v1338_v52, %v981_v53 }
 0x79d   :  { %v991_v57 = vmul.f32 %v1338_v52, %v982_v55  ;;  %992 = vst [vmem:[%s2132_s9] sm:$0xff] %v990_v56 }
 0x79f   :  { %993 = vst [vmem:[%s2132_s9 + $0x8] sm:$0xff] %v991_v57  ;;  %v994_v43 = vpack.c.bf16 %v991_v57, %v990_v56 }
 0x7a1   :  { %1466 = vmatmul.mubr.bf16.vlgmr.msra.gmra.mrb[24].mxu1 %v994_v43 }
 0x874   :  { %v1093_v58 = vpop.f32.mrb[24].mxu1 }
 0x875   :  { %v1467_v59 = vpop.f32.mrb[25].mxu1  ;;  %v1101_v60 = vsel %vm1100_vm11, %v1093_v58, -inf }
 0x876   :  { %1102 = vmax.xlane.f32.xlu0 %v1101_v60  ;;  %v1096_v61 = vpop.f32.mrb[26].mxu1 }
 0x877   :  { %v1468_v62 = vpop.f32.mrb[27].mxu1  ;;  %v1104_v63 = vsel %vm1100_vm11, %v1096_v61, -inf }
 0x87a   :  { %1105 = vmax.xlane.f32.xlu0 %v1104_v63 }
 0x903   :  { %v1103_v0 = vpop.xlane.xlu0 %1102 }
 0x904   :  { %v1107_v1 = vsub.f32 %v1093_v58, %v1103_v0 }
 0x906   :  { %v1109_v2 = vmul.f32 1.442695, %v1107_v1 }
 0x907   :  { %v1106_v4 = vpop.xlane.xlu0 %1105 }
 0x908   :  { %1597 = vpow2.f32 %v1109_v2  ;;  %v1108_v46 = vsub.f32 %v1096_v61, %v1106_v4 }
 0x90a   :  { %v1111_v6 = vmul.f32 1.442695, %v1108_v46 }
 0x90c   :  { %1599 = vpow2.f32 %v1111_v6 }
 0x912   :  { %v1598_v7 = vpop.eup %1597 }
 0x913   :  { %v1113_v8 = vsel %vm1100_vm11, %v1598_v7, 0.0 }
 0x914   :  { %1114 = vadd.xlane.f32.xlu1 %v1113_v8 }
 0x916   :  { %v1600_v9 = vpop.eup %1599 }
 0x917   :  { %v1116_v10 = vsel %vm1100_vm11, %v1600_v9, 0.0 }
 0x918   :  { %1117 = vadd.xlane.f32.xlu0 %v1116_v10 }
 0x9a1   :  { %v1115_v11 = vpop.xlane.xlu1 %1114 }
 0x9a2   :  { %1601 = vrcp.f32 %v1115_v11 }
 0x9a5   :  { %v1118_v12 = vpop.xlane.xlu0 %1117 }
 0x9a6   :  { %1603 = vrcp.f32 %v1118_v12 }
 0x9ac   :  { %v1602_v13 = vpop.eup %1601 }
 0x9ad   :  { %v1120_v14 = vmul.f32 %v1602_v13, %v1598_v7 }
 0x9af   :  { %v1123_v15 = vsel %vm1100_vm11, %v1120_v14, -inf }
 0x9b0   :  { %v1604_v16 = vpop.eup %1603  ;;  %1124 = vmax.xlane.f32.xlu1 %v1123_v15 }
 0x9b1   :  { %v1122_v17 = vmul.f32 %v1604_v16, %v1600_v9 }
 0x9b3   :  { %v1126_v18 = vsel %vm1100_vm11, %v1122_v17, -inf }
 0x9b4   :  { %1127 = vmax.xlane.f32.xlu0 %v1126_v18 }
 0xa3d   :  { %v2009_v19 = vpop.xlane.xlu1 %1124 }
 0xa3e   :  { %vm1129_vm12 = vcmp.ge.f32.partialorder %v1120_v14, %v2009_v19 }
 0xa3f   :  { %v1131_v20 = vsel %vm1129_vm12, %v1790_v48, 4 }
 0xa40   :  { %v1133_v22 = vsel %vm1100_vm11, %v1131_v20, 2147483647 }
 0xa41   :  { %v2014_v23 = vpop.xlane.xlu0 %1127  ;;  %v1135_v49 = vshra.s32 %v1133_v22, 16  ;;  %v1134_v28 = vand.u32 65535, %v1133_v22 }
 0xa42   :  { %vm1130_vm13 = vcmp.ge.f32.partialorder %v1122_v17, %v2014_v23 }
 0xa43   :  { %v1137_v36 = vcvt.s32.f32 %v1135_v49  ;;  %v1132_v24 = vsel %vm1130_vm13, %v1790_v48, 4  ;;  %v1136_v30 = vcvt.s32.f32 %v1134_v28 }
 0xa44   :  { %v1148_v25 = vsel %vm1100_vm11, %v1132_v24, 2147483647 }
 0xa45   :  { %1138 = vmin.xlane.f32.xlu1 %v1137_v36  ;;  %v1150_v26 = vshra.s32 %v1148_v25, 16  ;;  %v1149_v31 = vand.u32 65535, %v1148_v25 }
 0xa47   :  { %v1152_v27 = vcvt.s32.f32 %v1150_v26  ;;  %v1151_v34 = vcvt.s32.f32 %v1149_v31 }
 0xa49   :  { %1153 = vmin.xlane.f32.xlu0 %v1152_v27 }
 0xad2   :  { %v1139_v29 = vpop.xlane.xlu1 %1138 }
 0xad3   :  { %vm1140_vm14 = vcmp.eq.f32.partialorder %v1137_v36, %v1139_v29  ;;  %v1145_v3 = vcvt.f32.s32 %v1139_v29 }
 0xad4   :  { %v1141_v32 = vsel %vm1140_vm14, %v1136_v30, inf  ;;  %vm1267_vm14 = vcmask 7168  }
 0xad5   :  { %1142 = vmin.xlane.f32.xlu1 %v1141_v32  ;;  %v1146_v37 = vshll.u32 %v1145_v3, 16 }
 0xad6   :  { %v1154_v33 = vpop.xlane.xlu0 %1153 }
 0xad7   :  { %vm1155_vm15 = vcmp.eq.f32.partialorder %v1152_v27, %v1154_v33  ;;  %v1160_v39 = vcvt.f32.s32 %v1154_v33 }
 0xad8   :  { %v1156_v35 = vsel %vm1155_vm15, %v1151_v34, inf }
 0xad9   :  { %1157 = vmin.xlane.f32.xlu0 %v1156_v35  ;;  %v1161_v42 = vshll.u32 %v1160_v39, 16 }
 0xb62   :  { %v1143_v5 = vpop.xlane.xlu1 %1142 }
 0xb63   :  { %v1144_v38 = vcvt.f32.s32 %v1143_v5 }
 0xb65   :  { %v2019_v40 = vadd.s32 %v1146_v37, %v1144_v38 }
 0xb66   :  { %v1158_v41 = vpop.xlane.xlu0 %1157 }
 0xb67   :  { %v1159_v44 = vcvt.f32.s32 %v1158_v41  ;;  %vm1187_vm0 = vcmp.eq.s32.totalorder %v1790_v48, %v2019_v40  ;;  %vm1163_vm6 = vcmp.eq.s32.totalorder %v2019_v40, 0  ;;  %vm1169_vm7 = vcmp.eq.s32.totalorder %v2019_v40, 1 }
 0xb68   :  { %v1193_v45 = vsel %vm1187_vm0, -inf, %v1120_v14  ;;  %vm1175_vm8 = vcmp.eq.s32.totalorder %v2019_v40, 2  ;;  %vm1181_vm9 = vcmp.eq.s32.totalorder %v2019_v40, 3  ;;  %v1165_v11 = vsel %vm1163_vm6, %v2009_v19, 0.0 }
 0xb69   :  { %v2026_v47 = vadd.s32 %v1161_v42, %v1159_v44  ;;  %v1195_v50 = vsel %vm1100_vm11, %v1193_v45, -inf  ;;  %v1171_v12 = vsel %vm1169_vm7, %v2009_v19, 0.0  ;;  %v1177_v13 = vsel %vm1175_vm8, %v2009_v19, 0.0 }
 0xb6a   :  { %1196 = vmax.xlane.f32.xlu1 %v1195_v50  ;;  %v1183_v14 = vsel %vm1181_vm9, %v2009_v19, 0.0  ;;  %v1189_v15 = vsel %vm1187_vm0, 1, %v1659_v21 }
 0xb6b   :  { %vm1188_vm1 = vcmp.eq.s32.totalorder %v1790_v48, %v2026_v47  ;;  %vm1164_vm10 = vcmp.eq.s32.totalorder %v2026_v47, 0  ;;  %vm1170_vm12 = vcmp.eq.s32.totalorder %v2026_v47, 1  ;;  %vm1176_vm13 = vcmp.eq.s32.totalorder %v2026_v47, 2 }
 0xb6c   :  { %v1194_v51 = vsel %vm1188_vm1, -inf, %v1122_v17  ;;  %v1166_v30 = vsel %vm1164_vm10, %v2014_v23, 0.0  ;;  %v1191_v31 = vsel %vm1187_vm0, %v1189_v15, 0  ;;  %v1172_v33 = vsel %vm1170_vm12, %v2014_v23, 0.0 }
 0xb6d   :  { %v1198_v52 = vsel %vm1100_vm11, %v1194_v51, -inf  ;;  %v1178_v34 = vsel %vm1176_vm13, %v2014_v23, 0.0  ;;  %v1190_v3 = vsel %vm1188_vm1, 1, %v1659_v21 }
 0xb6e   :  { %1199 = vmax.xlane.f32.xlu0 %v1198_v52  ;;  %v1192_v44 = vsel %vm1188_vm1, %v1190_v3, 0  ;;  %vm1285_vm1 = vcmask 24576  }
 0xbf7   :  { %v1197_v53 = vpop.xlane.xlu1 %1196 }
 0xbf8   :  { %vm1201_vm2 = vcmp.ge.f32.partialorder %v1193_v45, %v1197_v53 }
 0xbf9   :  { %v1203_v54 = vsel %vm1201_vm2, %v1790_v48, 4 }
 0xbfa   :  { %v1205_v55 = vsel %vm1100_vm11, %v1203_v54, 2147483647 }
 0xbfb   :  { %v1207_v56 = vshra.s32 %v1205_v55, 16  ;;  %v2037_v57 = vpop.xlane.xlu0 %1199  ;;  %v1206_v62 = vand.u32 65535, %v1205_v55 }
 0xbfc   :  { %vm1202_vm3 = vcmp.ge.f32.partialorder %v1194_v51, %v2037_v57 }
 0xbfd   :  { %v1209_v43 = vcvt.s32.f32 %v1207_v56  ;;  %v1204_v58 = vsel %vm1202_vm3, %v1790_v48, 4  ;;  %v1208_v0 = vcvt.s32.f32 %v1206_v62 }
 0xbfe   :  { %v1220_v59 = vsel %vm1100_vm11, %v1204_v58, 2147483647 }
 0xbff   :  { %1210 = vmin.xlane.f32.xlu1 %v1209_v43  ;;  %v1222_v60 = vshra.s32 %v1220_v59, 16  ;;  %v1221_v2 = vand.u32 65535, %v1220_v59 }
 0xc01   :  { %v1224_v61 = vcvt.s32.f32 %v1222_v60  ;;  %v1223_v46 = vcvt.s32.f32 %v1221_v2 }
 0xc03   :  { %1225 = vmin.xlane.f32.xlu0 %v1224_v61 }
 0xc8c   :  { %v1211_v63 = vpop.xlane.xlu1 %1210 }
 0xc8d   :  { %vm1212_vm4 = vcmp.eq.f32.partialorder %v1209_v43, %v1211_v63  ;;  %v1217_v7 = vcvt.f32.s32 %v1211_v63 }
 0xc8e   :  { %v1213_v1 = vsel %vm1212_vm4, %v1208_v0, inf }
 0xc8f   :  { %1214 = vmin.xlane.f32.xlu1 %v1213_v1  ;;  %v1218_v9 = vshll.u32 %v1217_v7, 16 }
 0xc90   :  { %v1226_v4 = vpop.xlane.xlu0 %1225 }
 0xc91   :  { %vm1227_vm5 = vcmp.eq.f32.partialorder %v1224_v61, %v1226_v4  ;;  %v1232_v17 = vcvt.f32.s32 %v1226_v4 }
 0xc92   :  { %v1228_v6 = vsel %vm1227_vm5, %v1223_v46, inf  ;;  %vm1182_vm5 = vcmp.eq.s32.totalorder %v2026_v47, 3 }
 0xc93   :  { %1229 = vmin.xlane.f32.xlu0 %v1228_v6  ;;  %v1233_v27 = vshll.u32 %v1232_v17, 16  ;;  %v1184_v35 = vsel %vm1182_vm5, %v2014_v23, 0.0 }
 0xd1c   :  { %v1215_v8 = vpop.xlane.xlu1 %1214 }
 0xd1d   :  { %v1216_v10 = vcvt.f32.s32 %v1215_v8 }
 0xd1f   :  { %v1219_v16 = vadd.s32 %v1218_v9, %v1216_v10 }
 0xd20   :  { %v1230_v49 = vpop.xlane.xlu0 %1229 }
 0xd21   :  { %vm1235_vm15 = vcmp.eq.s32.totalorder %v1219_v16, 0  ;;  %vm1241_vm2 = vcmp.eq.s32.totalorder %v1219_v16, 1  ;;  %vm1247_vm3 = vcmp.eq.s32.totalorder %v1219_v16, 2  ;;  %vm1253_vm4 = vcmp.eq.s32.totalorder %v1219_v16, 3 }
 0xd22   :  { %v1237_v18 = vsel %vm1235_vm15, %v1197_v53, 0.0  ;;  %v1243_v19 = vsel %vm1241_vm2, %v1197_v53, 0.0  ;;  %v1249_v20 = vsel %vm1247_vm3, %v1197_v53, 0.0  ;;  %v1255_v22 = vsel %vm1253_vm4, %v1197_v53, 0.0 }
 0xd23   :  { %v1239_v36 = vadd.f32 %v1237_v18, %v1165_v11  ;;  %v1245_v24 = vadd.f32 %v1243_v19, %v1171_v12  ;;  %v1251_v25 = vadd.f32 %v1249_v20, %v1177_v13  ;;  %v1257_v26 = vadd.f32 %v1255_v22, %v1183_v14 }
 0xd24   :  { %vm1259_vm6 = vcmp.eq.s32.totalorder %v1790_v48, %v1219_v16  ;;  %v1231_v28 = vcvt.f32.s32 %v1230_v49 }
 0xd25   :  { %v1261_v29 = vsel %vm1259_vm6, 1, %v1659_v21  ;;  %1268 = vst.msk [vmem:[%s2134_s11] sm:$0xff] %vm1267_vm14, %v1239_v36  ;;  %1270 = vst.msk [vmem:[%s2134_s11 + $0x10] sm:$0xff] %vm1267_vm14, %v1245_v24 }
 0xd26   :  { %1272 = vst.msk [vmem:[%s2134_s11 + $0x20] sm:$0xff] %vm1267_vm14, %v1251_v25  ;;  %1274 = vst.msk [vmem:[%s2134_s11 + $0x30] sm:$0xff] %vm1267_vm14, %v1257_v26  ;;  %v1234_v32 = vadd.s32 %v1233_v27, %v1231_v28  ;;  %vm1263_vm7 = vcmp.gt.s32.totalorder %v1191_v31, %v1261_v29 }
 0xd27   :  { %v1264_v45 = vsel %vm1263_vm7, %v1191_v31, %v1261_v29 }
 0xd28   :  { %vm1236_vm8 = vcmp.eq.s32.totalorder %v1234_v32, 0  ;;  %vm1242_vm9 = vcmp.eq.s32.totalorder %v1234_v32, 1  ;;  %vm1248_vm0 = vcmp.eq.s32.totalorder %v1234_v32, 2  ;;  %vm1254_vm10 = vcmp.eq.s32.totalorder %v1234_v32, 3 }
 0xd29   :  { %v1238_v5 = vsel %vm1236_vm8, %v2037_v57, 0.0  ;;  %v1244_v37 = vsel %vm1242_vm9, %v2037_v57, 0.0  ;;  %v1250_v38 = vsel %vm1248_vm0, %v2037_v57, 0.0  ;;  %v1256_v23 = vsel %vm1254_vm10, %v2037_v57, 0.0 }
 0xd2a   :  { %v1240_v39 = vadd.f32 %v1238_v5, %v1166_v30  ;;  %v1246_v40 = vadd.f32 %v1244_v37, %v1172_v33  ;;  %v1252_v41 = vadd.f32 %v1250_v38, %v1178_v34  ;;  %v1258_v42 = vadd.f32 %v1256_v23, %v1184_v35 }
 0xd2b   :  { %vm1260_vm12 = vcmp.eq.s32.totalorder %v1790_v48, %v1234_v32  ;;  %v1276_v48 = vsel %vm1100_vm11, %v1264_v45, 0 }
 0xd2c   :  { %v1262_v50 = vsel %vm1260_vm12, 1, %v1659_v21  ;;  %1269 = vst.msk [vmem:[%s2134_s11 + $0x8] sm:$0xff] %vm1267_vm14, %v1240_v39  ;;  %1271 = vst.msk [vmem:[%s2134_s11 + $0x18] sm:$0xff] %vm1267_vm14, %v1246_v40 }
 0xd2d   :  { %1273 = vst.msk [vmem:[%s2134_s11 + $0x28] sm:$0xff] %vm1267_vm14, %v1252_v41  ;;  %vm1265_vm13 = vcmp.gt.s32.totalorder %v1192_v44, %v1262_v50  ;;  %1275 = vst.msk [vmem:[%s2134_s11 + $0x38] sm:$0xff] %vm1267_vm14, %v1258_v42 }
 0xd2e   :  { %v1266_v21 = vsel %vm1265_vm13, %v1192_v44, %v1262_v50 }
 0xd2f   :  { %v1277_v47 = vsel %vm1100_vm11, %v1266_v21, 0 }
 0xd30   :  { %v1278_v51 = vadd.s32 %v1277_v47, %v1276_v48 }
 0xd32   :  { %v1279_v52 = vrot.slane %v1278_v51, 4 }
 0xd34   :  { %v1280_v53 = vadd.s32 %v1279_v52, %v1278_v51 }
 0xd36   :  { %v1281_v54 = vrot.slane %v1280_v53, 2 }
 0xd38   :  { %v1282_v55 = vadd.s32 %v1281_v54, %v1280_v53 }
 0xd3a   :  { %v1283_v56 = vrot.slane %v1282_v55, 1 }
 0xd3c   :  { %v1284_v57 = vadd.s32 %v1283_v56, %v1282_v55 }
 0xd3e   :  { %1286 = vst.msk [vmem:[%s2135_s12] sm:$0x1] %vm1285_vm1, %v1284_v57 }
 0xd3f   :  { %1303 = vsyncpa [#allocation3], 1 }
 0xd40   :  { %1304 = vsyncpa [#allocation5], 1 }

// kernel: xverse_model_forward.7
= control target key start
LH: loop header
LB: loop body
LE: loop exit
PB: predicated region body
PF: predicated region fallthrough
CT: control target
= control target key end

     0   :  { %v1570_v21 = vmov 0   ;;  %s1572_s23 = smov 16   ;;  %v1573_v43 = vmov 0.0   ;;  %vm1574_vm0 = vmmov 0   ;;  %v207_v46 = vlaneseq  ;;  %s1577_s19 = smov 32   ;;  %s2091_s0 = inlined_call_operand.vmem [shape: f32[16,128], index: 0, kind: input, shape index: {}, may-alias: {0,9}]   ;;  %s2092_s1 = inlined_call_operand.vmem [shape: f32[16,128], index: 1, kind: input, shape index: {}, may-alias: {1,10}]   ;;  %s2093_s3 = inlined_call_operand.vmem [shape: bf16[128,256], index: 3, kind: input, shape index: {}]   ;;  %s2094_s2 = inlined_call_operand.vmem [shape: f32[1,128], index: 2, kind: input, shape index: {}]   ;;  %s2095_s5 = inlined_call_operand.vmem [shape: f32[16,256], index: 5, kind: input, shape index: {}]   ;;  %s2096_s4 = inlined_call_operand.vmem [shape: f32[16,256], index: 4, kind: input, shape index: {}]   ;;  %s2097_s6 = inlined_call_operand.vmem [shape: bf16[128,128], index: 6, kind: input, shape index: {}]   ;;  %s2098_s8 = inlined_call_operand.vmem [shape: bf16[128,4], index: 8, kind: input, shape index: {}]   ;;  %s2099_s10 = inlined_call_operand.vmem [shape: f32[16,128], index: 10, kind: output, shape index: {1}, may-alias: {1,10}]   ;;  %s2100_s7 = inlined_call_operand.vmem [shape: f32[1,128], index: 7, kind: input, shape index: {}]   ;;  %s2101_s9 = inlined_call_operand.vmem [shape: f32[16,128], index: 9, kind: output, shape index: {0}, may-alias: {0,9}]   ;;  %s2102_s11 = inlined_call_operand.vmem [shape: f32[4,16,1], index: 11, kind: output, shape index: {2}]   ;;  %s2103_s12 = inlined_call_operand.vmem [shape: s32[1,4], index: 12, kind: output, shape index: {3}]  }
   0x1   :  { %v37_v0 = vld [vmem:[%s2091_s0] sm:$0xff]  ;;  %v38_v2 = vld [vmem:[%s2091_s0 + $0x8] sm:$0xff]  ;;  %v1485_v9 = vld [vmem:[%s2093_s3 + $0x14] ss:$8 sps:$4 sm:$0xff]   ;;  %196 = vmatprep.mubr.bf16.mxu0 %v1570_v21  ;;  %1351 = vmatprep.subr.bf16.mxu1 %v1573_v43  ;;  %vm329_vm5 = vcmask 261120   ;;  %vm524_vm7 = vcmask 130048  }
   0x2   :  { %v39_v1 = vld [vmem:[%s2092_s1] sm:$0xff]  ;;  %v40_v4 = vld [vmem:[%s2092_s1 + $0x8] sm:$0xff]  ;;  %v1487_v10 = vld [vmem:[%s2093_s3 + $0x10] ss:$8 sps:$4 sm:$0xff]   ;;  %1353 = vmatprep.mubr.msk.bf16.mxu1 %vm1574_vm0, %v1573_v43  ;;  %v1732_v48 = vand.u32 127, %v207_v46  ;;  %vm827_vm9 = vcmask 523264  }
   0x3   :  { %v1652_v3 = vadd.f32 %v39_v1, %v37_v0  ;;  %v1657_v5 = vadd.f32 %v40_v4, %v38_v2  ;;  %v1482_v6 = vld [vmem:[%s2093_s3 + $0x4] ss:$8 sps:$4 sm:$0xff]   ;;  %v1484_v7 = vld [vmem:[%s2093_s3] ss:$8 sps:$4 sm:$0xff]   ;;  %v1491_v14 = vld [vmem:[%s2093_s3 + $0x34] ss:$8 sps:$4 sm:$0xff]  }
   0x4   :  { %164 = vmatprep.subr.bf16.mxu0 %v1482_v6  ;;  %v1488_v12 = vld [vmem:[%s2093_s3 + $0x24] ss:$8 sps:$4 sm:$0xff]   ;;  %v1490_v13 = vld [vmem:[%s2093_s3 + $0x20] ss:$8 sps:$4 sm:$0xff]   ;;  %v1493_v15 = vld [vmem:[%s2093_s3 + $0x30] ss:$8 sps:$4 sm:$0xff]  }
   0x5   :  { %v43_v8 = vmul.f32 %v1652_v3, %v1652_v3  ;;  %v44_v11 = vmul.f32 %v1657_v5, %v1657_v5  ;;  %165 = vmatpush1.bf16.msra.mxu0 %v1484_v7  ;;  %v1494_v16 = vld [vmem:[%s2093_s3 + $0x44] ss:$8 sps:$4 sm:$0xff]   ;;  %v1496_v17 = vld [vmem:[%s2093_s3 + $0x40] ss:$8 sps:$4 sm:$0xff]   ;;  %v1497_v18 = vld [vmem:[%s2093_s3 + $0x54] ss:$8 sps:$4 sm:$0xff]  }
   0x6   :  { %166 = vmatprep.subr.bf16.mxu0 %v1485_v9  ;;  %v1499_v19 = vld [vmem:[%s2093_s3 + $0x50] ss:$8 sps:$4 sm:$0xff]   ;;  %v1500_v20 = vld [vmem:[%s2093_s3 + $0x64] ss:$8 sps:$4 sm:$0xff]   ;;  %v1502_v22 = vld [vmem:[%s2093_s3 + $0x60] ss:$8 sps:$4 sm:$0xff]  }
   0x7   :  { %45 = vadd.xlane.f32.xlu0 %v43_v8  ;;  %v1503_v23 = vld [vmem:[%s2093_s3 + $0x74] ss:$8 sps:$4 sm:$0xff]   ;;  %v1505_v24 = vld [vmem:[%s2093_s3 + $0x70] ss:$8 sps:$4 sm:$0xff]   ;;  %v1275_v34 = vld [vmem:[%s2094_s2] ss:$0 sm:$0xff] }
   0x8   :  { %s1571_s3 = smov 112   ;;  %v209_v49 = vadd.s32 128, %v1732_v48  ;;  %vm244_vm1 = vcmp.lt.s32.totalorder %v1732_v48, 112  ;;  %v214_v52 = vand.u32 31, %v1732_v48  ;;  %vm261_vm2 = vcmp.lt.s32.totalorder %v1732_v48, 16  ;;  %v278_v2 = vld [vmem:[%s2095_s5] sm:$0xff] }
   0x9   :  { %167 = vmatpush1.bf16.msra.mxu0 %v1487_v10  ;;  %v279_v4 = vld [vmem:[%s2095_s5 + $0x8] sm:$0xff]  ;;  %v270_v8 = vld [vmem:[%s2096_s4] sm:$0xff]  ;;  %v272_v10 = vld [vmem:[%s2096_s4 + $0x10] sm:$0xff]  ;;  %vm830_vm10 = vcmask 785408   ;;  %vm1072_vm11 = vcmask 31744  }
   0xa   :  { %168 = vmatprep.subr.bf16.mxu0 %v1488_v12  ;;  %v221_v53 = vand.u32 31, %v209_v49  ;;  %vm1742_vm3 = vcmp.lt.s32.totalorder %v214_v52, 16  ;;  %v271_v9 = vld [vmem:[%s2096_s4 + $0x8] sm:$0xff] }
   0xb   :  { %47 = vadd.xlane.f32.xlu0 %v44_v11  ;;  %v273_v11 = vld [vmem:[%s2096_s4 + $0x18] sm:$0xff]  ;;  %s1575_s4 = smov 96  }
   0xc   :  { %vm1746_vm4 = vcmp.lt.s32.totalorder %v221_v53, 16 }
   0xd   :  { %169 = vmatpush1.bf16.msra.mxu0 %v1490_v13 }
   0xe   :  { %170 = vmatprep.subr.bf16.mxu0 %v1491_v14  ;;  %v280_v14 = vld [vmem:[%s2095_s5 + $0x10] sm:$0xff] }
  0x11   :  { %171 = vmatpush1.bf16.msra.mxu0 %v1493_v15  ;;  %v281_v15 = vld [vmem:[%s2095_s5 + $0x18] sm:$0xff]  ;;  %s1576_s5 = smov 64  }
  0x12   :  { %172 = vmatprep.subr.bf16.mxu0 %v1494_v16 }
  0x15   :  { %173 = vmatpush1.bf16.msra.mxu0 %v1496_v17 }
  0x16   :  { %174 = vmatprep.subr.bf16.mxu0 %v1497_v18 }
  0x19   :  { %175 = vmatpush1.bf16.msra.mxu0 %v1499_v19 }
  0x1a   :  { %176 = vmatprep.subr.bf16.mxu0 %v1500_v20 }
  0x1d   :  { %177 = vmatpush1.bf16.msra.mxu0 %v1502_v22 }
  0x1e   :  { %178 = vmatprep.subr.bf16.mxu0 %v1503_v23 }
  0x21   :  { %179 = vmatpush1.bf16.msra.mxu0 %v1505_v24 }
  0x22   :  { %1375 = vmatprep.subr.bf16.mxu0 %v1573_v43 }
  0x94   :  { %v46_v25 = vpop.xlane.xlu0 %45 }
  0x95   :  { %v50_v26 = vmul.f32 0.0078125, %v46_v25 }
  0x97   :  { %v52_v27 = vadd.f32 1e-06, %v50_v26 }
  0x98   :  { %v48_v28 = vpop.xlane.xlu0 %47 }
  0x99   :  { %1522 = vrsqrt.f32 %v52_v27  ;;  %v51_v29 = vmul.f32 0.0078125, %v48_v28 }
  0x9b   :  { %v53_v30 = vadd.f32 1e-06, %v51_v29 }
  0x9d   :  { %1524 = vrsqrt.f32 %v53_v30 }
  0xa3   :  { %v1523_v31 = vpop.eup %1522 }
  0xa4   :  { %v56_v32 = vmul.f32 %v1523_v31, %v1652_v3 }
  0xa6   :  { %v65_v36 = vmul.f32 %v1275_v34, %v56_v32 }
  0xa7   :  { %v1525_v33 = vpop.eup %1524 }
  0xa8   :  { %v57_v35 = vmul.f32 %v1525_v33, %v1657_v5 }
  0xaa   :  { %v66_v37 = vmul.f32 %v1275_v34, %v57_v35 }
  0xac   :  { %v67_v38 = vpack.c.bf16 %v66_v37, %v65_v36 }
  0xae   :  { %197 = vmatmul.mubr.bf16.vlgmr.msra.gmra.mrb[0].mxu0 %v67_v38 }
  0xaf   :  { %1377 = vmatprep.mubr.msk.bf16.mxu0 %vm1574_vm0, %v1573_v43 }
 0x181   :  { %v1717_v39 = vpop.f32.mrb[0].mxu0 }
 0x182   :  { %236 = vrot.lane.b32.xlu1 %v1717_v39, %s1571_s3  ;;  %v200_v40 = vpop.f32.mrb[1].mxu0  ;;  %v274_v22 = vmul.f32 %v270_v8, %v1717_v39 }
 0x183   :  { %240 = vrot.lane.b32.xlu0 %v200_v40, %s1571_s3  ;;  %v1720_v41 = vpop.f32.mrb[2].mxu0  ;;  %v275_v23 = vmul.f32 %v271_v9, %v200_v40 }
 0x184   :  { %v204_v42 = vpop.f32.mrb[3].mxu0  ;;  %v276_v26 = vmul.f32 %v272_v10, %v1720_v41 }
 0x185   :  { %v277_v27 = vmul.f32 %v273_v11, %v204_v42 }
 0x186   :  { %253 = vrot.lane.b32.xlu1 %v1717_v39, %s1572_s23 }
 0x18a   :  { %257 = vrot.lane.b32.xlu1 %v200_v40, %s1572_s23 }
 0x18e   :  { %238 = vrot.lane.b32.xlu1 %v1720_v41, %s1571_s3 }
 0x192   :  { %255 = vrot.lane.b32.xlu1 %v1720_v41, %s1572_s23 }
 0x196   :  { %242 = vrot.lane.b32.xlu1 %v204_v42, %s1571_s3 }
 0x19a   :  { %259 = vrot.lane.b32.xlu1 %v204_v42, %s1572_s23 }
 0x1f4   :  { %v237_v44 = vpop.permute.xlu1 %236 }
 0x1f5   :  { %v241_v51 = vpop.permute.xlu0 %240 }
 0x1f6   :  { %v245_v55 = vsel %vm244_vm1, %v237_v44, %v241_v51  ;;  %v247_v56 = vsel %vm244_vm1, %v241_v51, %v237_v44 }
 0x1f7   :  { %v249_v61 = vsub.f32 0.0, %v245_v55  ;;  %v250_v62 = vsub.f32 0.0, %v247_v56 }
 0x1f8   :  { %v254_v45 = vpop.permute.xlu1 %253 }
 0x1fc   :  { %v258_v47 = vpop.permute.xlu1 %257 }
 0x1fd   :  { %v262_v59 = vsel %vm261_vm2, %v254_v45, %v258_v47  ;;  %v264_v60 = vsel %vm261_vm2, %v258_v47, %v254_v45 }
 0x1fe   :  { %v266_v6 = vsel %vm1742_vm3, %v249_v61, %v264_v60  ;;  %v267_v7 = vsel %vm1746_vm4, %v250_v62, %v262_v59  ;;  %v319_v59 = vshrl.u32 %v207_v46, 7 }
 0x1ff   :  { %v282_v17 = vmul.f32 %v278_v2, %v266_v6  ;;  %v283_v18 = vmul.f32 %v279_v4, %v267_v7 }
 0x200   :  { %v239_v50 = vpop.permute.xlu1 %238  ;;  %v320_v60 = vadd.s32 8, %v319_v59  ;;  %vm321_vm6 = vcmp.le.s32.totalorder %v1732_v48, %v319_v59 }
 0x201   :  { %v286_v30 = vadd.f32 %v282_v17, %v274_v22  ;;  %v287_v32 = vadd.f32 %v283_v18, %v275_v23 }
 0x202   :  { %vm322_vm8 = vcmp.le.s32.totalorder %v1732_v48, %v320_v60 }
 0x204   :  { %v256_v54 = vpop.permute.xlu1 %255 }
 0x208   :  { %v243_v63 = vpop.permute.xlu1 %242 }
 0x209   :  { %v246_v0 = vsel %vm244_vm1, %v239_v50, %v243_v63  ;;  %v248_v1 = vsel %vm244_vm1, %v243_v63, %v239_v50 }
 0x20a   :  { %v251_v12 = vsub.f32 0.0, %v246_v0  ;;  %v252_v13 = vsub.f32 0.0, %v248_v1 }
 0x20c   :  { %v260_v16 = vpop.permute.xlu1 %259 }
 0x20d   :  { %v263_v19 = vsel %vm261_vm2, %v256_v54, %v260_v16  ;;  %v265_v20 = vsel %vm261_vm2, %v260_v16, %v256_v54 }
 0x20e   :  { %v268_v24 = vsel %vm1742_vm3, %v251_v12, %v265_v20  ;;  %v269_v25 = vsel %vm1746_vm4, %v252_v13, %v263_v19 }
 0x20f   :  { %v284_v28 = vmul.f32 %v280_v14, %v268_v24  ;;  %v285_v29 = vmul.f32 %v281_v15, %v269_v25 }
 0x211   :  { %v288_v31 = vadd.f32 %v284_v28, %v276_v26  ;;  %v289_v33 = vadd.f32 %v285_v29, %v277_v27 }
 0x213   :  { %v1447_v34 = vpack.i.bf16 %v288_v31, %v286_v30  ;;  %v1452_v35 = vpack.i.bf16 %v289_v33, %v287_v32  ;;  %v1796_v36 = vpack.c.bf16 %v289_v33, %v287_v32  ;;  %v323_v37 = vpack.c.bf16 %v288_v31, %v286_v30 }
 0x215   :  { %1448 = vrot.lane.b32.xlu1 %v1447_v34, %s1575_s4  ;;  %1453 = vrot.lane.b32.xlu0 %v1452_v35, %s1575_s4  ;;  %v334_v38 = vsel %vm329_vm5, %v1796_v36, 0 }
 0x216   :  { %1352 = vmatpush3.bf16.xpose.msra.mxu1 %v334_v38 }
 0x217   :  { %1357 = vmatprep.subr.bf16.mxu1 %v1573_v43 }
 0x219   :  { %1458 = vrot.lane.b32.xlu1 %v1447_v34, %s1576_s5  ;;  %1463 = vrot.lane.b32.xlu0 %v1447_v34, %s1577_s19 }
 0x21d   :  { %1354 = vmatmul.mubr.msk.bf16.vlgmr.msra.gmra.mrb[0].mxu1 %vm329_vm5, %v323_v37 }
 0x21e   :  { %1358 = vmatpush3.bf16.xpose.msra.mxu1 %v334_v38  ;;  %1359 = vmatprep.mubr.msk.bf16.mxu1 %vm1574_vm0, %v1573_v43 }
 0x21f   :  { %1363 = vmatprep.subr.bf16.mxu1 %v1573_v43 }
 0x287   :  { %v1449_v39 = vpop.permute.xlu1 %1448  ;;  %v1454_v40 = vpop.permute.xlu0 %1453 }
 0x288   :  { %v1451_v41 = vunpack.i.h.bf16 %v1449_v39  ;;  %v1450_v42 = vunpack.i.l.bf16 %v1449_v39  ;;  %v1456_v44 = vunpack.i.h.bf16 %v1454_v40  ;;  %v1455_v45 = vunpack.i.l.bf16 %v1454_v40 }
 0x28a   :  { %v324_v47 = vpack.c.bf16 %v1451_v41, %v1450_v42  ;;  %v1809_v49 = vpack.c.bf16 %v1456_v44, %v1455_v45 }
 0x28b   :  { %v1459_v50 = vpop.permute.xlu1 %1458  ;;  %v1464_v55 = vpop.permute.xlu0 %1463 }
 0x28c   :  { %1360 = vmatmul.mubr.msk.bf16.vlgmr.msra.gmra.mrb[4].mxu1 %vm329_vm5, %v324_v47  ;;  %v425_v51 = vsel %vm329_vm5, %v1809_v49, 0  ;;  %v1461_v52 = vunpack.i.h.bf16 %v1459_v50  ;;  %v1460_v53 = vunpack.i.l.bf16 %v1459_v50  ;;  %v1466_v56 = vunpack.i.h.bf16 %v1464_v55 }
 0x28d   :  { %1365 = vmatprep.mubr.msk.bf16.mxu1 %vm1574_vm0, %v1573_v43  ;;  %1364 = vmatpush3.bf16.xpose.msra.mxu1 %v425_v51  ;;  %v1465_v57 = vunpack.i.l.bf16 %v1464_v55 }
 0x28e   :  { %1369 = vmatprep.subr.bf16.mxu1 %v1573_v43  ;;  %v325_v54 = vpack.c.bf16 %v1461_v52, %v1460_v53 }
 0x28f   :  { %v326_v58 = vpack.c.bf16 %v1466_v56, %v1465_v57 }
 0x294   :  { %1366 = vmatmul.mubr.msk.bf16.vlgmr.msra.gmra.mrb[8].mxu1 %vm329_vm5, %v325_v54 }
 0x295   :  { %1370 = vmatpush3.bf16.xpose.msra.mxu1 %v425_v51  ;;  %1371 = vmatprep.mubr.msk.bf16.mxu1 %vm1574_vm0, %v1573_v43 }
 0x296   :  { %1381 = vmatprep.subr.bf16.mxu1 %v1573_v43 }
 0x29c   :  { %1372 = vmatmul.mubr.msk.bf16.vlgmr.msra.gmra.mrb[12].mxu1 %vm329_vm5, %v326_v58 }
 0x29d   :  { %1383 = vmatprep.mubr.msk.bf16.mxu1 %vm1574_vm0, %v1573_v43 }
 0x2f0   :  { %v370_v61 = vpop.f32.mrb[0].mxu1 }
 0x2f1   :  { %v516_v62 = vsel %vm321_vm6, %v370_v61, -1e+30  ;;  %v1355_v63 = vpop.f32.mrb[1].mxu1 }
 0x2f2   :  { %v373_v0 = vpop.f32.mrb[2].mxu1  ;;  %v525_v1 = vsel %vm524_vm7, %v516_v62, -inf }
 0x2f3   :  { %v517_v2 = vsel %vm322_vm8, %v373_v0, -1e+30  ;;  %526 = vmax.xlane.f32.xlu1 %v525_v1  ;;  %v1356_v4 = vpop.f32.mrb[3].mxu1 }
 0x2f4   :  { %v528_v46 = vsel %vm524_vm7, %v517_v2, -inf }
 0x2f5   :  { %529 = vmax.xlane.f32.xlu0 %v528_v46 }
 0x35f   :  { %v414_v6 = vpop.f32.mrb[4].mxu1 }
 0x360   :  { %v518_v7 = vsel %vm321_vm6, %v414_v6, -1e+30  ;;  %v1361_v8 = vpop.f32.mrb[5].mxu1 }
 0x361   :  { %v417_v9 = vpop.f32.mrb[6].mxu1  ;;  %v531_v10 = vsel %vm524_vm7, %v518_v7, -inf }
 0x362   :  { %v519_v11 = vsel %vm322_vm8, %v417_v9, -1e+30  ;;  %532 = vmax.xlane.f32.xlu0 %v531_v10  ;;  %v1362_v12 = vpop.f32.mrb[7].mxu1 }
 0x363   :  { %v534_v13 = vsel %vm524_vm7, %v519_v11, -inf }
 0x364   :  { %535 = vmax.xlane.f32.xlu1 %v534_v13 }
 0x367   :  { %v461_v14 = vpop.f32.mrb[8].mxu1 }
 0x368   :  { %v520_v15 = vsel %vm321_vm6, %v461_v14, -1e+30  ;;  %v1367_v16 = vpop.f32.mrb[9].mxu1 }
 0x369   :  { %v464_v17 = vpop.f32.mrb[10].mxu1  ;;  %v537_v18 = vsel %vm524_vm7, %v520_v15, -inf }
 0x36a   :  { %v521_v19 = vsel %vm322_vm8, %v464_v17, -1e+30  ;;  %538 = vmax.xlane.f32.xlu0 %v537_v18  ;;  %v1368_v20 = vpop.f32.mrb[11].mxu1 }
 0x36b   :  { %v540_v22 = vsel %vm524_vm7, %v521_v19, -inf }
 0x36c   :  { %541 = vmax.xlane.f32.xlu1 %v540_v22 }
 0x36f   :  { %v505_v23 = vpop.f32.mrb[12].mxu1 }
 0x370   :  { %v522_v24 = vsel %vm321_vm6, %v505_v23, -1e+30  ;;  %v1373_v25 = vpop.f32.mrb[13].mxu1 }
 0x371   :  { %v508_v26 = vpop.f32.mrb[14].mxu1  ;;  %v543_v27 = vsel %vm524_vm7, %v522_v24, -inf }
 0x372   :  { %v523_v28 = vsel %vm322_vm8, %v508_v26, -1e+30  ;;  %544 = vmax.xlane.f32.xlu0 %v543_v27  ;;  %v1374_v29 = vpop.f32.mrb[15].mxu1 }
 0x373   :  { %v546_v30 = vsel %vm524_vm7, %v523_v28, -inf }
 0x374   :  { %547 = vmax.xlane.f32.xlu1 %v546_v30 }
 0x380   :  { %v527_v31 = vpop.xlane.xlu1 %526 }
 0x381   :  { %v549_v32 = vsub.f32 %v516_v62, %v527_v31 }
 0x382   :  { %v530_v33 = vpop.xlane.xlu0 %529 }
 0x383   :  { %v557_v34 = vmul.f32 1.442695, %v549_v32  ;;  %v550_v35 = vsub.f32 %v517_v2, %v530_v33 }
 0x385   :  { %1526 = vpow2.f32 %v557_v34  ;;  %v559_v37 = vmul.f32 1.442695, %v550_v35 }
 0x387   :  { %1528 = vpow2.f32 %v559_v37 }
 0x38f   :  { %v1851_v38 = vpop.eup %1526 }
 0x390   :  { %v573_v39 = vsel %vm524_vm7, %v1851_v38, 0.0 }
 0x391   :  { %v1855_v40 = vpop.eup %1528  ;;  %574 = vadd.xlane.f32.xlu0 %v573_v39 }
 0x392   :  { %v576_v41 = vsel %vm524_vm7, %v1855_v40, 0.0 }
 0x393   :  { %577 = vadd.xlane.f32.xlu1 %v576_v41 }
 0x3ef   :  { %v533_v42 = vpop.xlane.xlu0 %532 }
 0x3f0   :  { %v551_v44 = vsub.f32 %v518_v7, %v533_v42 }
 0x3f1   :  { %v536_v45 = vpop.xlane.xlu1 %535 }
 0x3f2   :  { %v561_v47 = vmul.f32 1.442695, %v551_v44  ;;  %v552_v50 = vsub.f32 %v519_v11, %v536_v45  ;;  %v1506_v44 = vld [vmem:[%s2097_s6] sm:$0xff]   ;;  %v1507_v45 = vld [vmem:[%s2097_s6 + $0x8] sm:$0xff]  }
 0x3f4   :  { %1530 = vpow2.f32 %v561_v47  ;;  %v563_v51 = vmul.f32 1.442695, %v552_v50  ;;  %v1508_v47 = vld [vmem:[%s2097_s6 + $0x10] sm:$0xff]   ;;  %v1509_v50 = vld [vmem:[%s2097_s6 + $0x18] sm:$0xff]  }
 0x3f6   :  { %1532 = vpow2.f32 %v563_v51  ;;  %v1510_v51 = vld [vmem:[%s2097_s6 + $0x20] sm:$0xff]  }
 0x3f7   :  { %v539_v52 = vpop.xlane.xlu0 %538 }
 0x3f8   :  { %v553_v53 = vsub.f32 %v520_v15, %v539_v52  ;;  %v1511_v52 = vld [vmem:[%s2097_s6 + $0x28] sm:$0xff]  }
 0x3f9   :  { %v542_v54 = vpop.xlane.xlu1 %541 }
 0x3fa   :  { %v565_v55 = vmul.f32 1.442695, %v553_v53  ;;  %v554_v56 = vsub.f32 %v521_v19, %v542_v54  ;;  %v1512_v53 = vld [vmem:[%s2097_s6 + $0x30] sm:$0xff]  }
 0x3fc   :  { %1534 = vpow2.f32 %v565_v55  ;;  %v567_v57 = vmul.f32 1.442695, %v554_v56 }
 0x3fe   :  { %v1531_v58 = vpop.eup %1530  ;;  %1536 = vpow2.f32 %v567_v57 }
 0x3ff   :  { %v579_v59 = vsel %vm524_vm7, %v1531_v58, 0.0  ;;  %v545_v61 = vpop.xlane.xlu0 %544 }
 0x400   :  { %v1533_v60 = vpop.eup %1532  ;;  %580 = vadd.xlane.f32.xlu0 %v579_v59  ;;  %v555_v62 = vsub.f32 %v522_v24, %v545_v61 }
 0x401   :  { %v582_v63 = vsel %vm524_vm7, %v1533_v60, 0.0  ;;  %v548_v0 = vpop.xlane.xlu1 %547 }
 0x402   :  { %583 = vadd.xlane.f32.xlu1 %v582_v63  ;;  %v569_v1 = vmul.f32 1.442695, %v555_v62  ;;  %v556_v2 = vsub.f32 %v523_v28, %v548_v0 }
 0x404   :  { %1538 = vpow2.f32 %v569_v1  ;;  %v571_v4 = vmul.f32 1.442695, %v556_v2 }
 0x406   :  { %v1535_v46 = vpop.eup %1534  ;;  %1540 = vpow2.f32 %v571_v4 }
 0x407   :  { %v585_v6 = vsel %vm524_vm7, %v1535_v46, 0.0 }
 0x408   :  { %v1537_v7 = vpop.eup %1536  ;;  %586 = vadd.xlane.f32.xlu0 %v585_v6 }
 0x409   :  { %v588_v8 = vsel %vm524_vm7, %v1537_v7, 0.0 }
 0x40a   :  { %589 = vadd.xlane.f32.xlu1 %v588_v8 }
 0x40e   :  { %v1539_v9 = vpop.eup %1538 }
 0x40f   :  { %v591_v10 = vsel %vm524_vm7, %v1539_v9, 0.0 }
 0x410   :  { %v1541_v11 = vpop.eup %1540  ;;  %592 = vadd.xlane.f32.xlu0 %v591_v10 }
 0x411   :  { %v594_v12 = vsel %vm524_vm7, %v1541_v11, 0.0 }
 0x412   :  { %595 = vadd.xlane.f32.xlu1 %v594_v12 }
 0x41e   :  { %v575_v14 = vpop.xlane.xlu0 %574 }
 0x420   :  { %v578_v13 = vpop.xlane.xlu1 %577 }
 0x421   :  { %1542 = vrcp.f32 %v578_v13 }
 0x423   :  { %710 = vrot.lane.b32.xlu1 %v1809_v49, %s1576_s5 }
 0x426   :  { %618 = vrot.lane.b32.xlu0 %v1796_v36, %s1576_s5 }
 0x42b   :  { %v1543_v19 = vpop.eup %1542 }
 0x42c   :  { %v606_v36 = vmul.f32 %v1543_v19, %v1855_v40 }
 0x48d   :  { %v581_v16 = vpop.xlane.xlu0 %580 }
 0x48f   :  { %v584_v15 = vpop.xlane.xlu1 %583 }
 0x490   :  { %1544 = vrcp.f32 %v584_v15 }
 0x491   :  { %1546 = vrcp.f32 %v575_v14 }
 0x492   :  { %1548 = vrcp.f32 %v581_v16 }
 0x495   :  { %v587_v18 = vpop.xlane.xlu0 %586 }
 0x497   :  { %v590_v17 = vpop.xlane.xlu1 %589 }
 0x498   :  { %1550 = vrcp.f32 %v590_v17 }
 0x499   :  { %1552 = vrcp.f32 %v587_v18 }
 0x49a   :  { %v1545_v20 = vpop.eup %1544 }
 0x49b   :  { %v1547_v22 = vpop.eup %1546  ;;  %v608_v24 = vmul.f32 %v1545_v20, %v1533_v60  ;;  %v1513_v60 = vld [vmem:[%s2097_s6 + $0x38] sm:$0xff]  }
 0x49c   :  { %v1549_v49 = vpop.eup %1548  ;;  %v605_v26 = vmul.f32 %v1547_v22, %v1851_v38 }
 0x49d   :  { %v593_v23 = vpop.xlane.xlu0 %592  ;;  %v607_v27 = vmul.f32 %v1549_v49, %v1531_v58 }
 0x49e   :  { %1554 = vrcp.f32 %v593_v23  ;;  %v613_v29 = vpack.c.bf16 %v606_v36, %v605_v26  ;;  %v1514_v26 = vld [vmem:[%s2098_s8] sm:$0xff]  }
 0x49f   :  { %v596_v25 = vpop.xlane.xlu1 %595  ;;  %v614_v30 = vpack.c.bf16 %v608_v24, %v607_v27  ;;  %v1515_v27 = vld [vmem:[%s2098_s8 + $0x8] sm:$0xff]  }
 0x4a0   :  { %1556 = vrcp.f32 %v596_v25 }
 0x4a1   :  { %v619_v28 = vpop.permute.xlu0 %618 }
 0x4a2   :  { %1376 = vmatpush3.bf16.msra.mxu0 %v619_v28  ;;  %1382 = vmatpush3.bf16.msra.mxu1 %v619_v28  ;;  %v1551_v31 = vpop.eup %1550 }
 0x4a3   :  { %1387 = vmatprep.subr.bf16.mxu0 %v1573_v43  ;;  %1393 = vmatprep.subr.bf16.mxu1 %v1573_v43  ;;  %v711_v32 = vpop.permute.xlu1 %710  ;;  %v1553_v33 = vpop.eup %1552  ;;  %v610_v34 = vmul.f32 %v1551_v31, %v1537_v7 }
 0x4a4   :  { %v609_v37 = vmul.f32 %v1553_v33, %v1535_v46 }
 0x4a5   :  { %1378 = vmatmul.mubr.msk.bf16.vlgmr.msra.gmra.mrb[4].mxu0 %vm524_vm7, %v613_v29  ;;  %1384 = vmatmul.mubr.msk.bf16.vlgmr.msra.gmra.mrb[16].mxu1 %vm524_vm7, %v614_v30 }
 0x4a6   :  { %1388 = vmatpush3.bf16.msra.mxu0 %v711_v32  ;;  %1394 = vmatpush3.bf16.msra.mxu1 %v711_v32  ;;  %v615_v41 = vpack.c.bf16 %v610_v34, %v609_v37  ;;  %v1518_v37 = vld [vmem:[%s2098_s8 + $0x20] sm:$0xff]  }
 0x4a7   :  { %1389 = vmatprep.mubr.msk.bf16.mxu0 %vm1574_vm0, %v1573_v43  ;;  %1395 = vmatprep.mubr.msk.bf16.mxu1 %vm1574_vm0, %v1573_v43 }
 0x4a8   :  { %v1555_v35 = vpop.eup %1554  ;;  %1399 = vmatprep.subr.bf16.mxu0 %v1573_v43  ;;  %1419 = vmatprep.subr.bf16.mxu1 %v1573_v43 }
 0x4a9   :  { %v611_v39 = vmul.f32 %v1555_v35, %v1539_v9 }
 0x4aa   :  { %v1557_v38 = vpop.eup %1556 }
 0x4ab   :  { %v612_v40 = vmul.f32 %v1557_v38, %v1541_v11  ;;  %v1519_v38 = vld [vmem:[%s2098_s8 + $0x28] sm:$0xff]  }
 0x4ad   :  { %1390 = vmatmul.mubr.msk.bf16.vlgmr.msra.gmra.mrb[8].mxu0 %vm524_vm7, %v615_v41  ;;  %v616_v42 = vpack.c.bf16 %v612_v40, %v611_v39  ;;  %v1520_v39 = vld [vmem:[%s2098_s8 + $0x30] sm:$0xff]   ;;  %v1521_v40 = vld [vmem:[%s2098_s8 + $0x38] sm:$0xff]  }
 0x4ae   :  { %1415 = vmatprep.mubr.msk.bf16.mxu0 %vm1574_vm0, %v1573_v43  ;;  %1400 = vmatpush3.bf16.msra.mxu0 %v1506_v44 }
 0x4af   :  { %1396 = vmatmul.mubr.msk.bf16.vlgmr.msra.gmra.mrb[20].mxu1 %vm524_vm7, %v616_v42  ;;  %1401 = vmatprep.subr.bf16.mxu0 %v1573_v43 }
 0x4b0   :  { %1435 = vmatprep.mubr.msk.bf16.mxu1 %vm1574_vm0, %v1573_v43  ;;  %1420 = vmatpush3.bf16.msra.mxu1 %v1514_v26 }
 0x4b1   :  { %1421 = vmatprep.subr.bf16.mxu1 %v1573_v43 }
 0x4b2   :  { %1402 = vmatpush3.bf16.msra.mxu0 %v1507_v45 }
 0x4b3   :  { %1403 = vmatprep.subr.bf16.mxu0 %v1573_v43 }
 0x4b4   :  { %1422 = vmatpush3.bf16.msra.mxu1 %v1515_v27 }
 0x4b5   :  { %1423 = vmatprep.subr.bf16.mxu1 %v1573_v43 }
 0x4b6   :  { %1404 = vmatpush3.bf16.msra.mxu0 %v1508_v47 }
 0x4b7   :  { %1405 = vmatprep.subr.bf16.mxu0 %v1573_v43 }
 0x4ba   :  { %1406 = vmatpush3.bf16.msra.mxu0 %v1509_v50 }
 0x4bb   :  { %1407 = vmatprep.subr.bf16.mxu0 %v1573_v43 }
 0x4be   :  { %1408 = vmatpush3.bf16.msra.mxu0 %v1510_v51 }
 0x4bf   :  { %1409 = vmatprep.subr.bf16.mxu0 %v1573_v43 }
 0x4c2   :  { %1410 = vmatpush3.bf16.msra.mxu0 %v1511_v52  ;;  %v1308_v52 = vld [vmem:[%s2100_s7] ss:$0 sm:$0xff] }
 0x4c3   :  { %1411 = vmatprep.subr.bf16.mxu0 %v1573_v43 }
 0x4c6   :  { %1412 = vmatpush3.bf16.msra.mxu0 %v1512_v53 }
 0x4c7   :  { %1413 = vmatprep.subr.bf16.mxu0 %v1573_v43 }
 0x4ca   :  { %1414 = vmatpush3.bf16.msra.mxu0 %v1513_v60 }
 0x578   :  { %v658_v54 = vpop.f32.mrb[4].mxu0  ;;  %v702_v55 = vpop.f32.mrb[16].mxu1 }
 0x579   :  { %v1379_v56 = vpop.f32.mrb[5].mxu0  ;;  %v1385_v57 = vpop.f32.mrb[17].mxu1 }
 0x57a   :  { %v661_v58 = vpop.f32.mrb[6].mxu0  ;;  %v705_v59 = vpop.f32.mrb[18].mxu1 }
 0x57b   :  { %v1467_v61 = vpack.i.bf16 %v705_v59, %v702_v55  ;;  %v1380_v62 = vpop.f32.mrb[7].mxu0  ;;  %v1386_v63 = vpop.f32.mrb[19].mxu1 }
 0x57d   :  { %1468 = vrot.lane.b32.xlu1 %v1467_v61, %s1577_s19 }
 0x580   :  { %v750_v0 = vpop.f32.mrb[8].mxu0 }
 0x581   :  { %v1391_v1 = vpop.f32.mrb[9].mxu0 }
 0x582   :  { %v753_v2 = vpop.f32.mrb[10].mxu0  ;;  %v794_v4 = vpop.f32.mrb[20].mxu1 }
 0x583   :  { %v1472_v46 = vpack.i.bf16 %v753_v2, %v750_v0  ;;  %v1392_v6 = vpop.f32.mrb[11].mxu0  ;;  %v1397_v7 = vpop.f32.mrb[21].mxu1 }
 0x584   :  { %v797_v8 = vpop.f32.mrb[22].mxu1 }
 0x585   :  { %v1477_v9 = vpack.i.bf16 %v797_v8, %v794_v4  ;;  %1473 = vrot.lane.b32.xlu0 %v1472_v46, %s1576_s5  ;;  %v1398_v10 = vpop.f32.mrb[23].mxu1 }
 0x587   :  { %1478 = vrot.lane.b32.xlu1 %v1477_v9, %s1575_s4 }
 0x5ef   :  { %v1469_v11 = vpop.permute.xlu1 %1468 }
 0x5f0   :  { %v1471_v12 = vunpack.i.h.bf16 %v1469_v11  ;;  %v1470_v13 = vunpack.i.l.bf16 %v1469_v11 }
 0x5f2   :  { %v826_v17 = vsel %vm329_vm5, %v661_v58, %v1471_v12  ;;  %v825_v18 = vsel %vm329_vm5, %v658_v54, %v1470_v13 }
 0x5f7   :  { %v1474_v14 = vpop.permute.xlu0 %1473 }
 0x5f8   :  { %v1476_v15 = vunpack.i.h.bf16 %v1474_v14  ;;  %v1475_v16 = vunpack.i.l.bf16 %v1474_v14 }
 0x5f9   :  { %v1479_v19 = vpop.permute.xlu1 %1478 }
 0x5fa   :  { %v828_v20 = vsel %vm827_vm9, %v825_v18, %v1475_v16  ;;  %v829_v22 = vsel %vm827_vm9, %v826_v17, %v1476_v15  ;;  %v1481_v23 = vunpack.i.h.bf16 %v1479_v19  ;;  %v1480_v49 = vunpack.i.l.bf16 %v1479_v19 }
 0x5fc   :  { %v832_v36 = vsel %vm830_vm10, %v829_v22, %v1481_v23  ;;  %v831_v24 = vsel %vm830_vm10, %v828_v20, %v1480_v49 }
 0x5fd   :  { %v833_v25 = vpack.c.bf16 %v832_v36, %v831_v24 }
 0x5ff   :  { %1416 = vmatmul.mubr.bf16.vlgmr.msra.gmra.mrb[12].mxu0 %v833_v25 }
 0x6d2   :  { %v932_v28 = vpop.f32.mrb[12].mxu0 }
 0x6d3   :  { %v933_v29 = vadd.f32 %v932_v28, %v1652_v3  ;;  %v1417_v30 = vpop.f32.mrb[13].mxu0  ;;  %v1516_v3 = vld [vmem:[%s2098_s8 + $0x10] sm:$0xff]  }
 0x6d4   :  { %v935_v31 = vpop.f32.mrb[14].mxu0  ;;  %1424 = vmatpush3.bf16.msra.mxu1 %v1516_v3 }
 0x6d5   :  { %939 = vst [vmem:[%s2099_s10] sm:$0xff] %v933_v29  ;;  %v936_v32 = vadd.f32 %v935_v31, %v1657_v5  ;;  %v1418_v33 = vpop.f32.mrb[15].mxu0  ;;  %v941_v34 = vmul.f32 %v933_v29, %v933_v29  ;;  %1425 = vmatprep.subr.bf16.mxu1 %v1573_v43  ;;  %v1517_v5 = vld [vmem:[%s2098_s8 + $0x18] sm:$0xff]  }
 0x6d7   :  { %940 = vst [vmem:[%s2099_s10 + $0x8] sm:$0xff] %v936_v32  ;;  %943 = vadd.xlane.f32.xlu0 %v941_v34  ;;  %v942_v35 = vmul.f32 %v936_v32, %v936_v32 }
 0x6d8   :  { %1426 = vmatpush3.bf16.msra.mxu1 %v1517_v5 }
 0x6d9   :  { %945 = vadd.xlane.f32.xlu1 %v942_v35  ;;  %1427 = vmatprep.subr.bf16.mxu1 %v1573_v43 }
 0x6dc   :  { %1428 = vmatpush3.bf16.msra.mxu1 %v1518_v37 }
 0x6dd   :  { %1429 = vmatprep.subr.bf16.mxu1 %v1573_v43 }
 0x6e0   :  { %1430 = vmatpush3.bf16.msra.mxu1 %v1519_v38 }
 0x6e1   :  { %1431 = vmatprep.subr.bf16.mxu1 %v1573_v43 }
 0x6e4   :  { %1432 = vmatpush3.bf16.msra.mxu1 %v1520_v39 }
 0x6e5   :  { %1433 = vmatprep.subr.bf16.mxu1 %v1573_v43 }
 0x6e8   :  { %1434 = vmatpush3.bf16.msra.mxu1 %v1521_v40 }
 0x764   :  { %v944_v41 = vpop.xlane.xlu0 %943 }
 0x765   :  { %v947_v42 = vmul.f32 0.0078125, %v944_v41 }
 0x766   :  { %v946_v44 = vpop.xlane.xlu1 %945 }
 0x767   :  { %v949_v45 = vadd.f32 1e-06, %v947_v42  ;;  %v948_v47 = vmul.f32 0.0078125, %v946_v44 }
 0x769   :  { %1558 = vrsqrt.f32 %v949_v45  ;;  %v950_v50 = vadd.f32 1e-06, %v948_v47 }
 0x76b   :  { %1560 = vrsqrt.f32 %v950_v50 }
 0x773   :  { %v1559_v51 = vpop.eup %1558 }
 0x774   :  { %v953_v53 = vmul.f32 %v1559_v51, %v933_v29 }
 0x775   :  { %v1561_v54 = vpop.eup %1560 }
 0x776   :  { %v954_v55 = vmul.f32 %v1561_v54, %v936_v32  ;;  %v962_v56 = vmul.f32 %v1308_v52, %v953_v53 }
 0x778   :  { %v963_v57 = vmul.f32 %v1308_v52, %v954_v55  ;;  %964 = vst [vmem:[%s2101_s9] sm:$0xff] %v962_v56 }
 0x77a   :  { %965 = vst [vmem:[%s2101_s9 + $0x8] sm:$0xff] %v963_v57  ;;  %v966_v43 = vpack.c.bf16 %v963_v57, %v962_v56 }
 0x77c   :  { %1436 = vmatmul.mubr.bf16.vlgmr.msra.gmra.mrb[24].mxu1 %v966_v43 }
 0x84f   :  { %v1065_v58 = vpop.f32.mrb[24].mxu1 }
 0x850   :  { %v1437_v59 = vpop.f32.mrb[25].mxu1  ;;  %v1073_v60 = vsel %vm1072_vm11, %v1065_v58, -inf }
 0x851   :  { %1074 = vmax.xlane.f32.xlu0 %v1073_v60  ;;  %v1068_v61 = vpop.f32.mrb[26].mxu1 }
 0x852   :  { %v1438_v62 = vpop.f32.mrb[27].mxu1  ;;  %v1076_v63 = vsel %vm1072_vm11, %v1068_v61, -inf }
 0x855   :  { %1077 = vmax.xlane.f32.xlu0 %v1076_v63 }
 0x8de   :  { %v1075_v0 = vpop.xlane.xlu0 %1074 }
 0x8df   :  { %v1079_v1 = vsub.f32 %v1065_v58, %v1075_v0 }
 0x8e1   :  { %v1081_v2 = vmul.f32 1.442695, %v1079_v1 }
 0x8e2   :  { %v1078_v4 = vpop.xlane.xlu0 %1077 }
 0x8e3   :  { %1562 = vpow2.f32 %v1081_v2  ;;  %v1080_v46 = vsub.f32 %v1068_v61, %v1078_v4 }
 0x8e5   :  { %v1083_v6 = vmul.f32 1.442695, %v1080_v46 }
 0x8e7   :  { %1564 = vpow2.f32 %v1083_v6 }
 0x8ed   :  { %v1563_v7 = vpop.eup %1562 }
 0x8ee   :  { %v1085_v8 = vsel %vm1072_vm11, %v1563_v7, 0.0 }
 0x8ef   :  { %1086 = vadd.xlane.f32.xlu1 %v1085_v8 }
 0x8f1   :  { %v1565_v9 = vpop.eup %1564 }
 0x8f2   :  { %v1088_v10 = vsel %vm1072_vm11, %v1565_v9, 0.0 }
 0x8f3   :  { %1089 = vadd.xlane.f32.xlu0 %v1088_v10 }
 0x97c   :  { %v1087_v11 = vpop.xlane.xlu1 %1086 }
 0x97d   :  { %1566 = vrcp.f32 %v1087_v11 }
 0x980   :  { %v1090_v12 = vpop.xlane.xlu0 %1089 }
 0x981   :  { %1568 = vrcp.f32 %v1090_v12 }
 0x987   :  { %v1567_v13 = vpop.eup %1566 }
 0x988   :  { %v1092_v14 = vmul.f32 %v1567_v13, %v1563_v7 }
 0x98a   :  { %v1095_v15 = vsel %vm1072_vm11, %v1092_v14, -inf }
 0x98b   :  { %v1569_v16 = vpop.eup %1568  ;;  %1096 = vmax.xlane.f32.xlu1 %v1095_v15 }
 0x98c   :  { %v1094_v17 = vmul.f32 %v1569_v16, %v1565_v9 }
 0x98e   :  { %v1098_v18 = vsel %vm1072_vm11, %v1094_v17, -inf }
 0x98f   :  { %1099 = vmax.xlane.f32.xlu0 %v1098_v18 }
 0xa18   :  { %v1977_v19 = vpop.xlane.xlu1 %1096 }
 0xa19   :  { %vm1101_vm12 = vcmp.ge.f32.partialorder %v1092_v14, %v1977_v19 }
 0xa1a   :  { %v1103_v20 = vsel %vm1101_vm12, %v1732_v48, 4 }
 0xa1b   :  { %v1105_v22 = vsel %vm1072_vm11, %v1103_v20, 2147483647 }
 0xa1c   :  { %v1982_v23 = vpop.xlane.xlu0 %1099  ;;  %v1107_v49 = vshra.s32 %v1105_v22, 16  ;;  %v1106_v28 = vand.u32 65535, %v1105_v22 }
 0xa1d   :  { %vm1102_vm13 = vcmp.ge.f32.partialorder %v1094_v17, %v1982_v23 }
 0xa1e   :  { %v1109_v36 = vcvt.s32.f32 %v1107_v49  ;;  %v1104_v24 = vsel %vm1102_vm13, %v1732_v48, 4  ;;  %v1108_v30 = vcvt.s32.f32 %v1106_v28 }
 0xa1f   :  { %v1120_v25 = vsel %vm1072_vm11, %v1104_v24, 2147483647 }
 0xa20   :  { %1110 = vmin.xlane.f32.xlu1 %v1109_v36  ;;  %v1122_v26 = vshra.s32 %v1120_v25, 16  ;;  %v1121_v31 = vand.u32 65535, %v1120_v25 }
 0xa22   :  { %v1124_v27 = vcvt.s32.f32 %v1122_v26  ;;  %v1123_v34 = vcvt.s32.f32 %v1121_v31 }
 0xa24   :  { %1125 = vmin.xlane.f32.xlu0 %v1124_v27 }
 0xaad   :  { %v1111_v29 = vpop.xlane.xlu1 %1110 }
 0xaae   :  { %vm1112_vm14 = vcmp.eq.f32.partialorder %v1109_v36, %v1111_v29  ;;  %v1117_v3 = vcvt.f32.s32 %v1111_v29 }
 0xaaf   :  { %v1113_v32 = vsel %vm1112_vm14, %v1108_v30, inf  ;;  %vm1239_vm14 = vcmask 7168  }
 0xab0   :  { %1114 = vmin.xlane.f32.xlu1 %v1113_v32  ;;  %v1118_v37 = vshll.u32 %v1117_v3, 16 }
 0xab1   :  { %v1126_v33 = vpop.xlane.xlu0 %1125 }
 0xab2   :  { %vm1127_vm15 = vcmp.eq.f32.partialorder %v1124_v27, %v1126_v33  ;;  %v1132_v39 = vcvt.f32.s32 %v1126_v33 }
 0xab3   :  { %v1128_v35 = vsel %vm1127_vm15, %v1123_v34, inf }
 0xab4   :  { %1129 = vmin.xlane.f32.xlu0 %v1128_v35  ;;  %v1133_v42 = vshll.u32 %v1132_v39, 16 }
 0xb3d   :  { %v1115_v5 = vpop.xlane.xlu1 %1114 }
 0xb3e   :  { %v1116_v38 = vcvt.f32.s32 %v1115_v5 }
 0xb40   :  { %v1987_v40 = vadd.s32 %v1118_v37, %v1116_v38 }
 0xb41   :  { %v1130_v41 = vpop.xlane.xlu0 %1129 }
 0xb42   :  { %v1131_v44 = vcvt.f32.s32 %v1130_v41  ;;  %vm1159_vm0 = vcmp.eq.s32.totalorder %v1732_v48, %v1987_v40  ;;  %vm1135_vm6 = vcmp.eq.s32.totalorder %v1987_v40, 0  ;;  %vm1141_vm7 = vcmp.eq.s32.totalorder %v1987_v40, 1 }
 0xb43   :  { %v1165_v45 = vsel %vm1159_vm0, -inf, %v1092_v14  ;;  %vm1147_vm8 = vcmp.eq.s32.totalorder %v1987_v40, 2  ;;  %vm1153_vm9 = vcmp.eq.s32.totalorder %v1987_v40, 3  ;;  %v1137_v11 = vsel %vm1135_vm6, %v1977_v19, 0.0 }
 0xb44   :  { %v1994_v47 = vadd.s32 %v1133_v42, %v1131_v44  ;;  %v1167_v50 = vsel %vm1072_vm11, %v1165_v45, -inf  ;;  %v1143_v12 = vsel %vm1141_vm7, %v1977_v19, 0.0  ;;  %v1149_v13 = vsel %vm1147_vm8, %v1977_v19, 0.0 }
 0xb45   :  { %1168 = vmax.xlane.f32.xlu1 %v1167_v50  ;;  %v1155_v14 = vsel %vm1153_vm9, %v1977_v19, 0.0  ;;  %v1161_v15 = vsel %vm1159_vm0, 1, %v1570_v21 }
 0xb46   :  { %vm1160_vm1 = vcmp.eq.s32.totalorder %v1732_v48, %v1994_v47  ;;  %vm1136_vm10 = vcmp.eq.s32.totalorder %v1994_v47, 0  ;;  %vm1142_vm12 = vcmp.eq.s32.totalorder %v1994_v47, 1  ;;  %vm1148_vm13 = vcmp.eq.s32.totalorder %v1994_v47, 2 }
 0xb47   :  { %v1166_v51 = vsel %vm1160_vm1, -inf, %v1094_v17  ;;  %v1138_v30 = vsel %vm1136_vm10, %v1982_v23, 0.0  ;;  %v1163_v31 = vsel %vm1159_vm0, %v1161_v15, 0  ;;  %v1144_v33 = vsel %vm1142_vm12, %v1982_v23, 0.0 }
 0xb48   :  { %v1170_v52 = vsel %vm1072_vm11, %v1166_v51, -inf  ;;  %v1150_v34 = vsel %vm1148_vm13, %v1982_v23, 0.0  ;;  %v1162_v3 = vsel %vm1160_vm1, 1, %v1570_v21 }
 0xb49   :  { %1171 = vmax.xlane.f32.xlu0 %v1170_v52  ;;  %v1164_v44 = vsel %vm1160_vm1, %v1162_v3, 0  ;;  %vm1257_vm1 = vcmask 24576  }
 0xbd2   :  { %v1169_v53 = vpop.xlane.xlu1 %1168 }
 0xbd3   :  { %vm1173_vm2 = vcmp.ge.f32.partialorder %v1165_v45, %v1169_v53 }
 0xbd4   :  { %v1175_v54 = vsel %vm1173_vm2, %v1732_v48, 4 }
 0xbd5   :  { %v1177_v55 = vsel %vm1072_vm11, %v1175_v54, 2147483647 }
 0xbd6   :  { %v1179_v56 = vshra.s32 %v1177_v55, 16  ;;  %v2005_v57 = vpop.xlane.xlu0 %1171  ;;  %v1178_v62 = vand.u32 65535, %v1177_v55 }
 0xbd7   :  { %vm1174_vm3 = vcmp.ge.f32.partialorder %v1166_v51, %v2005_v57 }
 0xbd8   :  { %v1181_v43 = vcvt.s32.f32 %v1179_v56  ;;  %v1176_v58 = vsel %vm1174_vm3, %v1732_v48, 4  ;;  %v1180_v0 = vcvt.s32.f32 %v1178_v62 }
 0xbd9   :  { %v1192_v59 = vsel %vm1072_vm11, %v1176_v58, 2147483647 }
 0xbda   :  { %1182 = vmin.xlane.f32.xlu1 %v1181_v43  ;;  %v1194_v60 = vshra.s32 %v1192_v59, 16  ;;  %v1193_v2 = vand.u32 65535, %v1192_v59 }
 0xbdc   :  { %v1196_v61 = vcvt.s32.f32 %v1194_v60  ;;  %v1195_v46 = vcvt.s32.f32 %v1193_v2 }
 0xbde   :  { %1197 = vmin.xlane.f32.xlu0 %v1196_v61 }
 0xc67   :  { %v1183_v63 = vpop.xlane.xlu1 %1182 }
 0xc68   :  { %vm1184_vm4 = vcmp.eq.f32.partialorder %v1181_v43, %v1183_v63  ;;  %v1189_v7 = vcvt.f32.s32 %v1183_v63 }
 0xc69   :  { %v1185_v1 = vsel %vm1184_vm4, %v1180_v0, inf }
 0xc6a   :  { %1186 = vmin.xlane.f32.xlu1 %v1185_v1  ;;  %v1190_v9 = vshll.u32 %v1189_v7, 16 }
 0xc6b   :  { %v1198_v4 = vpop.xlane.xlu0 %1197 }
 0xc6c   :  { %vm1199_vm5 = vcmp.eq.f32.partialorder %v1196_v61, %v1198_v4  ;;  %v1204_v17 = vcvt.f32.s32 %v1198_v4 }
 0xc6d   :  { %v1200_v6 = vsel %vm1199_vm5, %v1195_v46, inf  ;;  %vm1154_vm5 = vcmp.eq.s32.totalorder %v1994_v47, 3 }
 0xc6e   :  { %1201 = vmin.xlane.f32.xlu0 %v1200_v6  ;;  %v1205_v27 = vshll.u32 %v1204_v17, 16  ;;  %v1156_v35 = vsel %vm1154_vm5, %v1982_v23, 0.0 }
 0xcf7   :  { %v1187_v8 = vpop.xlane.xlu1 %1186 }
 0xcf8   :  { %v1188_v10 = vcvt.f32.s32 %v1187_v8 }
 0xcfa   :  { %v1191_v16 = vadd.s32 %v1190_v9, %v1188_v10 }
 0xcfb   :  { %v1202_v49 = vpop.xlane.xlu0 %1201 }
 0xcfc   :  { %vm1207_vm15 = vcmp.eq.s32.totalorder %v1191_v16, 0  ;;  %vm1213_vm2 = vcmp.eq.s32.totalorder %v1191_v16, 1  ;;  %vm1219_vm3 = vcmp.eq.s32.totalorder %v1191_v16, 2  ;;  %vm1225_vm4 = vcmp.eq.s32.totalorder %v1191_v16, 3 }
 0xcfd   :  { %v1209_v18 = vsel %vm1207_vm15, %v1169_v53, 0.0  ;;  %v1215_v19 = vsel %vm1213_vm2, %v1169_v53, 0.0  ;;  %v1221_v20 = vsel %vm1219_vm3, %v1169_v53, 0.0  ;;  %v1227_v22 = vsel %vm1225_vm4, %v1169_v53, 0.0 }
 0xcfe   :  { %v1211_v36 = vadd.f32 %v1209_v18, %v1137_v11  ;;  %v1217_v24 = vadd.f32 %v1215_v19, %v1143_v12  ;;  %v1223_v25 = vadd.f32 %v1221_v20, %v1149_v13  ;;  %v1229_v26 = vadd.f32 %v1227_v22, %v1155_v14 }
 0xcff   :  { %vm1231_vm6 = vcmp.eq.s32.totalorder %v1732_v48, %v1191_v16  ;;  %v1203_v28 = vcvt.f32.s32 %v1202_v49 }
 0xd00   :  { %v1233_v29 = vsel %vm1231_vm6, 1, %v1570_v21  ;;  %1240 = vst.msk [vmem:[%s2102_s11] sm:$0xff] %vm1239_vm14, %v1211_v36  ;;  %1242 = vst.msk [vmem:[%s2102_s11 + $0x10] sm:$0xff] %vm1239_vm14, %v1217_v24 }
 0xd01   :  { %1244 = vst.msk [vmem:[%s2102_s11 + $0x20] sm:$0xff] %vm1239_vm14, %v1223_v25  ;;  %1246 = vst.msk [vmem:[%s2102_s11 + $0x30] sm:$0xff] %vm1239_vm14, %v1229_v26  ;;  %v1206_v32 = vadd.s32 %v1205_v27, %v1203_v28  ;;  %vm1235_vm7 = vcmp.gt.s32.totalorder %v1163_v31, %v1233_v29 }
 0xd02   :  { %v1236_v45 = vsel %vm1235_vm7, %v1163_v31, %v1233_v29 }
 0xd03   :  { %vm1208_vm8 = vcmp.eq.s32.totalorder %v1206_v32, 0  ;;  %vm1214_vm9 = vcmp.eq.s32.totalorder %v1206_v32, 1  ;;  %vm1220_vm0 = vcmp.eq.s32.totalorder %v1206_v32, 2  ;;  %vm1226_vm10 = vcmp.eq.s32.totalorder %v1206_v32, 3 }
 0xd04   :  { %v1210_v5 = vsel %vm1208_vm8, %v2005_v57, 0.0  ;;  %v1216_v37 = vsel %vm1214_vm9, %v2005_v57, 0.0  ;;  %v1222_v38 = vsel %vm1220_vm0, %v2005_v57, 0.0  ;;  %v1228_v23 = vsel %vm1226_vm10, %v2005_v57, 0.0 }
 0xd05   :  { %v1212_v39 = vadd.f32 %v1210_v5, %v1138_v30  ;;  %v1218_v40 = vadd.f32 %v1216_v37, %v1144_v33  ;;  %v1224_v41 = vadd.f32 %v1222_v38, %v1150_v34  ;;  %v1230_v42 = vadd.f32 %v1228_v23, %v1156_v35 }
 0xd06   :  { %vm1232_vm12 = vcmp.eq.s32.totalorder %v1732_v48, %v1206_v32  ;;  %v1248_v48 = vsel %vm1072_vm11, %v1236_v45, 0 }
 0xd07   :  { %v1234_v50 = vsel %vm1232_vm12, 1, %v1570_v21  ;;  %1241 = vst.msk [vmem:[%s2102_s11 + $0x8] sm:$0xff] %vm1239_vm14, %v1212_v39  ;;  %1243 = vst.msk [vmem:[%s2102_s11 + $0x18] sm:$0xff] %vm1239_vm14, %v1218_v40 }
 0xd08   :  { %1245 = vst.msk [vmem:[%s2102_s11 + $0x28] sm:$0xff] %vm1239_vm14, %v1224_v41  ;;  %vm1237_vm13 = vcmp.gt.s32.totalorder %v1164_v44, %v1234_v50  ;;  %1247 = vst.msk [vmem:[%s2102_s11 + $0x38] sm:$0xff] %vm1239_vm14, %v1230_v42 }
 0xd09   :  { %v1238_v21 = vsel %vm1237_vm13, %v1164_v44, %v1234_v50 }
 0xd0a   :  { %v1249_v47 = vsel %vm1072_vm11, %v1238_v21, 0 }
 0xd0b   :  { %v1250_v51 = vadd.s32 %v1249_v47, %v1248_v48 }
 0xd0d   :  { %v1251_v52 = vrot.slane %v1250_v51, 4 }
 0xd0f   :  { %v1252_v53 = vadd.s32 %v1251_v52, %v1250_v51 }
 0xd11   :  { %v1253_v54 = vrot.slane %v1252_v53, 2 }
 0xd13   :  { %v1254_v55 = vadd.s32 %v1253_v54, %v1252_v53 }
 0xd15   :  { %v1255_v56 = vrot.slane %v1254_v55, 1 }
 0xd17   :  { %v1256_v57 = vadd.s32 %v1255_v56, %v1254_v55 }
 0xd19   :  { %1258 = vst.msk [vmem:[%s2103_s12] sm:$0x1] %vm1257_vm1, %v1256_v57 }

// kernel: xverse_model_forward.9
= control target key start
LH: loop header
LB: loop body
LE: loop exit
PB: predicated region body
PF: predicated region fallthrough
CT: control target
= control target key end

     0   :  { %8 = vsyncpa [#allocation3], 0  ;;  %s198_s0 = inlined_call_operand.hbm [shape: f32[16,128], index: 0, kind: input, shape index: {}, may-alias: {0,3}]   ;;  %s199_s1 = inlined_call_operand.vmem [shape: f32[16,128], index: 1, kind: input, shape index: {}]   ;;  %s200_s2 = inlined_call_operand.vmem [shape: f32[1,128], index: 2, kind: input, shape index: {}]   ;;  %s201_s3 = inlined_call_operand.hbm [shape: f32[16,128], index: 3, kind: output, shape index: {}, may-alias: {0,3}]  }
   0x1   :  { %9 = vsyncpa [#allocation4], 0  ;;  %s135_s12 = smov [#allocation2]   ;;  %s87_s16 = scalar_lea.hbm %s198_s0, 256 }
   0x2   :  { %s15_s13 = sshll.u32 %s135_s12, 4  ;;  %p88_p0 = scmp.ne.s32.totalorder %s198_s0, %s87_s16  ;;  %s16_s13 = int_to_ptr.vmem [resolvable:$true] %s15_s13 }
   0x3   :  { %p91_p1 = scmp.lt.u32.totalorder %s87_s16, %s198_s0 }
   0x5   :  { %p93_p2 = pnand %p91_p1, %p88_p0 }
   0x7   :  { %96 = shalt.err (!%p93_p2)
}
   0x8   :  { %s97_s21 = scalar_lea.vmem %s16_s13, 256  ;;  %p102_p4 = scmp.lt.s32.totalorder %s16_s13, %s16_s13 }
   0x9   :  { %p98_p3 = scmp.ne.s32.totalorder %s16_s13, %s97_s21  ;;  %p103_p5 = scmp.lt.s32.totalorder %s97_s21, %s97_s21 }
   0xb   :  { %p104_p6 = por %p103_p5, %p102_p4 }
   0xd   :  { %p105_p7 = pnand %p104_p6, %p98_p3 }
   0xf   :  { %108 = shalt.err (!%p105_p7)
}
  0x10   :  { %s136_s22 = smov 128   ;;  %s137_s23 = smov 8  }
  0x11   :  { %21 = dma.hbm_to_vmem [thread:$0]  %s198_s0, 256, %s16_s13, [#allocation3], %s136_s22, %s136_s22, %s137_s23  }
  0x12   :  { %131 = dma.done.wait [#allocation3], 256  }
  0x13   :  { %132 = vsyncadd [#allocation3], 4294967040  ;;  %v29_v0 = vld [vmem:[#allocation2] sm:$0xff]  ;;  %v30_v2 = vld [vmem:[#allocation2 + $0x8] sm:$0xff] }
  0x14   :  { %v31_v1 = vld [vmem:[%s199_s1] sm:$0xff]  ;;  %v32_v4 = vld [vmem:[%s199_s1 + $0x8] sm:$0xff]  ;;  %s138_s1 = smov [#allocation5]  }
  0x15   :  { %v33_v3 = vadd.f32 %v31_v1, %v29_v0  ;;  %v34_v5 = vadd.f32 %v32_v4, %v30_v2  ;;  %v78_v15 = vld [vmem:[%s200_s2] ss:$0 sm:$0xff]  ;;  %s66_s4 = sshll.u32 %s138_s1, 4  ;;  %s67_s4 = int_to_ptr.vmem [resolvable:$true] %s66_s4 }
  0x16   :  { %s109_s5 = scalar_lea.vmem %s67_s4, 256  ;;  %p114_p9 = scmp.lt.s32.totalorder %s67_s4, %s67_s4 }
  0x17   :  { %v35_v6 = vmul.f32 %v33_v3, %v33_v3  ;;  %v36_v7 = vmul.f32 %v34_v5, %v34_v5  ;;  %p110_p8 = scmp.ne.s32.totalorder %s67_s4, %s109_s5  ;;  %p115_p10 = scmp.lt.s32.totalorder %s109_s5, %s109_s5 }
  0x19   :  { %37 = vadd.xlane.f32.xlu0 %v35_v6  ;;  %p116_p11 = por %p115_p10, %p114_p9 }
  0x1b   :  { %p117_p12 = pnand %p116_p11, %p110_p8 }
  0x1d   :  { %39 = vadd.xlane.f32.xlu0 %v36_v7 }
  0xa6   :  { %v38_v8 = vpop.xlane.xlu0 %37 }
  0xa7   :  { %v42_v9 = vmul.f32 0.0078125, %v38_v8 }
  0xa9   :  { %v44_v10 = vadd.f32 1e-06, %v42_v9 }
  0xaa   :  { %v40_v11 = vpop.xlane.xlu0 %39 }
  0xab   :  { %83 = vrsqrt.f32 %v44_v10  ;;  %v43_v12 = vmul.f32 0.0078125, %v40_v11 }
  0xad   :  { %v45_v13 = vadd.f32 1e-06, %v43_v12 }
  0xaf   :  { %85 = vrsqrt.f32 %v45_v13 }
  0xb5   :  { %v84_v14 = vpop.eup %83 }
  0xb6   :  { %v48_v16 = vmul.f32 %v84_v14, %v33_v3 }
  0xb8   :  { %v57_v17 = vmul.f32 %v78_v15, %v48_v16 }
  0xb9   :  { %v86_v18 = vpop.eup %85 }
  0xba   :  { %v49_v19 = vmul.f32 %v86_v18, %v34_v5  ;;  %59 = vst [vmem:[#allocation5] sm:$0xff] %v57_v17 }
  0xbc   :  { %v58_v20 = vmul.f32 %v78_v15, %v49_v19 }
  0xbe   :  { %60 = vst [vmem:[#allocation5 + $0x8] sm:$0xff] %v58_v20 }
  0xbf   :  { %120 = shalt.err (!%p117_p12)
}
  0xc0   :  { %s121_s2 = scalar_lea.hbm %s201_s3, 256 }
  0xc1   :  { %p122_p13 = scmp.ne.s32.totalorder %s201_s3, %s121_s2  ;;  %p125_p0 = scmp.lt.u32.totalorder %s121_s2, %s201_s3 }
  0xc3   :  { %p127_p1 = pnand %p125_p0, %p122_p13 }
  0xc5   :  { %130 = shalt.err (!%p127_p1)
}
  0xc6   :  { %72 = dma.vmem_to_hbm [thread:$0]  %s67_s4, 256, %s201_s3, [#allocation4], %s136_s22, %s136_s22, %s137_s23  }
  0xc7   :  { %133 = dma.done.wait [#allocation4], 256  }
  0xc8   :  { %134 = vsyncadd [#allocation4], 4294967040 }
  0xc9   :  { %76 = vsyncpa [#allocation3], 1 }
  0xca   :  { %77 = vsyncpa [#allocation4], 1 }

</bundles_post_ra>
